<compile_context>
chip_gen: v6e
topology: v6e:2x2x1
jax: 0.10.0
libtpu: 0.0.40
codegen_flags: <defaults>
</compile_context>

<pallas_src>
import jax
import jax.numpy as jnp
from jax.experimental import pallas as pl
from jax.experimental.pallas import tpu as pltpu

LANE = 128      # TPU lane width: channel dims are padded to a multiple of this
SUBLANE = 8     # TPU sublane width: working width padded to a multiple of this


def _round_up(v, m):
    return (v + m - 1) // m * m


# --------------------------- parameter preparation ---------------------------

def prepare_params(w1, s1, b1, w2, s2, b2, w3, s3, b3,
                   compute_dtype=jnp.bfloat16):
    """One-time transform: fold eval-mode BN scale into conv weights, zero-pad
    channels to the lane width, cast weights to the MXU compute dtype.

    w1: (Cin, Cmid) 1x1 conv.  w2: (3, 3, Cmid, Cmid) HWIO.  w3: (Cmid, Cout).
    s*/b*: folded BatchNorm scale/bias per output channel (f32).
    """
    cin, cmid = w1.shape
    cout = w3.shape[1]
    Cin, Cmid, Cout = (_round_up(c, LANE) for c in (cin, cmid, cout))

    # fold BN scale into the conv output channels (exact in eval mode)
    w1f = w1 * s1[None, :]
    w2f = w2 * s2[None, None, None, :]
    w3f = w3 * s3[None, :]

    w1p = jnp.pad(w1f, ((0, Cin - cin), (0, Cmid - cmid))).astype(compute_dtype)
    w2p = jnp.pad(w2f, ((0, 0), (0, 0), (0, Cmid - cmid), (0, Cmid - cmid)))
    w2p = w2p.reshape(9, Cmid, Cmid).astype(compute_dtype)
    w3p = jnp.pad(w3f, ((0, Cmid - cmid), (0, Cout - cout))).astype(compute_dtype)

    b1p = jnp.pad(b1, (0, Cmid - cmid)).reshape(1, Cmid).astype(jnp.float32)
    b2p = jnp.pad(b2, (0, Cmid - cmid)).reshape(1, Cmid).astype(jnp.float32)
    b3p = jnp.pad(b3, (0, Cout - cout)).reshape(1, Cout).astype(jnp.float32)
    return (w1p, b1p, w2p, b2p, w3p, b3p)


def _choose_row_tile(H, row_tile, dil):
    """Largest divisor of H that is <= row_tile and >= dil.

    Bounds the h1/halo scratch even for odd ASPP sizes (65/97/129) instead of the
    previous silent TH=H fallback.  TODO(synk): cdiv + masked last tile instead.
    """
    for t in range(min(row_tile, H), 0, -1):
        if H % t == 0 and t >= dil:
            return t
    return H


# ------------------------------ fused kernel ---------------------------------

def _fused_bottleneck_call(xp, w1, b1, w2, b2, w3, b3, *, dilation, row_tile, w_valid):
    N, H, W_pad, Cin = xp.shape
    Cmid = w1.shape[1]
    Cout = w3.shape[1]
    dil = int(dilation)
    assert W_pad % SUBLANE == 0 and 0 < w_valid <= W_pad
    assert Cin == Cout, "identity residual requires inplanes == planes * expansion"

    TH = _choose_row_tile(H, row_tile, dil)
    nH = H // TH

    pad_l = _round_up(dil, SUBLANE)      # sublane-aligned left halo offset in h1
    pad_r = _round_up(dil, SUBLANE)
    Wh = pad_l + W_pad + pad_r           # h1 scratch width (image + zero frame)
    SLAB = TH + 2 * dil                  # h1 scratch rows (body + conv2 row halo)
    c0 = pad_l - dil                     # column of the first conv2 tap

    def kernel(xt_ref, x_hbm, w1_ref, b1_ref, w2_ref, b2_ref, w3_ref, b3_ref,
               o_ref, h1_ref, halo_ref, sem):
        # xt_ref  : (TH, W_pad, Cin)  bf16, auto-pipelined body rows (also residual)
        # x_hbm   : (N, H, W_pad, Cin) in HBM; only the dil-row halos are DMA'd
        # h1_ref  : (SLAB, Wh, Cmid)  bf16 conv1 output with zero conv2 frame
        # halo_ref: (2*dil, W_pad, Cin) bf16 landing buffer for the halo DMAs
        n = pl.program_id(0)
        i = pl.program_id(1)
        r0 = pl.multiple_of(i * TH, TH)

        # ---- kick off halo-row DMAs so they overlap the body conv1 ----------
        @pl.when(i > 0)
        def _():
            pltpu.make_async_copy(x_hbm.at[n, pl.ds(r0 - dil, dil)],
                                  halo_ref.at[pl.ds(0, dil)], sem.at[0]).start()

        @pl.when(i < nH - 1)
        def _():
            pltpu.make_async_copy(x_hbm.at[n, pl.ds(r0 + TH, dil)],
                                  halo_ref.at[pl.ds(dil, dil)], sem.at[1]).start()

        def conv1(x2d):
            y = jnp.dot(x2d, w1_ref[...], preferred_element_type=jnp.float32)
            return jnp.maximum(y + b1_ref[...], 0.0)

        # ---- conv1 (1x1) + bn1 + relu on the resident body rows -------------
        xb = xt_ref[...].reshape(TH * W_pad, Cin)
        h1_ref[dil:dil + TH, pad_l:pad_l + W_pad, :] = (
            conv1(xb).reshape(TH, W_pad, Cmid).astype(h1_ref.dtype))

        # ---- conv1 on the recomputed dil-row halos (streamed from HBM) ------
        @pl.when(i > 0)
        def _():
            pltpu.make_async_copy(x_hbm.at[n, pl.ds(r0 - dil, dil)],
                                  halo_ref.at[pl.ds(0, dil)], sem.at[0]).wait()
            xt = halo_ref[0:dil].reshape(dil * W_pad, Cin)
            h1_ref[0:dil, pad_l:pad_l + W_pad, :] = (
                conv1(xt).reshape(dil, W_pad, Cmid).astype(h1_ref.dtype))

        @pl.when(i < nH - 1)
        def _():
            pltpu.make_async_copy(x_hbm.at[n, pl.ds(r0 + TH, dil)],
                                  halo_ref.at[pl.ds(dil, dil)], sem.at[1]).wait()
            xt = halo_ref[dil:2 * dil].reshape(dil * W_pad, Cin)
            h1_ref[dil + TH:SLAB, pad_l:pad_l + W_pad, :] = (
                conv1(xt).reshape(dil, W_pad, Cmid).astype(h1_ref.dtype))

        # ---- zero only the conv2 halo frame (not the whole scratch) ---------
        @pl.when(i == 0)                                 # image top border
        def _():
            h1_ref[0:dil, :, :] = jnp.zeros((dil, Wh, Cmid), h1_ref.dtype)

        @pl.when(i == nH - 1)                            # image bottom border
        def _():
            h1_ref[dil + TH:SLAB, :, :] = jnp.zeros((dil, Wh, Cmid), h1_ref.dtype)

        h1_ref[:, 0:pad_l, :] = jnp.zeros((SLAB, pad_l, Cmid), h1_ref.dtype)
        h1_ref[:, pad_l + w_valid:, :] = jnp.zeros(
            (SLAB, Wh - pad_l - w_valid, Cmid), h1_ref.dtype)

        # ---- conv2 (3x3 dilated) + bn2 + relu: value accumulation ------------
        # first tap is an assignment; no f32 VMEM accumulator read-modify-write
        y2 = None
        for ky in range(3):
            for kx in range(3):
                patch = h1_ref[ky * dil:ky * dil + TH,
                               c0 + kx * dil:c0 + kx * dil + W_pad, :]
                t = jnp.dot(patch.reshape(TH * W_pad, Cmid), w2_ref[ky * 3 + kx],
                            preferred_element_type=jnp.float32)
                y2 = t if y2 is None else y2 + t
        y2 = jnp.maximum(y2 + b2_ref[...], 0.0).astype(w3_ref.dtype)

        # ---- conv3 (1x1) + bn3 + residual + relu ------------------------------
        y3 = jnp.dot(y2, w3_ref[...], preferred_element_type=jnp.float32)
        res = xt_ref[...].reshape(TH * W_pad, Cout).astype(jnp.float32)
        y3 = jnp.maximum(y3 + b3_ref[...] + res, 0.0)
        o_ref[...] = y3.reshape(TH, W_pad, Cout).astype(o_ref.dtype)

    out = pl.pallas_call(
        kernel,
        out_shape=jax.ShapeDtypeStruct((N, H, W_pad, Cout), xp.dtype),
        grid=(N, nH),
        in_specs=[
            pl.BlockSpec((None, TH, W_pad, Cin), lambda n, i: (n, i, 0, 0)),  # x body rows
            pl.BlockSpec(memory_space=pl.ANY),                                # x in HBM (halos)
            pl.BlockSpec((Cin, Cmid),     lambda n, i: (0, 0)),               # w1 (scale-folded)
            pl.BlockSpec((1, Cmid),       lambda n, i: (0, 0)),               # b1
            pl.BlockSpec((9, Cmid, Cmid), lambda n, i: (0, 0, 0)),            # w2 (scale-folded)
            pl.BlockSpec((1, Cmid),       lambda n, i: (0, 0)),               # b2
            pl.BlockSpec((Cmid, Cout),    lambda n, i: (0, 0)),               # w3 (scale-folded)
            pl.BlockSpec((1, Cout),       lambda n, i: (0, 0)),               # b3
        ],
        out_specs=pl.BlockSpec((None, TH, W_pad, Cout), lambda n, i: (n, i, 0, 0)),
        scratch_shapes=[
            pltpu.VMEM((SLAB, Wh, Cmid), xp.dtype),        # conv1 out + zero frame
            pltpu.VMEM((2 * dil, W_pad, Cin), xp.dtype),   # halo-row landing buffer
            pltpu.SemaphoreType.DMA((2,)),                 # top / bottom halo DMAs
        ],
        compiler_params=pltpu.CompilerParams(
            dimension_semantics=("parallel", "parallel"),
            # leave headroom under v7x's 64 MiB/TC; raise with row_tile on v5e/v6e
            vmem_limit_bytes=48 * 1024 * 1024),
    )(xp, xp, w1, b1, w2, b2, w3, b3)
    return out


def bottleneck_forward_padded(xp, padded_params, *, dilation=1, row_tile=16,
                              w_valid=None):
    """xp: lane/sublane-padded bf16 NHWC activations.  In a full network this
    padded layout is carried between blocks, so no per-block pad/cast/slice."""
    w1, b1, w2, b2, w3, b3 = padded_params
    if w_valid is None:
        w_valid = xp.shape[2]
    return _fused_bottleneck_call(xp, w1, b1, w2, b2, w3, b3,
                                  dilation=dilation, row_tile=row_tile,
                                  w_valid=w_valid)


def bottleneck_forward(x, S, padded_params, dilation=1, row_tile=16):
    """Convenience boundary wrapper: unpadded f32 NHWC in, unpadded out, S untouched."""
    w1 = padded_params[0]
    N, H, W, cin = x.shape
    Cin = w1.shape[0]
    W_pad = _round_up(W, SUBLANE)
    xp = x
    if W_pad != W or Cin != cin:
        xp = jnp.pad(xp, ((0, 0), (0, 0), (0, W_pad - W), (0, Cin - cin)))
    xp = xp.astype(w1.dtype)
    out_p = bottleneck_forward_padded(xp, padded_params, dilation=dilation,
                                      row_tile=row_tile, w_valid=W)
    return [out_p[:, :, :W, :cin], S]


# ----------------------------------- main -------------------------------------

if __name__ == "__main__":
    key = jax.random.PRNGKey(0)
    keys = jax.random.split(key, 8)

    N, H, W = 2, 16, 16
    planes = 4
    inplanes = planes * 4          # identity residual: inplanes == planes * expansion
    dilation = 2                   # layer3-style dilated conv2 (exercises the halo path)
    row_tile = 8                   # 2 row tiles per image: halos + both image borders hit

    x = jax.random.normal(keys[0], (N, H, W, inplanes), jnp.float32)   # NHWC
    S = jax.random.normal(keys[1], (N, H, W, 1), jnp.float32)          # depth, carried through

    def bn_fold(k, c):
        k1, k2, k3, k4 = jax.random.split(k, 4)
        gamma = 1.0 + 0.1 * jax.random.normal(k1, (c,), jnp.float32)
        beta = 0.1 * jax.random.normal(k2, (c,), jnp.float32)
        mean = 0.1 * jax.random.normal(k3, (c,), jnp.float32)
        var = jax.random.uniform(k4, (c,), jnp.float32, minval=0.5, maxval=1.5)
        scale = gamma / jnp.sqrt(var + 1e-5)
        bias = beta - mean * scale
        return scale, bias

    w1 = 0.2 * jax.random.normal(keys[2], (inplanes, planes), jnp.float32)      # conv1 1x1
    w2 = 0.2 * jax.random.normal(keys[3], (3, 3, planes, planes), jnp.float32)  # conv2 3x3 HWIO
    w3 = 0.2 * jax.random.normal(keys[4], (planes, planes * 4), jnp.float32)    # conv3 1x1
    s1, b1 = bn_fold(keys[5], planes)
    s2, b2 = bn_fold(keys[6], planes)
    s3, b3 = bn_fold(keys[7], planes * 4)

    params = prepare_params(w1, s1, b1, w2, s2, b2, w3, s3, b3)
    out, S_out = bottleneck_forward(x, S, params, dilation=dilation, row_tile=row_tile)
    out = jax.block_until_ready(out)

    # ---- pure-JAX reference with the same folded-bf16 weights / casts ----
    w1p, b1p, w2p, b2p, w3p, b3p = params
    Cin_p, Cmid_p = w1p.shape
    xb = jnp.pad(x, ((0, 0), (0, 0), (0, 0), (0, Cin_p - inplanes))).astype(jnp.bfloat16)

    def conv(t, w, pad=0, dil=1):
        return jax.lax.conv_general_dilated(
            t, w, (1, 1), [(pad, pad), (pad, pad)],
            rhs_dilation=(dil, dil),
            dimension_numbers=('NHWC', 'HWIO', 'NHWC'),
            preferred_element_type=jnp.float32)

    h1 = jnp.maximum(conv(xb, w1p[None, None]) + b1p, 0.0).astype(jnp.bfloat16)
    h2 = jnp.maximum(conv(h1, w2p.reshape(3, 3, Cmid_p, Cmid_p),
                          pad=dilation, dil=dilation) + b2p, 0.0).astype(jnp.bfloat16)
    ref = jnp.maximum(conv(h2, w3p[None, None]) + b3p + xb.astype(jnp.float32), 0.0)
    ref = ref[..., :inplanes]

    out_f32 = out.astype(jnp.float32)
    max_err = float(jnp.max(jnp.abs(out_f32 - ref)))
    assert jnp.allclose(out_f32, ref, atol=2e-2, rtol=2e-2), max_err
    assert jnp.allclose(S_out, S)
    print("KERNEL_OK")
</pallas_src>

<mosaic_0001>
module attributes {stable_mosaic.version = 11 : i64} {
  func.func @kernel(%arg0: i32, %arg1: i32, %arg2: memref<1x8x16x128xbf16, #tpu.memory_space<vmem>>, %arg3: memref<2x16x16x128xbf16, #tpu.memory_space<any>>, %arg4: memref<128x128xbf16, #tpu.memory_space<vmem>>, %arg5: memref<1x128xf32, #tpu.memory_space<vmem>>, %arg6: memref<9x128x128xbf16, #tpu.memory_space<vmem>>, %arg7: memref<1x128xf32, #tpu.memory_space<vmem>>, %arg8: memref<128x128xbf16, #tpu.memory_space<vmem>>, %arg9: memref<1x128xf32, #tpu.memory_space<vmem>>, %arg10: memref<1x8x16x128xbf16, #tpu.memory_space<vmem>>, %arg11: memref<12x32x128xbf16, #tpu.memory_space<vmem>>, %arg12: memref<4x16x128xbf16, #tpu.memory_space<vmem>>, %arg13: memref<2x!tpu.dma_semaphore, #tpu.memory_space<semaphore_mem>>) attributes {dimension_semantics = [#tpu.dimension_semantics<parallel>, #tpu.dimension_semantics<parallel>], iteration_bounds = array<i64: 2, 2>, scalar_prefetch = 0 : i64, scratch_operands = 3 : i64, tpu.core_type = #tpu.core_type<tc>, window_params = [{transform_indices = @transform_0, window_bounds = array<i64: 1, 8, 16, 128>}, {}, {pipeline_mode = #tpu.pipeline_mode<synchronous>, transform_indices = @transform_2, window_bounds = array<i64: 128, 128>}, {pipeline_mode = #tpu.pipeline_mode<synchronous>, transform_indices = @transform_3, window_bounds = array<i64: 1, 128>}, {pipeline_mode = #tpu.pipeline_mode<synchronous>, transform_indices = @transform_4, window_bounds = array<i64: 9, 128, 128>}, {pipeline_mode = #tpu.pipeline_mode<synchronous>, transform_indices = @transform_5, window_bounds = array<i64: 1, 128>}, {pipeline_mode = #tpu.pipeline_mode<synchronous>, transform_indices = @transform_6, window_bounds = array<i64: 128, 128>}, {pipeline_mode = #tpu.pipeline_mode<synchronous>, transform_indices = @transform_7, window_bounds = array<i64: 1, 128>}, {transform_indices = @transform_8, window_bounds = array<i64: 1, 8, 16, 128>}]} {
    %c8_i32 = arith.constant 8 : i32
    %0 = arith.muli %arg1, %c8_i32 : i32
    %1 = tpu.assume_multiple %0, 8 : i32
    %c0_i32 = arith.constant 0 : i32
    %2 = arith.cmpi sgt, %arg1, %c0_i32 : i32
    %3 = arith.extui %2 : i1 to i32
    %c0_i32_0 = arith.constant 0 : i32
    %4 = arith.cmpi ne, %3, %c0_i32_0 : i32
    scf.if %4 {
      %c2_i32 = arith.constant 2 : i32
      %113 = arith.subi %1, %c2_i32 : i32
      %c0_i32_99 = arith.constant 0 : i32
      %c0_i32_100 = arith.constant 0 : i32
      %c0_i32_101 = arith.constant 0 : i32
      %114 = tpu.memref_slice %arg3[%arg0, %113, %c0_i32_100, %c0_i32_101] : memref<2x16x16x128xbf16, #tpu.memory_space<any>> -> memref<1x2x16x128xbf16, #tpu.memory_space<any>>
      %115 = tpu.memref_squeeze %114 : memref<1x2x16x128xbf16, #tpu.memory_space<any>> -> memref<2x16x128xbf16, #tpu.memory_space<any>>
      %c0_i32_102 = arith.constant 0 : i32
      %c0_i32_103 = arith.constant 0 : i32
      %c0_i32_104 = arith.constant 0 : i32
      %116 = tpu.memref_slice %arg12[%c0_i32_102, %c0_i32_103, %c0_i32_104] : memref<4x16x128xbf16, #tpu.memory_space<vmem>> -> memref<2x16x128xbf16, #tpu.memory_space<vmem>>
      %117 = tpu.memref_slice %arg13[%c0_i32_99] : memref<2x!tpu.dma_semaphore, #tpu.memory_space<semaphore_mem>> -> memref<1x!tpu.dma_semaphore, #tpu.memory_space<semaphore_mem>>
      %118 = tpu.memref_squeeze %117 : memref<1x!tpu.dma_semaphore, #tpu.memory_space<semaphore_mem>> -> memref<!tpu.dma_semaphore, #tpu.memory_space<semaphore_mem>>
      tpu.enqueue_dma source(%115 : memref<2x16x128xbf16, #tpu.memory_space<any>>) target(%116 : memref<2x16x128xbf16, #tpu.memory_space<vmem>>) target_semaphore(%118 : memref<!tpu.dma_semaphore, #tpu.memory_space<semaphore_mem>>)
    } else {
    }
    %c1_i32 = arith.constant 1 : i32
    %5 = arith.cmpi slt, %arg1, %c1_i32 : i32
    %6 = arith.extui %5 : i1 to i32
    %c0_i32_1 = arith.constant 0 : i32
    %7 = arith.cmpi ne, %6, %c0_i32_1 : i32
    scf.if %7 {
      %c8_i32_99 = arith.constant 8 : i32
      %113 = arith.addi %1, %c8_i32_99 : i32
      %c1_i32_100 = arith.constant 1 : i32
      %c0_i32_101 = arith.constant 0 : i32
      %c0_i32_102 = arith.constant 0 : i32
      %114 = tpu.memref_slice %arg3[%arg0, %113, %c0_i32_101, %c0_i32_102] : memref<2x16x16x128xbf16, #tpu.memory_space<any>> -> memref<1x2x16x128xbf16, #tpu.memory_space<any>>
      %115 = tpu.memref_squeeze %114 : memref<1x2x16x128xbf16, #tpu.memory_space<any>> -> memref<2x16x128xbf16, #tpu.memory_space<any>>
      %c2_i32 = arith.constant 2 : i32
      %c0_i32_103 = arith.constant 0 : i32
      %c0_i32_104 = arith.constant 0 : i32
      %116 = tpu.memref_slice %arg12[%c2_i32, %c0_i32_103, %c0_i32_104] : memref<4x16x128xbf16, #tpu.memory_space<vmem>> -> memref<2x16x128xbf16, #tpu.memory_space<vmem>>
      %117 = tpu.memref_slice %arg13[%c1_i32_100] : memref<2x!tpu.dma_semaphore, #tpu.memory_space<semaphore_mem>> -> memref<1x!tpu.dma_semaphore, #tpu.memory_space<semaphore_mem>>
      %118 = tpu.memref_squeeze %117 : memref<1x!tpu.dma_semaphore, #tpu.memory_space<semaphore_mem>> -> memref<!tpu.dma_semaphore, #tpu.memory_space<semaphore_mem>>
      tpu.enqueue_dma source(%115 : memref<2x16x128xbf16, #tpu.memory_space<any>>) target(%116 : memref<2x16x128xbf16, #tpu.memory_space<vmem>>) target_semaphore(%118 : memref<!tpu.dma_semaphore, #tpu.memory_space<semaphore_mem>>)
    } else {
    }
    %c0 = arith.constant 0 : index
    %c0_2 = arith.constant 0 : index
    %c0_3 = arith.constant 0 : index
    %c0_4 = arith.constant 0 : index
    %8 = vector.load %arg2[%c0, %c0_2, %c0_3, %c0_4] : memref<1x8x16x128xbf16, #tpu.memory_space<vmem>>, vector<1x8x16x128xbf16>
    %9 = vector.shape_cast %8 : vector<1x8x16x128xbf16> to vector<8x16x128xbf16>
    %10 = vector.shape_cast %9 : vector<8x16x128xbf16> to vector<128x128xbf16>
    %c0_5 = arith.constant 0 : index
    %c0_6 = arith.constant 0 : index
    %11 = vector.load %arg4[%c0_5, %c0_6] : memref<128x128xbf16, #tpu.memory_space<vmem>>, vector<128x128xbf16>
    %cst = arith.constant dense<0.000000e+00> : vector<128x128xf32>
    %12 = tpu.matmul %10, %11, %cst {dimension_numbers = #tpu.dot_dimension_numbers<[1], [0], [0], [1], [0, 0, 1, 1], [], []>} : vector<128x128xbf16>, vector<128x128xbf16>, vector<128x128xf32> -> vector<128x128xf32>
    %c0_7 = arith.constant 0 : index
    %c0_8 = arith.constant 0 : index
    %13 = vector.load %arg5[%c0_7, %c0_8] : memref<1x128xf32, #tpu.memory_space<vmem>>, vector<1x128xf32>
    %14 = vector.broadcast %13 : vector<1x128xf32> to vector<128x128xf32>
    %15 = arith.addf %12, %14 : vector<128x128xf32>
    %cst_9 = arith.constant 0.000000e+00 : f32
    %16 = vector.broadcast %cst_9 : f32 to vector<128x128xf32>
    %17 = arith.maximumf %15, %16 : vector<128x128xf32>
    %18 = vector.shape_cast %17 : vector<128x128xf32> to vector<8x16x128xf32>
    %19 = arith.truncf %18 : vector<8x16x128xf32> to vector<8x16x128xbf16>
    %c2 = arith.constant 2 : index
    %c8 = arith.constant 8 : index
    %c0_10 = arith.constant 0 : index
    %20 = vector.load %arg11[%c2, %c8, %c0_10] : memref<12x32x128xbf16, #tpu.memory_space<vmem>>, vector<8x16x128xbf16>
    tpu.vector_store %arg11[%c2, %c8, %c0_10], %19 {strides = array<i32>} : memref<12x32x128xbf16, #tpu.memory_space<vmem>>, vector<8x16x128xbf16>,
    %c0_i32_11 = arith.constant 0 : i32
    %21 = arith.cmpi sgt, %arg1, %c0_i32_11 : i32
    %22 = arith.extui %21 : i1 to i32
    %c0_i32_12 = arith.constant 0 : i32
    %23 = arith.cmpi ne, %22, %c0_i32_12 : i32
    scf.if %23 {
      %c2_i32 = arith.constant 2 : i32
      %113 = arith.subi %1, %c2_i32 : i32
      %c0_i32_99 = arith.constant 0 : i32
      %c0_i32_100 = arith.constant 0 : i32
      %c0_i32_101 = arith.constant 0 : i32
      %114 = tpu.memref_slice %arg3[%arg0, %113, %c0_i32_100, %c0_i32_101] : memref<2x16x16x128xbf16, #tpu.memory_space<any>> -> memref<1x2x16x128xbf16, #tpu.memory_space<any>>
      %115 = tpu.memref_squeeze %114 : memref<1x2x16x128xbf16, #tpu.memory_space<any>> -> memref<2x16x128xbf16, #tpu.memory_space<any>>
      %c0_i32_102 = arith.constant 0 : i32
      %c0_i32_103 = arith.constant 0 : i32
      %c0_i32_104 = arith.constant 0 : i32
      %116 = tpu.memref_slice %arg12[%c0_i32_102, %c0_i32_103, %c0_i32_104] : memref<4x16x128xbf16, #tpu.memory_space<vmem>> -> memref<2x16x128xbf16, #tpu.memory_space<vmem>>
      %117 = tpu.memref_slice %arg13[%c0_i32_99] : memref<2x!tpu.dma_semaphore, #tpu.memory_space<semaphore_mem>> -> memref<1x!tpu.dma_semaphore, #tpu.memory_space<semaphore_mem>>
      %118 = tpu.memref_squeeze %117 : memref<1x!tpu.dma_semaphore, #tpu.memory_space<semaphore_mem>> -> memref<!tpu.dma_semaphore, #tpu.memory_space<semaphore_mem>>
      tpu.wait_dma2 semaphore(%118 : memref<!tpu.dma_semaphore, #tpu.memory_space<semaphore_mem>>) src(%115 : memref<2x16x128xbf16, #tpu.memory_space<any>>) dst(%116 : memref<2x16x128xbf16, #tpu.memory_space<vmem>>)
      %c0_105 = arith.constant 0 : index
      %c0_106 = arith.constant 0 : index
      %c0_107 = arith.constant 0 : index
      %119 = vector.load %arg12[%c0_105, %c0_106, %c0_107] : memref<4x16x128xbf16, #tpu.memory_space<vmem>>, vector<2x16x128xbf16>
      %120 = vector.shape_cast %119 : vector<2x16x128xbf16> to vector<32x128xbf16>
      %c0_108 = arith.constant 0 : index
      %c0_109 = arith.constant 0 : index
      %121 = vector.load %arg4[%c0_108, %c0_109] : memref<128x128xbf16, #tpu.memory_space<vmem>>, vector<128x128xbf16>
      %cst_110 = arith.constant dense<0.000000e+00> : vector<32x128xf32>
      %122 = tpu.matmul %120, %121, %cst_110 {dimension_numbers = #tpu.dot_dimension_numbers<[1], [0], [0], [1], [0, 0, 1, 1], [], []>} : vector<32x128xbf16>, vector<128x128xbf16>, vector<32x128xf32> -> vector<32x128xf32>
      %c0_111 = arith.constant 0 : index
      %c0_112 = arith.constant 0 : index
      %123 = vector.load %arg5[%c0_111, %c0_112] : memref<1x128xf32, #tpu.memory_space<vmem>>, vector<1x128xf32>
      %124 = vector.broadcast %123 : vector<1x128xf32> to vector<32x128xf32>
      %125 = arith.addf %122, %124 : vector<32x128xf32>
      %cst_113 = arith.constant 0.000000e+00 : f32
      %126 = vector.broadcast %cst_113 : f32 to vector<32x128xf32>
      %127 = arith.maximumf %125, %126 : vector<32x128xf32>
      %128 = vector.shape_cast %127 : vector<32x128xf32> to vector<2x16x128xf32>
      %129 = arith.truncf %128 : vector<2x16x128xf32> to vector<2x16x128xbf16>
      %c0_114 = arith.constant 0 : index
      %c8_115 = arith.constant 8 : index
      %c0_116 = arith.constant 0 : index
      %130 = vector.load %arg11[%c0_114, %c8_115, %c0_116] : memref<12x32x128xbf16, #tpu.memory_space<vmem>>, vector<2x16x128xbf16>
      tpu.vector_store %arg11[%c0_114, %c8_115, %c0_116], %129 {strides = array<i32>} : memref<12x32x128xbf16, #tpu.memory_space<vmem>>, vector<2x16x128xbf16>,
    } else {
    }
    %c1_i32_13 = arith.constant 1 : i32
    %24 = arith.cmpi slt, %arg1, %c1_i32_13 : i32
    %25 = arith.extui %24 : i1 to i32
    %c0_i32_14 = arith.constant 0 : i32
    %26 = arith.cmpi ne, %25, %c0_i32_14 : i32
    scf.if %26 {
      %c8_i32_99 = arith.constant 8 : i32
      %113 = arith.addi %1, %c8_i32_99 : i32
      %c1_i32_100 = arith.constant 1 : i32
      %c0_i32_101 = arith.constant 0 : i32
      %c0_i32_102 = arith.constant 0 : i32
      %114 = tpu.memref_slice %arg3[%arg0, %113, %c0_i32_101, %c0_i32_102] : memref<2x16x16x128xbf16, #tpu.memory_space<any>> -> memref<1x2x16x128xbf16, #tpu.memory_space<any>>
      %115 = tpu.memref_squeeze %114 : memref<1x2x16x128xbf16, #tpu.memory_space<any>> -> memref<2x16x128xbf16, #tpu.memory_space<any>>
      %c2_i32 = arith.constant 2 : i32
      %c0_i32_103 = arith.constant 0 : i32
      %c0_i32_104 = arith.constant 0 : i32
      %116 = tpu.memref_slice %arg12[%c2_i32, %c0_i32_103, %c0_i32_104] : memref<4x16x128xbf16, #tpu.memory_space<vmem>> -> memref<2x16x128xbf16, #tpu.memory_space<vmem>>
      %117 = tpu.memref_slice %arg13[%c1_i32_100] : memref<2x!tpu.dma_semaphore, #tpu.memory_space<semaphore_mem>> -> memref<1x!tpu.dma_semaphore, #tpu.memory_space<semaphore_mem>>
      %118 = tpu.memref_squeeze %117 : memref<1x!tpu.dma_semaphore, #tpu.memory_space<semaphore_mem>> -> memref<!tpu.dma_semaphore, #tpu.memory_space<semaphore_mem>>
      tpu.wait_dma2 semaphore(%118 : memref<!tpu.dma_semaphore, #tpu.memory_space<semaphore_mem>>) src(%115 : memref<2x16x128xbf16, #tpu.memory_space<any>>) dst(%116 : memref<2x16x128xbf16, #tpu.memory_space<vmem>>)
      %c2_105 = arith.constant 2 : index
      %c0_106 = arith.constant 0 : index
      %c0_107 = arith.constant 0 : index
      %119 = vector.load %arg12[%c2_105, %c0_106, %c0_107] : memref<4x16x128xbf16, #tpu.memory_space<vmem>>, vector<2x16x128xbf16>
      %120 = vector.shape_cast %119 : vector<2x16x128xbf16> to vector<32x128xbf16>
      %c0_108 = arith.constant 0 : index
      %c0_109 = arith.constant 0 : index
      %121 = vector.load %arg4[%c0_108, %c0_109] : memref<128x128xbf16, #tpu.memory_space<vmem>>, vector<128x128xbf16>
      %cst_110 = arith.constant dense<0.000000e+00> : vector<32x128xf32>
      %122 = tpu.matmul %120, %121, %cst_110 {dimension_numbers = #tpu.dot_dimension_numbers<[1], [0], [0], [1], [0, 0, 1, 1], [], []>} : vector<32x128xbf16>, vector<128x128xbf16>, vector<32x128xf32> -> vector<32x128xf32>
      %c0_111 = arith.constant 0 : index
      %c0_112 = arith.constant 0 : index
      %123 = vector.load %arg5[%c0_111, %c0_112] : memref<1x128xf32, #tpu.memory_space<vmem>>, vector<1x128xf32>
      %124 = vector.broadcast %123 : vector<1x128xf32> to vector<32x128xf32>
      %125 = arith.addf %122, %124 : vector<32x128xf32>
      %cst_113 = arith.constant 0.000000e+00 : f32
      %126 = vector.broadcast %cst_113 : f32 to vector<32x128xf32>
      %127 = arith.maximumf %125, %126 : vector<32x128xf32>
      %128 = vector.shape_cast %127 : vector<32x128xf32> to vector<2x16x128xf32>
      %129 = arith.truncf %128 : vector<2x16x128xf32> to vector<2x16x128xbf16>
      %c10_114 = arith.constant 10 : index
      %c8_115 = arith.constant 8 : index
      %c0_116 = arith.constant 0 : index
      %130 = vector.load %arg11[%c10_114, %c8_115, %c0_116] : memref<12x32x128xbf16, #tpu.memory_space<vmem>>, vector<2x16x128xbf16>
      tpu.vector_store %arg11[%c10_114, %c8_115, %c0_116], %129 {strides = array<i32>} : memref<12x32x128xbf16, #tpu.memory_space<vmem>>, vector<2x16x128xbf16>,
    } else {
    }
    %c0_i32_15 = arith.constant 0 : i32
    %27 = arith.cmpi eq, %arg1, %c0_i32_15 : i32
    %28 = arith.extui %27 : i1 to i32
    %c0_i32_16 = arith.constant 0 : i32
    %29 = arith.cmpi ne, %28, %c0_i32_16 : i32
    scf.if %29 {
      %cst_99 = arith.constant 0.000000e+00 : bf16
      %113 = vector.broadcast %cst_99 : bf16 to vector<2x32x128xbf16>
      %c0_100 = arith.constant 0 : index
      %c0_101 = arith.constant 0 : index
      %c0_102 = arith.constant 0 : index
      %114 = vector.load %arg11[%c0_100, %c0_101, %c0_102] : memref<12x32x128xbf16, #tpu.memory_space<vmem>>, vector<2x32x128xbf16>
      tpu.vector_store %arg11[%c0_100, %c0_101, %c0_102], %113 {strides = array<i32>} : memref<12x32x128xbf16, #tpu.memory_space<vmem>>, vector<2x32x128xbf16>,
    } else {
    }
    %c1_i32_17 = arith.constant 1 : i32
    %30 = arith.cmpi eq, %arg1, %c1_i32_17 : i32
    %31 = arith.extui %30 : i1 to i32
    %c0_i32_18 = arith.constant 0 : i32
    %32 = arith.cmpi ne, %31, %c0_i32_18 : i32
    scf.if %32 {
      %cst_99 = arith.constant 0.000000e+00 : bf16
      %113 = vector.broadcast %cst_99 : bf16 to vector<2x32x128xbf16>
      %c10_100 = arith.constant 10 : index
      %c0_101 = arith.constant 0 : index
      %c0_102 = arith.constant 0 : index
      %114 = vector.load %arg11[%c10_100, %c0_101, %c0_102] : memref<12x32x128xbf16, #tpu.memory_space<vmem>>, vector<2x32x128xbf16>
      tpu.vector_store %arg11[%c10_100, %c0_101, %c0_102], %113 {strides = array<i32>} : memref<12x32x128xbf16, #tpu.memory_space<vmem>>, vector<2x32x128xbf16>,
    } else {
    }
    %cst_19 = arith.constant 0.000000e+00 : bf16
    %33 = vector.broadcast %cst_19 : bf16 to vector<12x8x128xbf16>
    %c0_20 = arith.constant 0 : index
    %c0_21 = arith.constant 0 : index
    %c0_22 = arith.constant 0 : index
    %34 = vector.load %arg11[%c0_20, %c0_21, %c0_22] : memref<12x32x128xbf16, #tpu.memory_space<vmem>>, vector<12x8x128xbf16>
    tpu.vector_store %arg11[%c0_20, %c0_21, %c0_22], %33 {strides = array<i32>} : memref<12x32x128xbf16, #tpu.memory_space<vmem>>, vector<12x8x128xbf16>,
    %cst_23 = arith.constant 0.000000e+00 : bf16
    %35 = vector.broadcast %cst_23 : bf16 to vector<12x8x128xbf16>
    %c0_24 = arith.constant 0 : index
    %c24 = arith.constant 24 : index
    %c0_25 = arith.constant 0 : index
    %36 = vector.load %arg11[%c0_24, %c24, %c0_25] : memref<12x32x128xbf16, #tpu.memory_space<vmem>>, vector<12x8x128xbf16>
    tpu.vector_store %arg11[%c0_24, %c24, %c0_25], %35 {strides = array<i32>} : memref<12x32x128xbf16, #tpu.memory_space<vmem>>, vector<12x8x128xbf16>,
    %c0_26 = arith.constant 0 : index
    %c6 = arith.constant 6 : index
    %c0_27 = arith.constant 0 : index
    %37 = vector.load %arg11[%c0_26, %c6, %c0_27] : memref<12x32x128xbf16, #tpu.memory_space<vmem>>, vector<8x16x128xbf16>
    %38 = vector.shape_cast %37 : vector<8x16x128xbf16> to vector<128x128xbf16>
    %c0_28 = arith.constant 0 : index
    %c0_29 = arith.constant 0 : index
    %c0_30 = arith.constant 0 : index
    %39 = vector.load %arg6[%c0_28, %c0_29, %c0_30] : memref<9x128x128xbf16, #tpu.memory_space<vmem>>, vector<1x128x128xbf16>
    %40 = vector.shape_cast %39 : vector<1x128x128xbf16> to vector<128x128xbf16>
    %cst_31 = arith.constant dense<0.000000e+00> : vector<128x128xf32>
    %41 = tpu.matmul %38, %40, %cst_31 {dimension_numbers = #tpu.dot_dimension_numbers<[1], [0], [0], [1], [0, 0, 1, 1], [], []>} : vector<128x128xbf16>, vector<128x128xbf16>, vector<128x128xf32> -> vector<128x128xf32>
    %c0_32 = arith.constant 0 : index
    %c8_33 = arith.constant 8 : index
    %c0_34 = arith.constant 0 : index
    %42 = vector.load %arg11[%c0_32, %c8_33, %c0_34] : memref<12x32x128xbf16, #tpu.memory_space<vmem>>, vector<8x16x128xbf16>
    %43 = vector.shape_cast %42 : vector<8x16x128xbf16> to vector<128x128xbf16>
    %c1 = arith.constant 1 : index
    %c0_35 = arith.constant 0 : index
    %c0_36 = arith.constant 0 : index
    %44 = vector.load %arg6[%c1, %c0_35, %c0_36] : memref<9x128x128xbf16, #tpu.memory_space<vmem>>, vector<1x128x128xbf16>
    %45 = vector.shape_cast %44 : vector<1x128x128xbf16> to vector<128x128xbf16>
    %cst_37 = arith.constant dense<0.000000e+00> : vector<128x128xf32>
    %46 = tpu.matmul %43, %45, %cst_37 {dimension_numbers = #tpu.dot_dimension_numbers<[1], [0], [0], [1], [0, 0, 1, 1], [], []>} : vector<128x128xbf16>, vector<128x128xbf16>, vector<128x128xf32> -> vector<128x128xf32>
    %47 = arith.addf %41, %46 : vector<128x128xf32>
    %c0_38 = arith.constant 0 : index
    %c10 = arith.constant 10 : index
    %c0_39 = arith.constant 0 : index
    %48 = vector.load %arg11[%c0_38, %c10, %c0_39] : memref<12x32x128xbf16, #tpu.memory_space<vmem>>, vector<8x16x128xbf16>
    %49 = vector.shape_cast %48 : vector<8x16x128xbf16> to vector<128x128xbf16>
    %c2_40 = arith.constant 2 : index
    %c0_41 = arith.constant 0 : index
    %c0_42 = arith.constant 0 : index
    %50 = vector.load %arg6[%c2_40, %c0_41, %c0_42] : memref<9x128x128xbf16, #tpu.memory_space<vmem>>, vector<1x128x128xbf16>
    %51 = vector.shape_cast %50 : vector<1x128x128xbf16> to vector<128x128xbf16>
    %cst_43 = arith.constant dense<0.000000e+00> : vector<128x128xf32>
    %52 = tpu.matmul %49, %51, %cst_43 {dimension_numbers = #tpu.dot_dimension_numbers<[1], [0], [0], [1], [0, 0, 1, 1], [], []>} : vector<128x128xbf16>, vector<128x128xbf16>, vector<128x128xf32> -> vector<128x128xf32>
    %53 = arith.addf %47, %52 : vector<128x128xf32>
    %c2_44 = arith.constant 2 : index
    %c6_45 = arith.constant 6 : index
    %c0_46 = arith.constant 0 : index
    %54 = vector.load %arg11[%c2_44, %c6_45, %c0_46] : memref<12x32x128xbf16, #tpu.memory_space<vmem>>, vector<8x16x128xbf16>
    %55 = vector.shape_cast %54 : vector<8x16x128xbf16> to vector<128x128xbf16>
    %c3 = arith.constant 3 : index
    %c0_47 = arith.constant 0 : index
    %c0_48 = arith.constant 0 : index
    %56 = vector.load %arg6[%c3, %c0_47, %c0_48] : memref<9x128x128xbf16, #tpu.memory_space<vmem>>, vector<1x128x128xbf16>
    %57 = vector.shape_cast %56 : vector<1x128x128xbf16> to vector<128x128xbf16>
    %cst_49 = arith.constant dense<0.000000e+00> : vector<128x128xf32>
    %58 = tpu.matmul %55, %57, %cst_49 {dimension_numbers = #tpu.dot_dimension_numbers<[1], [0], [0], [1], [0, 0, 1, 1], [], []>} : vector<128x128xbf16>, vector<128x128xbf16>, vector<128x128xf32> -> vector<128x128xf32>
    %59 = arith.addf %53, %58 : vector<128x128xf32>
    %c2_50 = arith.constant 2 : index
    %c8_51 = arith.constant 8 : index
    %c0_52 = arith.constant 0 : index
    %60 = vector.load %arg11[%c2_50, %c8_51, %c0_52] : memref<12x32x128xbf16, #tpu.memory_space<vmem>>, vector<8x16x128xbf16>
    %61 = vector.shape_cast %60 : vector<8x16x128xbf16> to vector<128x128xbf16>
    %c4 = arith.constant 4 : index
    %c0_53 = arith.constant 0 : index
    %c0_54 = arith.constant 0 : index
    %62 = vector.load %arg6[%c4, %c0_53, %c0_54] : memref<9x128x128xbf16, #tpu.memory_space<vmem>>, vector<1x128x128xbf16>
    %63 = vector.shape_cast %62 : vector<1x128x128xbf16> to vector<128x128xbf16>
    %cst_55 = arith.constant dense<0.000000e+00> : vector<128x128xf32>
    %64 = tpu.matmul %61, %63, %cst_55 {dimension_numbers = #tpu.dot_dimension_numbers<[1], [0], [0], [1], [0, 0, 1, 1], [], []>} : vector<128x128xbf16>, vector<128x128xbf16>, vector<128x128xf32> -> vector<128x128xf32>
    %65 = arith.addf %59, %64 : vector<128x128xf32>
    %c2_56 = arith.constant 2 : index
    %c10_57 = arith.constant 10 : index
    %c0_58 = arith.constant 0 : index
    %66 = vector.load %arg11[%c2_56, %c10_57, %c0_58] : memref<12x32x128xbf16, #tpu.memory_space<vmem>>, vector<8x16x128xbf16>
    %67 = vector.shape_cast %66 : vector<8x16x128xbf16> to vector<128x128xbf16>
    %c5 = arith.constant 5 : index
    %c0_59 = arith.constant 0 : index
    %c0_60 = arith.constant 0 : index
    %68 = vector.load %arg6[%c5, %c0_59, %c0_60] : memref<9x128x128xbf16, #tpu.memory_space<vmem>>, vector<1x128x128xbf16>
    %69 = vector.shape_cast %68 : vector<1x128x128xbf16> to vector<128x128xbf16>
    %cst_61 = arith.constant dense<0.000000e+00> : vector<128x128xf32>
    %70 = tpu.matmul %67, %69, %cst_61 {dimension_numbers = #tpu.dot_dimension_numbers<[1], [0], [0], [1], [0, 0, 1, 1], [], []>} : vector<128x128xbf16>, vector<128x128xbf16>, vector<128x128xf32> -> vector<128x128xf32>
    %71 = arith.addf %65, %70 : vector<128x128xf32>
    %c4_62 = arith.constant 4 : index
    %c6_63 = arith.constant 6 : index
    %c0_64 = arith.constant 0 : index
    %72 = vector.load %arg11[%c4_62, %c6_63, %c0_64] : memref<12x32x128xbf16, #tpu.memory_space<vmem>>, vector<8x16x128xbf16>
    %73 = vector.shape_cast %72 : vector<8x16x128xbf16> to vector<128x128xbf16>
    %c6_65 = arith.constant 6 : index
    %c0_66 = arith.constant 0 : index
    %c0_67 = arith.constant 0 : index
    %74 = vector.load %arg6[%c6_65, %c0_66, %c0_67] : memref<9x128x128xbf16, #tpu.memory_space<vmem>>, vector<1x128x128xbf16>
    %75 = vector.shape_cast %74 : vector<1x128x128xbf16> to vector<128x128xbf16>
    %cst_68 = arith.constant dense<0.000000e+00> : vector<128x128xf32>
    %76 = tpu.matmul %73, %75, %cst_68 {dimension_numbers = #tpu.dot_dimension_numbers<[1], [0], [0], [1], [0, 0, 1, 1], [], []>} : vector<128x128xbf16>, vector<128x128xbf16>, vector<128x128xf32> -> vector<128x128xf32>
    %77 = arith.addf %71, %76 : vector<128x128xf32>
    %c4_69 = arith.constant 4 : index
    %c8_70 = arith.constant 8 : index
    %c0_71 = arith.constant 0 : index
    %78 = vector.load %arg11[%c4_69, %c8_70, %c0_71] : memref<12x32x128xbf16, #tpu.memory_space<vmem>>, vector<8x16x128xbf16>
    %79 = vector.shape_cast %78 : vector<8x16x128xbf16> to vector<128x128xbf16>
    %c7 = arith.constant 7 : index
    %c0_72 = arith.constant 0 : index
    %c0_73 = arith.constant 0 : index
    %80 = vector.load %arg6[%c7, %c0_72, %c0_73] : memref<9x128x128xbf16, #tpu.memory_space<vmem>>, vector<1x128x128xbf16>
    %81 = vector.shape_cast %80 : vector<1x128x128xbf16> to vector<128x128xbf16>
    %cst_74 = arith.constant dense<0.000000e+00> : vector<128x128xf32>
    %82 = tpu.matmul %79, %81, %cst_74 {dimension_numbers = #tpu.dot_dimension_numbers<[1], [0], [0], [1], [0, 0, 1, 1], [], []>} : vector<128x128xbf16>, vector<128x128xbf16>, vector<128x128xf32> -> vector<128x128xf32>
    %83 = arith.addf %77, %82 : vector<128x128xf32>
    %c4_75 = arith.constant 4 : index
    %c10_76 = arith.constant 10 : index
    %c0_77 = arith.constant 0 : index
    %84 = vector.load %arg11[%c4_75, %c10_76, %c0_77] : memref<12x32x128xbf16, #tpu.memory_space<vmem>>, vector<8x16x128xbf16>
    %85 = vector.shape_cast %84 : vector<8x16x128xbf16> to vector<128x128xbf16>
    %c8_78 = arith.constant 8 : index
    %c0_79 = arith.constant 0 : index
    %c0_80 = arith.constant 0 : index
    %86 = vector.load %arg6[%c8_78, %c0_79, %c0_80] : memref<9x128x128xbf16, #tpu.memory_space<vmem>>, vector<1x128x128xbf16>
    %87 = vector.shape_cast %86 : vector<1x128x128xbf16> to vector<128x128xbf16>
    %cst_81 = arith.constant dense<0.000000e+00> : vector<128x128xf32>
    %88 = tpu.matmul %85, %87, %cst_81 {dimension_numbers = #tpu.dot_dimension_numbers<[1], [0], [0], [1], [0, 0, 1, 1], [], []>} : vector<128x128xbf16>, vector<128x128xbf16>, vector<128x128xf32> -> vector<128x128xf32>
    %89 = arith.addf %83, %88 : vector<128x128xf32>
    %c0_82 = arith.constant 0 : index
    %c0_83 = arith.constant 0 : index
    %90 = vector.load %arg7[%c0_82, %c0_83] : memref<1x128xf32, #tpu.memory_space<vmem>>, vector<1x128xf32>
    %91 = vector.broadcast %90 : vector<1x128xf32> to vector<128x128xf32>
    %92 = arith.addf %89, %91 : vector<128x128xf32>
    %cst_84 = arith.constant 0.000000e+00 : f32
    %93 = vector.broadcast %cst_84 : f32 to vector<128x128xf32>
    %94 = arith.maximumf %92, %93 : vector<128x128xf32>
    %95 = arith.truncf %94 : vector<128x128xf32> to vector<128x128xbf16>
    %c0_85 = arith.constant 0 : index
    %c0_86 = arith.constant 0 : index
    %96 = vector.load %arg8[%c0_85, %c0_86] : memref<128x128xbf16, #tpu.memory_space<vmem>>, vector<128x128xbf16>
    %cst_87 = arith.constant dense<0.000000e+00> : vector<128x128xf32>
    %97 = tpu.matmul %95, %96, %cst_87 {dimension_numbers = #tpu.dot_dimension_numbers<[1], [0], [0], [1], [0, 0, 1, 1], [], []>} : vector<128x128xbf16>, vector<128x128xbf16>, vector<128x128xf32> -> vector<128x128xf32>
    %c0_88 = arith.constant 0 : index
    %c0_89 = arith.constant 0 : index
    %c0_90 = arith.constant 0 : index
    %c0_91 = arith.constant 0 : index
    %98 = vector.load %arg2[%c0_88, %c0_89, %c0_90, %c0_91] : memref<1x8x16x128xbf16, #tpu.memory_space<vmem>>, vector<1x8x16x128xbf16>
    %99 = vector.shape_cast %98 : vector<1x8x16x128xbf16> to vector<8x16x128xbf16>
    %100 = vector.shape_cast %99 : vector<8x16x128xbf16> to vector<128x128xbf16>
    %101 = arith.extf %100 : vector<128x128xbf16> to vector<128x128xf32>
    %c0_92 = arith.constant 0 : index
    %c0_93 = arith.constant 0 : index
    %102 = vector.load %arg9[%c0_92, %c0_93] : memref<1x128xf32, #tpu.memory_space<vmem>>, vector<1x128xf32>
    %103 = vector.broadcast %102 : vector<1x128xf32> to vector<128x128xf32>
    %104 = arith.addf %97, %103 : vector<128x128xf32>
    %105 = arith.addf %104, %101 : vector<128x128xf32>
    %cst_94 = arith.constant 0.000000e+00 : f32
    %106 = vector.broadcast %cst_94 : f32 to vector<128x128xf32>
    %107 = arith.maximumf %105, %106 : vector<128x128xf32>
    %108 = vector.shape_cast %107 : vector<128x128xf32> to vector<8x16x128xf32>
    %109 = arith.truncf %108 : vector<8x16x128xf32> to vector<8x16x128xbf16>
    %c0_95 = arith.constant 0 : index
    %c0_96 = arith.constant 0 : index
    %c0_97 = arith.constant 0 : index
    %c0_98 = arith.constant 0 : index
    %110 = vector.load %arg10[%c0_95, %c0_96, %c0_97, %c0_98] : memref<1x8x16x128xbf16, #tpu.memory_space<vmem>>, vector<1x8x16x128xbf16>
    %111 = vector.shape_cast %110 : vector<1x8x16x128xbf16> to vector<8x16x128xbf16>
    %112 = vector.shape_cast %109 : vector<8x16x128xbf16> to vector<1x8x16x128xbf16>
    tpu.vector_store %arg10[%c0_95, %c0_96, %c0_97, %c0_98], %112 {strides = array<i32>} : memref<1x8x16x128xbf16, #tpu.memory_space<vmem>>, vector<1x8x16x128xbf16>,
    return
  }
  func.func @transform_0(%arg0: i32, %arg1: i32) -> (i32, i32, i32, i32) {
    %c0_i32 = arith.constant 0 : i32
    %c0_i32_0 = arith.constant 0 : i32
    %c0_i32_1 = arith.constant 0 : i32
    return %arg0, %arg1, %c0_i32, %c0_i32_0 : i32, i32, i32, i32
  }
  func.func @transform_2(%arg0: i32, %arg1: i32) -> (i32, i32) {
    %c0_i32 = arith.constant 0 : i32
    %c0_i32_0 = arith.constant 0 : i32
    %c0_i32_1 = arith.constant 0 : i32
    return %c0_i32, %c0_i32_0 : i32, i32
  }
  func.func @transform_3(%arg0: i32, %arg1: i32) -> (i32, i32) {
    %c0_i32 = arith.constant 0 : i32
    %c0_i32_0 = arith.constant 0 : i32
    %c0_i32_1 = arith.constant 0 : i32
    return %c0_i32, %c0_i32_0 : i32, i32
  }
  func.func @transform_4(%arg0: i32, %arg1: i32) -> (i32, i32, i32) {
    %c0_i32 = arith.constant 0 : i32
    %c0_i32_0 = arith.constant 0 : i32
    %c0_i32_1 = arith.constant 0 : i32
    %c0_i32_2 = arith.constant 0 : i32
    return %c0_i32, %c0_i32_0, %c0_i32_1 : i32, i32, i32
  }
  func.func @transform_5(%arg0: i32, %arg1: i32) -> (i32, i32) {
    %c0_i32 = arith.constant 0 : i32
    %c0_i32_0 = arith.constant 0 : i32
    %c0_i32_1 = arith.constant 0 : i32
    return %c0_i32, %c0_i32_0 : i32, i32
  }
  func.func @transform_6(%arg0: i32, %arg1: i32) -> (i32, i32) {
    %c0_i32 = arith.constant 0 : i32
    %c0_i32_0 = arith.constant 0 : i32
    %c0_i32_1 = arith.constant 0 : i32
    return %c0_i32, %c0_i32_0 : i32, i32
  }
  func.func @transform_7(%arg0: i32, %arg1: i32) -> (i32, i32) {
    %c0_i32 = arith.constant 0 : i32
    %c0_i32_0 = arith.constant 0 : i32
    %c0_i32_1 = arith.constant 0 : i32
    return %c0_i32, %c0_i32_0 : i32, i32
  }
  func.func @transform_8(%arg0: i32, %arg1: i32) -> (i32, i32, i32, i32) {
    %c0_i32 = arith.constant 0 : i32
    %c0_i32_0 = arith.constant 0 : i32
    %c0_i32_1 = arith.constant 0 : i32
    return %arg0, %arg1, %c0_i32, %c0_i32_0 : i32, i32, i32, i32
  }
}

</mosaic_0001>

<bundles_post_ra>
// kernel: tpu_custom_call.1
= control target key start
LH: loop header
LB: loop body
LE: loop exit
PB: predicated region body
PF: predicated region fallthrough
CT: control target
= control target key end

     0   :  { %s6743_s0 = inlined_call_operand.hbm [shape: bf16[2,16,16,128], index: 0, kind: input, shape index: {}]   ;;  %s6744_s1 = inlined_call_operand.hbm [shape: bf16[2,16,16,128], index: 1, kind: input, shape index: {}]   ;;  %s6745_s2 = inlined_call_operand.hbm [shape: bf16[128,128], index: 2, kind: input, shape index: {}]   ;;  %s6746_s3 = inlined_call_operand.vmem [shape: f32[1,128], index: 3, kind: input, shape index: {}]   ;;  %s6747_s4 = inlined_call_operand.hbm [shape: bf16[9,128,128], index: 4, kind: input, shape index: {}]   ;;  %s6748_s5 = inlined_call_operand.vmem [shape: f32[1,128], index: 5, kind: input, shape index: {}]   ;;  %s6749_s6 = inlined_call_operand.hbm [shape: bf16[128,128], index: 6, kind: input, shape index: {}]   ;;  %s6750_s7 = inlined_call_operand.vmem [shape: f32[1,128], index: 7, kind: input, shape index: {}]   ;;  %s6751_s8 = inlined_call_operand.hbm [shape: bf16[2,16,16,128], index: 8, kind: output, shape index: {}]  }
   0x1   :  { %6761 = sst [smem:[#allocation59_spill]] %s6745_s2 }
   0x2   :  { %6762 = sst [smem:[#allocation60_spill]] %s6747_s4 }
   0x3   :  { %6763 = sst [smem:[#allocation61_spill]] %s6749_s6 }
   0x4   :  { %6764 = sst [smem:[#allocation62_spill]] %s6750_s7 }
   0x5   :  { %6765 = sst [smem:[#allocation63_spill]] %s6751_s8 }
   0x6   :  { %13 = vsyncpa [#allocation6], 0 }
   0x7   :  { %15 = vsyncpa [#allocation6 + $0x1], 0 }
   0x8   :  { %16 = vsyncpa [#allocation9], 0 }
   0x9   :  { %17 = vsyncpa [#allocation12], 0 }
   0xa   :  { %18 = vsyncpa [#allocation7], 0 }
   0xb   :  { %20 = vsyncpa [#allocation7 + $0x1], 0  ;;  %s5830_s27 = smov 0   ;;  %s5832_s28 = smov 0  }
   0xc   :  { %s5834_s29 = smov 0   ;;  %s5836_s30 = smov 0  }
   0xd   :  { %s5838_s9 = smov 0   ;;  %s5840_s10 = smov 0  }
   0xe   :  { %s5842_s11 = smov 0   ;;  %s5844_s12 = smov 0  }
   0xf LB: > { %6766 = sst [smem:[#allocation26_spill]] %s5741_s27  ;;  %s4182_s13 = sadd.s32 4294967295, %s5769_s12   ;;  %s5769_s12 = sphi %s5844_s12, %s26_s12   ;;  %s5765_s11 = sphi %s5842_s11, %s6859_s11   ;;  %s5761_s10 = sphi %s5840_s10, %s6854_s10   ;;  %s5757_s9 = sphi %s5838_s9, %s6858_s9   ;;  %s5753_s30 = sphi %s5836_s30, %s6853_s30   ;;  %s5749_s29 = sphi %s5834_s29, %s6857_s29   ;;  %s5745_s28 = sphi %s5832_s28, %s6856_s28   ;;  %s5741_s27 = sphi %s5830_s27, %s6855_s27  }
  0x10   : > { %6767 = sst [smem:[#allocation27_spill]] %s5761_s10  ;;  %s4183_s14 = sadd.s32 4294967294, %s5769_s12  }
  0x11   : > { %p60_p0 = scmp.ne.s32.totalorder %s5745_s28, %s5741_s27  ;;  %p5874_p1 = scmp.eq.s32.totalorder %s4182_s13, 0 }
  0x12   : > { %p5878_p2 = scmp.eq.s32.totalorder %s4182_s13, 3  ;;  %p218_p3 = scmp.eq.s32.totalorder %s4183_s14, 3 }
  0x13   : > { %p5884_p4 = por %p5874_p1, %p60_p0  ;;  %p4184_p5 = scmp.ge.s32.totalorder %s5769_s12, 1 }
  0x14   : > { %p5889_p6 = por %p218_p3, %p60_p0  ;;  %p225_p7 = scmp.lt.s32.totalorder %s5769_s12, 5 }
  0x15   : > { %s5771_s20 = smov [#allocation8]   ;;  %s5772_s23 = smov [#allocation10]  }
  0x16   : > { %s6771_s18 = scalar_select %p5889_p6, 1, 0 }
  0x17   : > { %p5894_p8 = pnand %p4184_p5, %p225_p7  ;;  %s237_s21 = sshll.u32 %s5771_s20, 4  ;;  %s238_s21 = int_to_ptr.vmem [resolvable:$true] %s237_s21 }
  0x18   : > { %6772 = sst [smem:[#allocation28_spill]] %s6771_s18  ;;  %s253_s24 = sshll.u32 %s5772_s23, 4  ;;  %s254_s24 = int_to_ptr.vmem [resolvable:$true] %s253_s24 }
  0x19   : > { %p5258_p9 = pneg %p5894_p8  ;;  %s5773_s25 = smov [#allocation11]  }
  0x1a   : > { %s269_s26 = sshll.u32 %s5773_s25, 4  ;;  %s5513_s13 = scalar_lea.vmem %s238_s21, 1024  ;;  %s270_s26 = int_to_ptr.vmem [resolvable:$true] %s269_s26 }
  0x1b   : > { %p5902_p10 = pnand %p5258_p9, %p5874_p1  ;;  %p5514_p12 = scmp.ne.s32.totalorder %s238_s21, %s5513_s13 }
  0x1c   : > { %p5521_p3 = scmp.lt.s32.totalorder %s238_s21, %s238_s21  ;;  %p5522_p5 = scmp.lt.s32.totalorder %s5513_s13, %s5513_s13 }
  0x1d   : > { %p5504_p11 = pneg %p5902_p10 }
  0x1e   : > { %p5523_p7 = por %p5522_p5, %p5521_p3 }
  0x1f   : > { %p5516_p13 = pnand %p5514_p12, %p5504_p11 }
  0x21   : > { %p5517_p0 = pneg %p5516_p13 }
  0x23   : > { %p5524_p9 = pnand %p5523_p7, %p5517_p0 }
  0x25   : > { %5527 = shalt.err (!%p5524_p9)
}
  0x26   : > { %s6754_s14 = smov 64   ;;  %s6755_s20 = smov 4  }
  0x27   : > { %s6775_s2 = sld [smem:[#allocation59_spill]]  ;;  %s5539_s18 = scalar_lea.vmem %s254_s24, 9216 }
  0x28   : > { %p5540_p12 = scmp.ne.s32.totalorder %s254_s24, %s5539_s18  ;;  %p5547_p0 = scmp.lt.s32.totalorder %s254_s24, %s254_s24 }
  0x29   : > { %p5548_p5 = scmp.lt.s32.totalorder %s5539_s18, %s5539_s18 }
  0x2a   : > { %p5542_p13 = pnand %p5540_p12, %p5504_p11 }
  0x2b   : > { %p5549_p7 = por %p5548_p5, %p5547_p0 }
  0x2c   : > { %p5543_p3 = pneg %p5542_p13 }
  0x2d   : > { %5261 = dma.hbm_to_vmem [thread:$0]  (!%p5902_p10), %s6775_s2, 1024, %s238_s21, [#allocation9], %s6754_s14, %s6754_s14, %s6755_s20  }
  0x2e   : > { %p5550_p9 = pnand %p5549_p7, %p5543_p3 }
  0x30   : > { %5553 = shalt.err (!%p5550_p9)
}
  0x31   : > { %s6776_s4 = sld [smem:[#allocation60_spill]]  ;;  %s5565_s21 = scalar_lea.vmem %s270_s26, 1024 }
  0x32   : > { %p5566_p6 = scmp.ne.s32.totalorder %s270_s26, %s5565_s21  ;;  %p5573_p0 = scmp.lt.s32.totalorder %s270_s26, %s270_s26 }
  0x33   : > { %p5574_p3 = scmp.lt.s32.totalorder %s5565_s21, %s5565_s21 }
  0x34   : > { %p5568_p12 = pnand %p5566_p6, %p5504_p11 }
  0x35   : > { %p5575_p5 = por %p5574_p3, %p5573_p0 }
  0x36   : > { %p5569_p13 = pneg %p5568_p12 }
  0x37   : > { %5264 = dma.hbm_to_vmem [thread:$0]  (!%p5902_p10), %s6776_s4, 9216, %s254_s24, [#allocation9], %s6754_s14, %s6754_s14, %s6755_s20  }
  0x38   : > { %p5576_p7 = pnand %p5575_p5, %p5569_p13 }
  0x3a   : > { %5579 = shalt.err (!%p5576_p7)
}
  0x3b   : > { %s6777_s6 = sld [smem:[#allocation61_spill]]  ;;  %s35_s22 = sadd.s32 1, %s5761_s10 }
  0x3c   : > { %p36_p6 = scmp.ge.s32.totalorder %s35_s22, 2  ;;  %s38_s24 = sadd.s32 1, %s5765_s11 }
  0x3d   : > { %s47_s23 = sadd.s32 1, %s5749_s29  ;;  %p54_p11 = scmp.ne.s32.totalorder %s5749_s29, %s5745_s28 }
  0x3e   : > { %s6861_s22 = smov (%p36_p6, %s35_s22), 0  ;;  %s6863_s24 = smov (!%p36_p6, %s38_s24), %s5765_s11 }
  0x3f   : > { %6778 = sst [smem:[#allocation29_spill]] %s6861_s22  ;;  %s43_s25 = ssub.s32 %s5761_s10, %s6861_s22 }
  0x40   : > { %p55_p9 = scmp.eq.s32.totalorder %s5769_s12, 0  ;;  %p40_p12 = scmp.ge.s32.totalorder %s6863_s24, 2 }
  0x41   : > { %5267 = dma.hbm_to_vmem [thread:$0]  (!%p5902_p10), %s6777_s6, 1024, %s270_s26, [#allocation12], %s6754_s14, %s6754_s14, %s6755_s20  }
  0x42   : > { %p5954_p13 = por %p5878_p2, %p54_p11  ;;  %p5958_p10 = por %p55_p9, %p54_p11 }
  0x43   : > { %p5279_p0 = scmp.lt.s32.totalorder %s5769_s12, 4  ;;  %s6865_s24 = smov (%p40_p12, %s6863_s24), 0 }
  0x44   : > { %s6779_s13 = scalar_select %p5954_p13, 1, 0 }
  0x45   : > { %s286_s21 = sand.u32 1, %s5749_s29   ;;  %s4505_s27 = sshll.u32 %s5761_s10, 4 }
  0x46   : > { %6780 = sst [smem:[#allocation30_spill]] %s6779_s13  ;;  %s42_s18 = ssub.s32 %s5765_s11, %s6865_s24 }
  0x47   : > { %s44_s14 = sor.u32 %s43_s25, %s42_s18  ;;  %s4189_s20 = sshll.u32 %s286_s21, 6 }
  0x48   : > { %p45_p3 = scmp.eq.s32.totalorder %s44_s14, 0  ;;  %s4192_s16 = sshll.u32 %s5765_s11, 5 }
  0x49   : > { %s290_s2 = scalar_lea.vmem [#allocation5], %s4189_s20  ;;  %s297_s22 = sadd.s32 %s4505_s27, %s4192_s16 }
  0x4a   : > { %s300_s4 = sshll.u32 %s290_s2, 4  ;;  %s4193_s8 = sshll.u32 %s297_s22, 6  ;;  %s301_s4 = int_to_ptr.vmem [resolvable:$true] %s300_s4 }
  0x4b   : > { %s5971_s6 = scalar_select %p45_p3, %s5749_s29, %s47_s23  }
  0x4c   : > { %p5977_p2 = pnand %p5279_p0, %p5958_p10  ;;  %s299_s25 = scalar_lea.hbm %s6743_s0, %s4193_s8 }
  0x4d   : > { %s287_s14 = scalar_lea.sflag [#allocation6], %s286_s21  ;;  %s5593_s2 = scalar_lea.vmem %s301_s4, 1024 }
  0x4e   : > { %p5582_p5 = pneg %p5977_p2  ;;  %p5594_p7 = scmp.ne.s32.totalorder %s301_s4, %s5593_s2 }
  0x4f   : > { %s5776_s20 = smov [#allocation5]  }
  0x50   : > { %p5596_p6 = pnand %p5594_p7, %p5582_p5  ;;  %s5598_s22 = sshll.u32 %s5776_s20, 4  ;;  %s5599_s22 = int_to_ptr.vmem [resolvable:$false] %s5598_s22 }
  0x51   : > { %s5600_s23 = scalar_lea.vmem %s5599_s22, 2048  ;;  %p5601_p9 = scmp.lt.s32.totalorder %s301_s4, %s5599_s22 }
  0x52   : > { %p5597_p11 = pneg %p5596_p6  ;;  %p5602_p12 = scmp.lt.s32.totalorder %s5600_s23, %s5593_s2 }
  0x54   : > { %p5603_p10 = por %p5602_p12, %p5601_p9 }
  0x56   : > { %p5604_p0 = pnand %p5603_p10, %p5597_p11 }
  0x58   : > { %5607 = shalt.err (!%p5604_p0)
}
  0x59   : > { %s6783_s7 = smov 4   ;;  %s6784_s8 = smov 64  }
  0x5a   : > { %5271 = dma.hbm_to_vmem [thread:$0]  (!%p5977_p2), %s299_s25, 1024, %s301_s4, %s287_s14, %s6784_s8, %s6784_s8, %s6783_s7  }
  0x5b   : > { %312 = sbr.rel (%p5894_p8) target bundleno = 1476 (0x5c4), region = 48 }
  0x60   : > { %s5994_s10 = sand.u32 1, %s5745_s28  }
  0x61   : > { %s4195_s26 = sshll.u32 %s5994_s10, 6  ;;  %s315_s21 = scalar_lea.sflag [#allocation6], %s5994_s10 }
  0x62   : > { %s6000_s27 = scalar_lea.vmem [#allocation5], %s4195_s26 }
  0x63   : > { %5720 = dma.done.wait (%p5884_p4), %s315_s21, 1024  }
  0x64   : > { %5722 = vsyncadd (%p5884_p4), %s315_s21, 4294966272 }
  0x65   : > { %5724 = dma.done.wait (%p5874_p1), [#allocation9], 10240  }
  0x66   : > { %5726 = vsyncadd (%p5874_p1), [#allocation9], 4294957056 }
  0x67   : > { %5728 = dma.done.wait (%p5874_p1), [#allocation12], 1024  }
  0x68   : > { %5730 = vsyncadd (%p5874_p1), [#allocation12], 4294966272  ;;  %v5362_v0 = vld [vmem:[#allocation8 + $0x38] sm:$0xff]   ;;  %v5363_v1 = vld [vmem:[#allocation8 + $0x30] sm:$0xff]   ;;  %s4200_s4 = sshll.u32 %s5753_s30, 3  ;;  %s4204_s19 = sshll.u32 %s5757_s9, 5 }
  0x69   : > { %4830 = vmatprep.subr.bf16.mxu0 %v5362_v0  ;;  %5222 = vmatprep.subr.bf16.mxu1 %v5362_v0  ;;  %v5364_v2 = vld [vmem:[#allocation8 + $0x28] sm:$0xff]   ;;  %v5365_v3 = vld [vmem:[#allocation8 + $0x20] sm:$0xff]   ;;  %v5366_v6 = vld [vmem:[#allocation8 + $0x18] sm:$0xff]   ;;  %s4202_s15 = sadd.s32 4294967294, %s4200_s4  ;;  %p5283_p1 = scmp.gt.s32.totalorder %s5753_s30, 0 }
  0x6a   : > { %4831 = vmatpush3.bf16.msra.mxu0 %v5362_v0  ;;  %5230 = vmatpush3.bf16.msra.mxu1 %v5362_v0  ;;  %v5370_v4 = vld [vmem:[%s6000_s27] sm:$0xff]   ;;  %v5367_v7 = vld [vmem:[#allocation8 + $0x10] sm:$0xff]   ;;  %v5368_v8 = vld [vmem:[#allocation8 + $0x8] sm:$0xff]   ;;  %s4203_s17 = sshll.u32 %s4202_s15, 1  ;;  %s5777_s2 = smov [#allocation3]  }
  0x6b   : > { %4832 = vmatprep.subr.bf16.mxu0 %v5363_v1  ;;  %5223 = vmatprep.subr.bf16.mxu1 %v5363_v1  ;;  %v5371_v5 = vld [vmem:[%s6000_s27 + $0x20] sm:$0xff]   ;;  %v5372_v10 = vld [vmem:[%s6000_s27 + $0x8] sm:$0xff]   ;;  %v5374_v12 = vld [vmem:[%s6000_s27 + $0x10] sm:$0xff]   ;;  %s372_s13 = sadd.s32 %s4204_s19, %s4203_s17  ;;  %s382_s20 = sshll.u32 %s5777_s2, 4  ;;  %s6031_s20 = int_to_ptr.vmem [resolvable:$true] %s382_s20 }
  0x6c   : > { %4846 = vmatprep.mubr.bf16.mxu0 %v5370_v4  ;;  %4854 = vmatprep.mubr.bf16.mxu1 %v5371_v5  ;;  %v5369_v9 = vld [vmem:[#allocation8] sm:$0xff]   ;;  %v5373_v11 = vld [vmem:[%s6000_s27 + $0x28] sm:$0xff]   ;;  %v5375_v13 = vld [vmem:[%s6000_s27 + $0x30] sm:$0xff]   ;;  %s4205_s18 = sshll.u32 %s372_s13, 6  ;;  %s4506_s22 = sshll.u32 %s5753_s30, 4 }
  0x6d   : > { %v5376_v14 = vld [vmem:[%s6000_s27 + $0x18] sm:$0xff]   ;;  %s374_s14 = scalar_lea.hbm %s6744_s1, %s4205_s18  ;;  %s5612_s21 = scalar_lea.hbm %s6744_s1, 4096 }
  0x6e   : > { %4833 = vmatpush3.bf16.msra.mxu0 %v5363_v1  ;;  %5231 = vmatpush3.bf16.msra.mxu1 %v5363_v1  ;;  %v5377_v15 = vld [vmem:[%s6000_s27 + $0x38] sm:$0xff]   ;;  %s5608_s23 = scalar_lea.hbm %s374_s14, 256  ;;  %p5613_p5 = scmp.lt.s32.totalorder %s374_s14, %s6744_s1 }
  0x6f   : > { %4834 = vmatprep.subr.bf16.mxu0 %v5364_v2  ;;  %5224 = vmatprep.subr.bf16.mxu1 %v5364_v2  ;;  %p5609_p8 = scmp.ne.s32.totalorder %s374_s14, %s5608_s23  ;;  %p5614_p7 = scmp.lt.s32.totalorder %s5612_s21, %s5608_s23 }
  0x71   : > { %p5610_p3 = pnand %p5609_p8, %p5283_p1  ;;  %p5615_p6 = por %p5614_p7, %p5613_p5 }
  0x72   : > { %4835 = vmatpush3.bf16.msra.mxu0 %v5364_v2  ;;  %5232 = vmatpush3.bf16.msra.mxu1 %v5364_v2 }
  0x73   : > { %4836 = vmatprep.subr.bf16.mxu0 %v5365_v3  ;;  %5225 = vmatprep.subr.bf16.mxu1 %v5365_v3  ;;  %p5611_p2 = pneg %p5610_p3 }
  0x75   : > { %p5616_p11 = pnand %p5615_p6, %p5611_p2 }
  0x76   : > { %4837 = vmatpush3.bf16.msra.mxu0 %v5365_v3  ;;  %5233 = vmatpush3.bf16.msra.mxu1 %v5365_v3 }
  0x77   : > { %4838 = vmatprep.subr.bf16.mxu0 %v5366_v6  ;;  %5226 = vmatprep.subr.bf16.mxu1 %v5366_v6 }
  0x7a   : > { %4839 = vmatpush3.bf16.msra.mxu0 %v5366_v6  ;;  %5234 = vmatpush3.bf16.msra.mxu1 %v5366_v6 }
  0x7b   : > { %4840 = vmatprep.subr.bf16.mxu0 %v5367_v7  ;;  %5227 = vmatprep.subr.bf16.mxu1 %v5367_v7 }
  0x7e   : > { %4841 = vmatpush3.bf16.msra.mxu0 %v5367_v7  ;;  %5235 = vmatpush3.bf16.msra.mxu1 %v5367_v7 }
  0x7f   : > { %4842 = vmatprep.subr.bf16.mxu0 %v5368_v8  ;;  %5228 = vmatprep.subr.bf16.mxu1 %v5368_v8 }
  0x82   : > { %4843 = vmatpush3.bf16.msra.mxu0 %v5368_v8  ;;  %5236 = vmatpush3.bf16.msra.mxu1 %v5368_v8 }
  0x83   : > { %4844 = vmatprep.subr.bf16.mxu0 %v5369_v9  ;;  %5229 = vmatprep.subr.bf16.mxu1 %v5369_v9 }
  0x86   : > { %4845 = vmatpush3.bf16.msra.mxu0 %v5369_v9  ;;  %5237 = vmatpush3.bf16.msra.mxu1 %v5369_v9 }
  0x89   : > { %4847 = vmatmul.mubr.bf16.vlgmr.msra.gmra.mxu0 %v5372_v10  ;;  %4855 = vmatmul.mubr.bf16.vlgmr.msra.gmra.mxu1 %v5373_v11 }
  0x8a   : > { %4850 = vmatprep.mubr.bf16.mxu0 %v5374_v12  ;;  %4858 = vmatprep.mubr.bf16.mxu1 %v5375_v13 }
  0x91   : > { %4851 = vmatmul.mubr.bf16.gmra.mxu0 %v5376_v14  ;;  %4859 = vmatmul.mubr.bf16.gmra.mxu1 %v5377_v15 }
  0x92   : > { %5619 = shalt.err (!%p5616_p11)  }
  0x93   : > { %s5620_s18 = scalar_lea.vmem %s6031_s20, 256  ;;  %s5626_s16 = scalar_lea.vmem %s6031_s20, 512 }
  0x94   : > { %p5621_p9 = scmp.ne.s32.totalorder %s6031_s20, %s5620_s18  ;;  %p5627_p0 = scmp.lt.s32.totalorder %s6031_s20, %s6031_s20 }
  0x95   : > { %p5628_p8 = scmp.lt.s32.totalorder %s5626_s16, %s5620_s18 }
  0x96   : > { %p5622_p12 = pnand %p5621_p9, %p5283_p1 }
  0x97   : > { %p5629_p3 = por %p5628_p8, %p5627_p0 }
  0x98   : > { %p5623_p10 = pneg %p5622_p12 }
  0x9a   : > { %p5630_p5 = pnand %p5629_p3, %p5623_p10 }
  0x9c   : > { %5633 = shalt.err (!%p5630_p5)  }
  0x9d   : > { %5253 = dma.hbm_to_vmem [thread:$0]  (%p5283_p1), %s374_s14, 256, %s6031_s20, [#allocation4] }
  0x9e   : > { %s6060_s25 = sadd.s32 %s4506_s22, %s4204_s19  ;;  %p5284_p7 = scmp.lt.s32.totalorder %s5753_s30, 1 }
  0x9f   : > { %s4210_s2 = sshll.u32 %s6060_s25, 6  ;;  %s5778_s15 = smov [#allocation3 + $0x10]  }
  0xa0   : > { %s4107_s8 = scalar_lea.hbm %s6744_s1, %s4210_s2  ;;  %s405_s17 = sshll.u32 %s5778_s15, 4  ;;  %s406_s17 = int_to_ptr.vmem [resolvable:$true] %s405_s17 }
  0xa1   : > { %s4108_s4 = scalar_lea.hbm %s4107_s8, 1024  ;;  %s5660_s13 = scalar_lea.hbm %s4107_s8, 1280 }
  0xa2   : > { %p5635_p6 = scmp.ne.s32.totalorder %s4108_s4, %s5660_s13  ;;  %p5639_p9 = scmp.lt.s32.totalorder %s4108_s4, %s6744_s1 }
  0xa3   : > { %p5640_p12 = scmp.lt.s32.totalorder %s5612_s21, %s5660_s13 }
  0xa4   : > { %p5636_p1 = pnand %p5635_p6, %p5284_p7 }
  0xa5   : > { %p5641_p10 = por %p5640_p12, %p5639_p9 }
  0xa6   : > { %p5637_p11 = pneg %p5636_p1 }
  0xa8   : > { %p5642_p0 = pnand %p5641_p10, %p5637_p11 }
  0xaa   : > { %5645 = shalt.err (!%p5642_p0)  }
  0xab   : > { %s5646_s18 = scalar_lea.vmem %s406_s17, 256  ;;  %p5653_p6 = scmp.lt.s32.totalorder %s406_s17, %s6031_s20 }
  0xac   : > { %p5647_p8 = scmp.ne.s32.totalorder %s406_s17, %s5646_s18  ;;  %p5654_p1 = scmp.lt.s32.totalorder %s5626_s16, %s5646_s18 }
  0xae   : > { %p5648_p3 = pnand %p5647_p8, %p5284_p7  ;;  %p5655_p2 = por %p5654_p1, %p5653_p6 }
  0xb0   : > { %p5649_p5 = pneg %p5648_p3 }
  0xb2   : > { %p5656_p4 = pnand %p5655_p2, %p5649_p5 }
  0xb4   : > { %5659 = shalt.err (!%p5656_p4)  }
  0xb5   : > { %5255 = dma.hbm_to_vmem [thread:$0]  (%p5284_p7), %s4108_s4, 256, %s406_s17, [#allocation4 + $0x1]  ;;  %v6089_v16 = vld [vmem:[%s6746_s3] ss:$0 sm:$0xff] }
  0xb6   : > { %s6109_s20 = scalar_lea.vmem [#allocation13], %s4195_s26  ;;  %p6785_p4 = scmp.le.s32.totalorder %s5753_s30, 0 }
 0x149   : > { %v4848_v17 = vpop.f32.mrf.mxu0  ;;  %v4856_v18 = vpop.f32.mrf.mxu1 }
 0x14a   : > { %v587_v19 = vadd.f32 %v4848_v17, %v6089_v16  ;;  %v619_v20 = vadd.f32 %v4856_v18, %v6089_v16 }
 0x14b   : > { %v578_v21 = vpop.f32.mrf.mxu0  ;;  %v610_v22 = vpop.f32.mrf.mxu1 }
 0x14c   : > { %v643_v23 = vmax.f32 %v587_v19, 0.0  ;;  %v651_v24 = vmax.f32 %v619_v20, 0.0  ;;  %v579_v25 = vadd.f32 %v6089_v16, %v578_v21  ;;  %v611_v26 = vadd.f32 %v6089_v16, %v610_v22 }
 0x14d   : > { %v4849_v27 = vpop.f32.mrf.mxu0  ;;  %v4857_v28 = vpop.f32.mrf.mxu1 }
 0x14e   : > { %v4509_v29 = vpack.c.bf16 %v643_v23, %v643_v23  ;;  %v4517_v30 = vpack.c.bf16 %v651_v24, %v651_v24  ;;  %v641_v31 = vmax.f32 %v579_v25, 0.0  ;;  %v649_v32 = vmax.f32 %v611_v26, 0.0 }
 0x14f   : > { %v590_v33 = vadd.f32 %v4849_v27, %v6089_v16  ;;  %v622_v34 = vadd.f32 %v4857_v28, %v6089_v16  ;;  %v581_v35 = vpop.f32.mrf.mxu0  ;;  %v613_v36 = vpop.f32.mrf.mxu1 }
 0x150   : > { %724 = vst [vmem:[#allocation2 + $0x34] sm:$0xf] %v4509_v29  ;;  %732 = vst [vmem:[#allocation2 + $0x74] sm:$0xf] %v4517_v30  ;;  %v4507_v37 = vpack.c.bf16 %v641_v31, %v641_v31  ;;  %v4515_v38 = vpack.c.bf16 %v649_v32, %v649_v32  ;;  %v582_v39 = vadd.f32 %v6089_v16, %v581_v35 }
 0x151   : > { %v614_v40 = vadd.f32 %v6089_v16, %v613_v36  ;;  %v644_v41 = vmax.f32 %v590_v33, 0.0  ;;  %v652_v42 = vmax.f32 %v622_v34, 0.0  ;;  %v4852_v43 = vpop.f32.mrf.mxu0  ;;  %v4860_v44 = vpop.f32.mrf.mxu1 }
 0x152   : > { %722 = vst [vmem:[#allocation2 + $0x24] sm:$0xf] %v4507_v37  ;;  %730 = vst [vmem:[#allocation2 + $0x64] sm:$0xf] %v4515_v38  ;;  %v642_v45 = vmax.f32 %v582_v39, 0.0  ;;  %v603_v47 = vadd.f32 %v4852_v43, %v6089_v16  ;;  %v635_v48 = vadd.f32 %v4860_v44, %v6089_v16 }
 0x153   : > { %v650_v46 = vmax.f32 %v614_v40, 0.0  ;;  %v4510_v49 = vpack.c.bf16 %v644_v41, %v644_v41  ;;  %v4518_v50 = vpack.c.bf16 %v652_v42, %v652_v42  ;;  %v594_v51 = vpop.f32.mrf.mxu0  ;;  %v626_v52 = vpop.f32.mrf.mxu1 }
 0x154   : > { %v4508_v53 = vpack.c.bf16 %v642_v45, %v642_v45  ;;  %v647_v55 = vmax.f32 %v603_v47, 0.0  ;;  %v655_v56 = vmax.f32 %v635_v48, 0.0  ;;  %v595_v57 = vadd.f32 %v6089_v16, %v594_v51 }
 0x155   : > { %v4516_v54 = vpack.c.bf16 %v650_v46, %v650_v46  ;;  %725 = vst [vmem:[#allocation2 + $0x38] sm:$0xf] %v4510_v49  ;;  %733 = vst [vmem:[#allocation2 + $0x78] sm:$0xf] %v4518_v50  ;;  %v627_v58 = vadd.f32 %v6089_v16, %v626_v52  ;;  %v4853_v59 = vpop.f32.mrf.mxu0  ;;  %v4861_v60 = vpop.f32.mrf.mxu1 }
 0x156   : > { %723 = vst [vmem:[#allocation2 + $0x28] sm:$0xf] %v4508_v53  ;;  %v4513_v61 = vpack.c.bf16 %v647_v55, %v647_v55  ;;  %v4521_v62 = vpack.c.bf16 %v655_v56, %v655_v56  ;;  %v606_v63 = vadd.f32 %v4853_v59, %v6089_v16  ;;  %v638_v0 = vadd.f32 %v4861_v60, %v6089_v16 }
 0x157   : > { %731 = vst [vmem:[#allocation2 + $0x68] sm:$0xf] %v4516_v54  ;;  %v645_v1 = vmax.f32 %v595_v57, 0.0  ;;  %v653_v2 = vmax.f32 %v627_v58, 0.0  ;;  %v597_v3 = vpop.f32.mrf.mxu0  ;;  %v629_v4 = vpop.f32.mrf.mxu1 }
 0x158   : > { %728 = vst [vmem:[#allocation2 + $0x54] sm:$0xf] %v4513_v61  ;;  %736 = vst [vmem:[#allocation2 + $0x94] sm:$0xf] %v4521_v62  ;;  %v648_v5 = vmax.f32 %v606_v63, 0.0  ;;  %v656_v6 = vmax.f32 %v638_v0, 0.0  ;;  %v598_v7 = vadd.f32 %v6089_v16, %v597_v3  ;;  %v630_v8 = vadd.f32 %v6089_v16, %v629_v4 }
 0x159   : > { %v4511_v9 = vpack.c.bf16 %v645_v1, %v645_v1  ;;  %v4519_v10 = vpack.c.bf16 %v653_v2, %v653_v2 }
 0x15a   : > { %v4514_v11 = vpack.c.bf16 %v648_v5, %v648_v5  ;;  %v4522_v12 = vpack.c.bf16 %v656_v6, %v656_v6  ;;  %v646_v13 = vmax.f32 %v598_v7, 0.0  ;;  %v654_v14 = vmax.f32 %v630_v8, 0.0  ;;  %740 = sbr.rel (%p6785_p4) target bundleno = 591 (0x24f), region = 84 }
 0x15b   : > { %726 = vst [vmem:[#allocation2 + $0x44] sm:$0xf] %v4511_v9  ;;  %734 = vst [vmem:[#allocation2 + $0x84] sm:$0xf] %v4519_v10 }
 0x15c   : > { %729 = vst [vmem:[#allocation2 + $0x58] sm:$0xf] %v4514_v11  ;;  %737 = vst [vmem:[#allocation2 + $0x98] sm:$0xf] %v4522_v12  ;;  %v4512_v15 = vpack.c.bf16 %v646_v13, %v646_v13  ;;  %v4520_v17 = vpack.c.bf16 %v654_v14, %v654_v14 }
 0x15e   : > { %727 = vst [vmem:[#allocation2 + $0x48] sm:$0xf] %v4512_v15  ;;  %735 = vst [vmem:[#allocation2 + $0x88] sm:$0xf] %v4520_v17 }
 0x15f   : > { %5731 = dma.done.wait [#allocation4], 256 }
 0x160   : > { %5732 = vsyncadd [#allocation4], 4294967040  ;;  %v5378_v16 = vld [vmem:[#allocation8 + $0x38] sm:$0xff]   ;;  %v5379_v18 = vld [vmem:[#allocation8 + $0x30] sm:$0xff]  }
 0x161   : > { %4862 = vmatprep.subr.bf16.mxu0 %v5378_v16  ;;  %v5380_v19 = vld [vmem:[#allocation8 + $0x28] sm:$0xff]   ;;  %v5381_v20 = vld [vmem:[#allocation8 + $0x20] sm:$0xff]   ;;  %v5382_v22 = vld [vmem:[#allocation8 + $0x18] sm:$0xff]  }
 0x162   : > { %4863 = vmatpush3.bf16.msra.mxu0 %v5378_v16  ;;  %v5386_v21 = vld [vmem:[#allocation3] sm:$0xff]   ;;  %v5383_v23 = vld [vmem:[#allocation8 + $0x10] sm:$0xff]   ;;  %v5384_v24 = vld [vmem:[#allocation8 + $0x8] sm:$0xff]  }
 0x163   : > { %4864 = vmatprep.subr.bf16.mxu0 %v5379_v18  ;;  %4878 = vmatprep.mubr.bf16.mxu0 %v5386_v21  ;;  %v5385_v25 = vld [vmem:[#allocation8] sm:$0xff]   ;;  %v5387_v26 = vld [vmem:[#allocation3 + $0x8] sm:$0xff]  }
 0x164   : > { %v4245_v27 = vld [vmem:[%s6746_s3] ss:$0 sm:$0xff] }
 0x166   : > { %4865 = vmatpush3.bf16.msra.mxu0 %v5379_v18 }
 0x167   : > { %4866 = vmatprep.subr.bf16.mxu0 %v5380_v19 }
 0x16a   : > { %4867 = vmatpush3.bf16.msra.mxu0 %v5380_v19 }
 0x16b   : > { %4868 = vmatprep.subr.bf16.mxu0 %v5381_v20 }
 0x16e   : > { %4869 = vmatpush3.bf16.msra.mxu0 %v5381_v20 }
 0x16f   : > { %4870 = vmatprep.subr.bf16.mxu0 %v5382_v22 }
 0x172   : > { %4871 = vmatpush3.bf16.msra.mxu0 %v5382_v22 }
 0x173   : > { %4872 = vmatprep.subr.bf16.mxu0 %v5383_v23 }
 0x176   : > { %4873 = vmatpush3.bf16.msra.mxu0 %v5383_v23 }
 0x177   : > { %4874 = vmatprep.subr.bf16.mxu0 %v5384_v24 }
 0x17a   : > { %4875 = vmatpush3.bf16.msra.mxu0 %v5384_v24 }
 0x17b   : > { %4876 = vmatprep.subr.bf16.mxu0 %v5385_v25 }
 0x17e   : > { %4877 = vmatpush3.bf16.msra.mxu0 %v5385_v25 }
 0x181   : > { %4879 = vmatmul.mubr.bf16.vlgmr.msra.gmra.mxu0 %v5387_v26 }
 0x241   : > { %v4880_v28 = vpop.f32.mrf.mxu0 }
 0x242   : > { %v876_v29 = vadd.f32 %v4880_v28, %v4245_v27 }
 0x243   : > { %v867_v30 = vpop.f32.mrf.mxu0 }
 0x244   : > { %v884_v31 = vmax.f32 %v876_v29, 0.0  ;;  %v868_v32 = vadd.f32 %v4245_v27, %v867_v30 }
 0x245   : > { %v4881_v33 = vpop.f32.mrf.mxu0 }
 0x246   : > { %v4525_v34 = vpack.c.bf16 %v884_v31, %v884_v31  ;;  %v882_v35 = vmax.f32 %v868_v32, 0.0  ;;  %v879_v36 = vadd.f32 %v4881_v33, %v4245_v27 }
 0x247   : > { %v870_v37 = vpop.f32.mrf.mxu0 }
 0x248   : > { %904 = vst [vmem:[#allocation2 + $0x14] sm:$0xf] %v4525_v34  ;;  %v4523_v38 = vpack.c.bf16 %v882_v35, %v882_v35  ;;  %v885_v39 = vmax.f32 %v879_v36, 0.0  ;;  %v871_v40 = vadd.f32 %v4245_v27, %v870_v37 }
 0x24a   : > { %902 = vst [vmem:[#allocation2 + $0x4] sm:$0xf] %v4523_v38  ;;  %v4526_v41 = vpack.c.bf16 %v885_v39, %v885_v39  ;;  %v883_v42 = vmax.f32 %v871_v40, 0.0 }
 0x24c   : > { %905 = vst [vmem:[#allocation2 + $0x18] sm:$0xf] %v4526_v41  ;;  %v4524_v43 = vpack.c.bf16 %v883_v42, %v883_v42 }
 0x24e   : > { %903 = vst [vmem:[#allocation2 + $0x8] sm:$0xf] %v4524_v43 }
 0x24f PF: > { %p6786_p2 = scmp.ge.s32.totalorder %s5753_s30, 1 }
 0x251   : > { %908 = sbr.rel (%p6786_p2) target bundleno = 838 (0x346), region = 88 }
 0x256   : > { %5733 = dma.done.wait [#allocation4 + $0x1], 256 }
 0x257   : > { %5734 = vsyncadd [#allocation4 + $0x1], 4294967040  ;;  %v5388_v44 = vld [vmem:[#allocation8 + $0x38] sm:$0xff]   ;;  %v5389_v45 = vld [vmem:[#allocation8 + $0x30] sm:$0xff]  }
 0x258   : > { %4882 = vmatprep.subr.bf16.mxu0 %v5388_v44  ;;  %v5390_v46 = vld [vmem:[#allocation8 + $0x28] sm:$0xff]   ;;  %v5391_v47 = vld [vmem:[#allocation8 + $0x20] sm:$0xff]   ;;  %v5396_v48 = vld [vmem:[#allocation3 + $0x10] sm:$0xff]  }
 0x259   : > { %4883 = vmatpush3.bf16.msra.mxu0 %v5388_v44  ;;  %4898 = vmatprep.mubr.bf16.mxu0 %v5396_v48  ;;  %v5392_v49 = vld [vmem:[#allocation8 + $0x18] sm:$0xff]   ;;  %v5393_v50 = vld [vmem:[#allocation8 + $0x10] sm:$0xff]   ;;  %v5394_v51 = vld [vmem:[#allocation8 + $0x8] sm:$0xff]  }
 0x25a   : > { %4884 = vmatprep.subr.bf16.mxu0 %v5389_v45  ;;  %v5395_v52 = vld [vmem:[#allocation8] sm:$0xff]   ;;  %v5397_v53 = vld [vmem:[#allocation3 + $0x18] sm:$0xff]  }
 0x25b   : > { %v4261_v54 = vld [vmem:[%s6746_s3] ss:$0 sm:$0xff] }
 0x25d   : > { %4885 = vmatpush3.bf16.msra.mxu0 %v5389_v45 }
 0x25e   : > { %4886 = vmatprep.subr.bf16.mxu0 %v5390_v46 }
 0x261   : > { %4887 = vmatpush3.bf16.msra.mxu0 %v5390_v46 }
 0x262   : > { %4888 = vmatprep.subr.bf16.mxu0 %v5391_v47 }
 0x265   : > { %4889 = vmatpush3.bf16.msra.mxu0 %v5391_v47 }
 0x266   : > { %4890 = vmatprep.subr.bf16.mxu0 %v5392_v49 }
 0x269   : > { %4891 = vmatpush3.bf16.msra.mxu0 %v5392_v49 }
 0x26a   : > { %4892 = vmatprep.subr.bf16.mxu0 %v5393_v50 }
 0x26d   : > { %4893 = vmatpush3.bf16.msra.mxu0 %v5393_v50 }
 0x26e   : > { %4894 = vmatprep.subr.bf16.mxu0 %v5394_v51 }
 0x271   : > { %4895 = vmatpush3.bf16.msra.mxu0 %v5394_v51 }
 0x272   : > { %4896 = vmatprep.subr.bf16.mxu0 %v5395_v52 }
 0x275   : > { %4897 = vmatpush3.bf16.msra.mxu0 %v5395_v52 }
 0x278   : > { %4899 = vmatmul.mubr.bf16.vlgmr.msra.gmra.mxu0 %v5397_v53 }
 0x338   : > { %v4900_v55 = vpop.f32.mrf.mxu0 }
 0x339   : > { %v1046_v56 = vadd.f32 %v4900_v55, %v4261_v54 }
 0x33a   : > { %v1037_v57 = vpop.f32.mrf.mxu0 }
 0x33b   : > { %v1054_v58 = vmax.f32 %v1046_v56, 0.0  ;;  %v1038_v59 = vadd.f32 %v4261_v54, %v1037_v57 }
 0x33c   : > { %v4901_v60 = vpop.f32.mrf.mxu0 }
 0x33d   : > { %v4529_v61 = vpack.c.bf16 %v1054_v58, %v1054_v58  ;;  %v1052_v62 = vmax.f32 %v1038_v59, 0.0  ;;  %v1049_v63 = vadd.f32 %v4901_v60, %v4261_v54 }
 0x33e   : > { %v1040_v0 = vpop.f32.mrf.mxu0 }
 0x33f   : > { %1075 = vst [vmem:[#allocation2 + $0xb4] sm:$0xf] %v4529_v61  ;;  %v4527_v1 = vpack.c.bf16 %v1052_v62, %v1052_v62  ;;  %v1055_v2 = vmax.f32 %v1049_v63, 0.0  ;;  %v1041_v3 = vadd.f32 %v4261_v54, %v1040_v0 }
 0x341   : > { %1073 = vst [vmem:[#allocation2 + $0xa4] sm:$0xf] %v4527_v1  ;;  %v4530_v4 = vpack.c.bf16 %v1055_v2, %v1055_v2  ;;  %v1053_v5 = vmax.f32 %v1041_v3, 0.0 }
 0x343   : > { %1076 = vst [vmem:[#allocation2 + $0xb8] sm:$0xf] %v4530_v4  ;;  %v4528_v6 = vpack.c.bf16 %v1053_v5, %v1053_v5 }
 0x345   : > { %1074 = vst [vmem:[#allocation2 + $0xa8] sm:$0xf] %v4528_v6 }
 0x346 PF: > { %p4276_p7 = scmp.ne.s32.totalorder %s5753_s30, 0 }
 0x348   : > { %1080 = sbr.rel (%p4276_p7) target bundleno = 850 (0x352), region = 92 }
 0x34d   : > { %v5779_v7 = vmov 0  }
 0x34e   : > { %1081 = vst [vmem:[#allocation2] sm:$0xf] %v5779_v7  ;;  %1082 = vst [vmem:[#allocation2 + $0x4] sm:$0xf] %v5779_v7 }
 0x34f   : > { %1083 = vst [vmem:[#allocation2 + $0x8] sm:$0xf] %v5779_v7  ;;  %1084 = vst [vmem:[#allocation2 + $0xc] sm:$0xf] %v5779_v7 }
 0x350   : > { %1085 = vst [vmem:[#allocation2 + $0x10] sm:$0xf] %v5779_v7  ;;  %1086 = vst [vmem:[#allocation2 + $0x14] sm:$0xf] %v5779_v7 }
 0x351   : > { %1087 = vst [vmem:[#allocation2 + $0x18] sm:$0xf] %v5779_v7  ;;  %1088 = vst [vmem:[#allocation2 + $0x1c] sm:$0xf] %v5779_v7 }
 0x352 PF: > { %p4277_p11 = scmp.ne.s32.totalorder %s5753_s30, 1 }
 0x354   : > { %1092 = sbr.rel (%p4277_p11) target bundleno = 862 (0x35e), region = 96 }
 0x359   : > { %v5780_v8 = vmov 0  }
 0x35a   : > { %1094 = vst [vmem:[#allocation2 + $0xa0] sm:$0xf] %v5780_v8  ;;  %1095 = vst [vmem:[#allocation2 + $0xa4] sm:$0xf] %v5780_v8 }
 0x35b   : > { %1096 = vst [vmem:[#allocation2 + $0xa8] sm:$0xf] %v5780_v8  ;;  %1097 = vst [vmem:[#allocation2 + $0xac] sm:$0xf] %v5780_v8 }
 0x35c   : > { %1098 = vst [vmem:[#allocation2 + $0xb0] sm:$0xf] %v5780_v8  ;;  %1099 = vst [vmem:[#allocation2 + $0xb4] sm:$0xf] %v5780_v8 }
 0x35d   : > { %1100 = vst [vmem:[#allocation2 + $0xb8] sm:$0xf] %v5780_v8  ;;  %1101 = vst [vmem:[#allocation2 + $0xbc] sm:$0xf] %v5780_v8 }
 0x35e PF: > { %v5398_v9 = vld [vmem:[#allocation10 + $0x78] sm:$0xff]   ;;  %v5781_v11 = vmov 0   ;;  %v5400_v12 = vld [vmem:[#allocation10 + $0x70] sm:$0xff]   ;;  %v5402_v14 = vld [vmem:[#allocation10 + $0x68] sm:$0xff]   ;;  %vm1174_vm0 = vcmask 1040384   ;;  %vm1175_vm1 = vcmask 1044484  }
 0x35f   : > { %v5399_v10 = vld [vmem:[#allocation10 + $0x38] sm:$0xff]   ;;  %1102 = vst [vmem:[#allocation2] sm:$0xf] %v5781_v11  ;;  %1103 = vst [vmem:[#allocation2 + $0x10] sm:$0xf] %v5781_v11  ;;  %4902 = vmatprep.subr.bf16.mxu0 %v5398_v9  ;;  %v5401_v13 = vld [vmem:[#allocation10 + $0x30] sm:$0xff]  }
 0x360   : > { %1104 = vst [vmem:[#allocation2 + $0x20] sm:$0xf] %v5781_v11  ;;  %1105 = vst [vmem:[#allocation2 + $0x30] sm:$0xf] %v5781_v11  ;;  %4934 = vmatprep.subr.bf16.mxu1 %v5399_v10  ;;  %4903 = vmatpush3.bf16.msra.mxu0 %v5398_v9  ;;  %v5403_v15 = vld [vmem:[#allocation10 + $0x28] sm:$0xff]   ;;  %v5404_v17 = vld [vmem:[#allocation10 + $0x60] sm:$0xff]  }
 0x361   : > { %1106 = vst [vmem:[#allocation2 + $0x40] sm:$0xf] %v5781_v11  ;;  %1107 = vst [vmem:[#allocation2 + $0x50] sm:$0xf] %v5781_v11  ;;  %4935 = vmatpush3.bf16.msra.mxu1 %v5399_v10  ;;  %4904 = vmatprep.subr.bf16.mxu0 %v5400_v12  ;;  %v5405_v16 = vld [vmem:[#allocation10 + $0x20] sm:$0xff]   ;;  %v5406_v18 = vld [vmem:[#allocation10 + $0x58] sm:$0xff]  }
 0x362   : > { %1108 = vst [vmem:[#allocation2 + $0x60] sm:$0xf] %v5781_v11  ;;  %1109 = vst [vmem:[#allocation2 + $0x70] sm:$0xf] %v5781_v11  ;;  %4936 = vmatprep.subr.bf16.mxu1 %v5401_v13  ;;  %v5407_v19 = vld [vmem:[#allocation10 + $0x18] sm:$0xff]   ;;  %v5408_v20 = vld [vmem:[#allocation10 + $0x50] sm:$0xff]  }
 0x363   : > { %1110 = vst [vmem:[#allocation2 + $0x80] sm:$0xf] %v5781_v11  ;;  %1111 = vst [vmem:[#allocation2 + $0x90] sm:$0xf] %v5781_v11  ;;  %v5409_v21 = vld [vmem:[#allocation10 + $0x10] sm:$0xff]   ;;  %v5410_v32 = vld [vmem:[#allocation10 + $0x48] sm:$0xff]  }
 0x364   : > { %1112 = vst [vmem:[#allocation2 + $0xa0] sm:$0xf] %v5781_v11  ;;  %1113 = vst [vmem:[#allocation2 + $0xb0] sm:$0xf] %v5781_v11  ;;  %4905 = vmatpush3.bf16.msra.mxu0 %v5400_v12  ;;  %v1127_v22 = vld [vmem:[#allocation2 + $0x4] sm:$0xf] }
 0x365   : > { %1114 = vst [vmem:[#allocation2 + $0xc] sm:$0xf] %v5781_v11  ;;  %1115 = vst [vmem:[#allocation2 + $0x1c] sm:$0xf] %v5781_v11  ;;  %4937 = vmatpush3.bf16.msra.mxu1 %v5401_v13  ;;  %4906 = vmatprep.subr.bf16.mxu0 %v5402_v14  ;;  %v1249_v23 = vld [vmem:[#allocation2 + $0x8] sm:$0xf] }
 0x366   : > { %1116 = vst [vmem:[#allocation2 + $0x2c] sm:$0xf] %v5781_v11  ;;  %1117 = vst [vmem:[#allocation2 + $0x3c] sm:$0xf] %v5781_v11  ;;  %4938 = vmatprep.subr.bf16.mxu1 %v5403_v15  ;;  %v1126_v24 = vld [vmem:[#allocation2] sm:$0x8]  ;;  %v4286_v26 = vcombine.low %v1127_v22, %v1249_v23 }
 0x367   : > { %1118 = vst [vmem:[#allocation2 + $0x4c] sm:$0xf] %v5781_v11  ;;  %1119 = vst [vmem:[#allocation2 + $0x5c] sm:$0xf] %v5781_v11  ;;  %v1179_v25 = vrot.slane %v1127_v22, 7  ;;  %v4278_v29 = vrot.slane %v1126_v24, 11 }
 0x368   : > { %1120 = vst [vmem:[#allocation2 + $0x6c] sm:$0xf] %v5781_v11  ;;  %1121 = vst [vmem:[#allocation2 + $0x7c] sm:$0xf] %v5781_v11  ;;  %4907 = vmatpush3.bf16.msra.mxu0 %v5402_v14  ;;  %v1128_v27 = vld [vmem:[#allocation2 + $0x8] sm:$0x7]  ;;  %4918 = vmatprep.mubr.bf16.mxu0 %v4286_v26 }
 0x369   : > { %1122 = vst [vmem:[#allocation2 + $0x8c] sm:$0xf] %v5781_v11  ;;  %1123 = vst [vmem:[#allocation2 + $0x9c] sm:$0xf] %v5781_v11  ;;  %4939 = vmatpush3.bf16.msra.mxu1 %v5403_v15  ;;  %4908 = vmatprep.subr.bf16.mxu0 %v5404_v17  ;;  %v6127_v30 = vld [vmem:[#allocation2 + $0x14] sm:$0xf] }
 0x36a   : > { %1124 = vst [vmem:[#allocation2 + $0xac] sm:$0xf] %v5781_v11  ;;  %1125 = vst [vmem:[#allocation2 + $0xbc] sm:$0xf] %v5781_v11  ;;  %4940 = vmatprep.subr.bf16.mxu1 %v5405_v16  ;;  %v1182_v31 = vrot.slane %v1128_v27, 7  ;;  %v5411_v33 = vld [vmem:[#allocation10 + $0x8] sm:$0xff]  }
 0x36b   : > { %vm6123_vm2 = vmor %vm1174_vm0, %vm1175_vm1  ;;  %v1181_v34 = vrot.slane %v1179_v25, 4  ;;  %v1186_v36 = vrot.slane %v6127_v30, 7  ;;  %v1129_v37 = vld [vmem:[#allocation2 + $0x10] sm:$0x8]  ;;  %v1131_v38 = vld [vmem:[#allocation2 + $0x18] sm:$0x7] }
 0x36c   : > { %4909 = vmatpush3.bf16.msra.mxu0 %v5404_v17  ;;  %v1180_v35 = vsel %vm6123_vm2, %v4278_v29, %v1179_v25  ;;  %v5412_v41 = vld [vmem:[#allocation10 + $0x40] sm:$0xff]   ;;  %v4279_v44 = vrot.slane %v1129_v37, 11  ;;  %v1189_v45 = vrot.slane %v1131_v38, 7  ;;  %v1134_v49 = vld [vmem:[#allocation2 + $0x28] sm:$0x7]  ;;  %v5416_v56 = vld [vmem:[#allocation10 + $0xb8] sm:$0xff]  }
 0x36d   : > { %4941 = vmatpush3.bf16.msra.mxu1 %v5405_v16  ;;  %4910 = vmatprep.subr.bf16.mxu0 %v5406_v18  ;;  %v1183_v39 = vsel %vm6123_vm2, %v1181_v34, %v1182_v31  ;;  %v6134_v42 = vld [vmem:[#allocation2 + $0x24] sm:$0xf]  ;;  %v1188_v43 = vrot.slane %v1186_v36, 4  ;;  %v1132_v47 = vld [vmem:[#allocation2 + $0x20] sm:$0x8]  ;;  %v1196_v54 = vrot.slane %v1134_v49, 7 }
 0x36e   : > { %4942 = vmatprep.subr.bf16.mxu1 %v5407_v19  ;;  %v4302_v40 = vcombine.low %v1180_v35, %v1183_v39  ;;  %v1193_v46 = vrot.slane %v6134_v42, 7  ;;  %v5413_v48 = vld [vmem:[#allocation10] sm:$0xff]   ;;  %v6137_v50 = vld [vmem:[#allocation2 + $0x34] sm:$0xf]  ;;  %v1250_v51 = vld [vmem:[#allocation2 + $0x18] sm:$0xf]  ;;  %v1187_v58 = vsel %vm6123_vm2, %v4279_v44, %v1186_v36 }
 0x36f   : > { %v4280_v53 = vrot.slane %v1132_v47, 11  ;;  %v1200_v55 = vrot.slane %v6137_v50, 7  ;;  %v1135_v57 = vld [vmem:[#allocation2 + $0x30] sm:$0x8]  ;;  %v1190_v59 = vsel %vm6123_vm2, %v1188_v43, %v1189_v45  ;;  %v5417_v60 = vld [vmem:[#allocation10 + $0xf8] sm:$0xff]   ;;  %v4287_v0 = vcombine.low %v6127_v30, %v1250_v51  ;;  %v5422_v17 = vld [vmem:[#allocation10 + $0xa8] sm:$0xff]  }
 0x370   : > { %4911 = vmatpush3.bf16.msra.mxu0 %v5406_v18  ;;  %4950 = vmatprep.mubr.bf16.mxu1 %v4302_v40  ;;  %v1195_v52 = vrot.slane %v1193_v46, 4  ;;  %v1251_v61 = vld [vmem:[#allocation2 + $0x28] sm:$0xf]  ;;  %v1137_v63 = vld [vmem:[#allocation2 + $0x38] sm:$0x7]  ;;  %v4303_v3 = vcombine.low %v1187_v58, %v1190_v59  ;;  %v4281_v4 = vrot.slane %v1135_v57, 11 }
 0x371   : > { %4943 = vmatpush3.bf16.msra.mxu1 %v5407_v19  ;;  %4912 = vmatprep.subr.bf16.mxu0 %v5408_v20  ;;  %v1202_v62 = vrot.slane %v1200_v55, 4  ;;  %v1194_v1 = vsel %vm6123_vm2, %v4280_v53, %v1193_v46  ;;  %v1203_v5 = vrot.slane %v1137_v63, 7  ;;  %v6149_v6 = vld [vmem:[#allocation2 + $0x44] sm:$0xf]  ;;  %v1138_v7 = vld [vmem:[#allocation2 + $0x40] sm:$0x8]  ;;  %v4288_v13 = vcombine.low %v6134_v42, %v1251_v61 }
 0x372   : > { %4944 = vmatprep.subr.bf16.mxu1 %v5409_v21  ;;  %v1197_v2 = vsel %vm6123_vm2, %v1195_v52, %v1196_v54  ;;  %v5418_v8 = vld [vmem:[#allocation10 + $0xb0] sm:$0xff]   ;;  %v1207_v9 = vrot.slane %v6149_v6, 7  ;;  %v1140_v10 = vld [vmem:[#allocation2 + $0x48] sm:$0x7]  ;;  %v1252_v15 = vld [vmem:[#allocation2 + $0x38] sm:$0xf] }
 0x373   : > { %v6152_v11 = vld [vmem:[#allocation2 + $0x54] sm:$0xf]  ;;  %v4304_v14 = vcombine.low %v1194_v1, %v1197_v2  ;;  %v4282_v18 = vrot.slane %v1138_v7, 11  ;;  %v1210_v19 = vrot.slane %v1140_v10, 7  ;;  %v1204_v22 = vsel %vm6123_vm2, %v1202_v62, %v1203_v5  ;;  %v1141_v23 = vld [vmem:[#allocation2 + $0x50] sm:$0x8] }
 0x374   : > { %4913 = vmatpush3.bf16.msra.mxu0 %v5408_v20  ;;  %v5419_v12 = vld [vmem:[#allocation10 + $0xf0] sm:$0xff]   ;;  %v1209_v16 = vrot.slane %v1207_v9, 4  ;;  %v1214_v20 = vrot.slane %v6152_v11, 7  ;;  %v1143_v24 = vld [vmem:[#allocation2 + $0x58] sm:$0x7]  ;;  %v5423_v25 = vld [vmem:[#allocation10 + $0xe8] sm:$0xff]   ;;  %v4289_v26 = vcombine.low %v6137_v50, %v1252_v15 }
 0x375   : > { %4945 = vmatpush3.bf16.msra.mxu1 %v5409_v21  ;;  %4914 = vmatprep.subr.bf16.mxu0 %v5410_v32  ;;  %v1201_v21 = vsel %vm6123_vm2, %v4281_v4, %v1200_v55  ;;  %v1253_v29 = vld [vmem:[#allocation2 + $0x48] sm:$0xf]  ;;  %v1208_v30 = vsel %vm6123_vm2, %v4282_v18, %v1207_v9  ;;  %v4283_v34 = vrot.slane %v1141_v23, 11  ;;  %v1217_v35 = vrot.slane %v1143_v24, 7  ;;  %v1144_v37 = vld [vmem:[#allocation2 + $0x60] sm:$0x8] }
 0x376   : > { %4946 = vmatprep.subr.bf16.mxu1 %v5411_v33  ;;  %v4305_v27 = vcombine.low %v1201_v21, %v1204_v22  ;;  %v1211_v31 = vsel %vm6123_vm2, %v1209_v16, %v1210_v19  ;;  %v5424_v38 = vld [vmem:[#allocation10 + $0xa0] sm:$0xff]   ;;  %v1146_v39 = vld [vmem:[#allocation2 + $0x68] sm:$0x7]  ;;  %v6168_v40 = vld [vmem:[#allocation2 + $0x74] sm:$0xf]  ;;  %v4290_v42 = vcombine.low %v6149_v6, %v1253_v29  ;;  %vm1684_vm3 = vcmask 1042432  }
 0x377   : > { %v4306_v43 = vcombine.low %v1208_v30, %v1211_v31  ;;  %v1254_v44 = vld [vmem:[#allocation2 + $0x58] sm:$0xf]  ;;  %vm1685_vm4 = vcmask 1046532   ;;  %v4284_v47 = vrot.slane %v1144_v37, 11  ;;  %v1228_v49 = vrot.slane %v6168_v40, 7  ;;  %v5430_v58 = vld [vmem:[#allocation10 + $0x90] sm:$0xff]  }
 0x378   : > { %4915 = vmatpush3.bf16.msra.mxu0 %v5410_v32  ;;  %v6165_v32 = vld [vmem:[#allocation2 + $0x64] sm:$0xf]  ;;  %v5428_v45 = vld [vmem:[#allocation10 + $0x98] sm:$0xff]   ;;  %v1215_v50 = vsel %vm6123_vm2, %v4283_v34, %v1214_v20  ;;  %v1147_v53 = vld [vmem:[#allocation2 + $0x70] sm:$0x8]  ;;  %s6847_s13 = sld [smem:[#allocation62_spill]] }
 0x379   : > { %4947 = vmatpush3.bf16.msra.mxu1 %v5411_v33  ;;  %4916 = vmatprep.subr.bf16.mxu0 %v5412_v41  ;;  %v1216_v33 = vrot.slane %v1214_v20, 4  ;;  %v1221_v36 = vrot.slane %v6165_v32, 7  ;;  %v5429_v52 = vld [vmem:[#allocation10 + $0xd8] sm:$0xff]   ;;  %v1255_v55 = vld [vmem:[#allocation2 + $0x68] sm:$0xf]  ;;  %v1230_v1 = vrot.slane %v1228_v49, 4  ;;  %vm6190_vm5 = vmor %vm1684_vm3, %vm1685_vm4 }
 0x37a   : > { %4948 = vmatprep.subr.bf16.mxu1 %v5413_v48  ;;  %v1149_v54 = vld [vmem:[#allocation2 + $0x78] sm:$0x7]  ;;  %v1636_v61 = vld [vmem:[#allocation2 + $0x4] sm:$0xe]  ;;  %v1637_v62 = vld [vmem:[#allocation2 + $0x8] sm:$0xf]  ;;  %v4292_v10 = vcombine.low %v6165_v32, %v1255_v55 }
 0x37b   : > { %v1223_v46 = vrot.slane %v1221_v36, 4  ;;  %v1218_v51 = vsel %vm6123_vm2, %v1216_v33, %v1217_v35  ;;  %v1222_v59 = vsel %vm6123_vm2, %v4284_v47, %v1221_v36  ;;  %v1638_v63 = vld [vmem:[#allocation2 + $0xc] sm:$0x1]  ;;  %v6181_v2 = vld [vmem:[#allocation2 + $0x78] sm:$0xf]  ;;  %v1231_v4 = vrot.slane %v1149_v54, 7 }
 0x37c   : > { %4917 = vmatpush3.bf16.msra.mxu0 %v5412_v41  ;;  %v5425_v41 = vld [vmem:[#allocation10 + $0xe0] sm:$0xff]   ;;  %v4307_v57 = vcombine.low %v1215_v50, %v1218_v51  ;;  %v1689_v5 = vrot.slane %v1637_v62, 5  ;;  %v4318_v6 = vrot.slane %v1636_v61, 9  ;;  %v1692_v7 = vrot.slane %v1638_v63, 5  ;;  %v1640_v9 = vld [vmem:[#allocation2 + $0x18] sm:$0xf] }
 0x37d   : > { %4949 = vmatpush3.bf16.msra.mxu1 %v5413_v48  ;;  %4966 = vmatprep.subr.bf16.mxu0 %v5416_v56  ;;  %v1224_v48 = vrot.slane %v1146_v39, 7  ;;  %v5434_v15 = vld [vmem:[#allocation10 + $0x88] sm:$0xff]   ;;  %v6184_v16 = vld [vmem:[#allocation2 + $0x24] sm:$0xf]  ;;  %v4293_v18 = vcombine.low %v6168_v40, %v6181_v2  ;;  %v1956_v24 = vld [vmem:[#allocation2 + $0x30] sm:$0x8] }
 0x37e   : > { %4998 = vmatprep.subr.bf16.mxu1 %v5417_v60  ;;  %v5435_v19 = vld [vmem:[#allocation10 + $0xc8] sm:$0xff]   ;;  %v6199_v30 = vld [vmem:[#allocation2 + $0x34] sm:$0xf]  ;;  %v1958_v31 = vld [vmem:[#allocation2 + $0x38] sm:$0x7]  ;;  %v4343_v34 = vrot.slane %v1956_v24, 11  ;;  %v1690_v36 = vsel %vm6190_vm5, %v4318_v6, %v1689_v5 }
 0x37f   : > { %4919 = vmatmul.mubr.bf16.vlgmr.msra.gmra.mxu0 %v4287_v0  ;;  %v5431_v0 = vld [vmem:[#allocation10 + $0xd0] sm:$0xff]   ;;  %v1955_v22 = vld [vmem:[#allocation2 + $0x28] sm:$0x7]  ;;  %v2010_v35 = vrot.slane %v6199_v30, 7  ;;  %v2013_v39 = vrot.slane %v1958_v31, 7  ;;  %v5438_v54 = vld [vmem:[#allocation10 + $0x138] sm:$0xff]  }
 0x380   : > { %4951 = vmatmul.mubr.bf16.vlgmr.msra.gmra.mxu1 %v4303_v3  ;;  %4967 = vmatpush3.bf16.msra.mxu0 %v5416_v56  ;;  %v4291_v56 = vcombine.low %v6152_v11, %v1254_v44  ;;  %v4285_v3 = vrot.slane %v1147_v53, 11  ;;  %v1691_v11 = vrot.slane %v1689_v5, 4  ;;  %v2006_v29 = vrot.slane %v1955_v22, 7  ;;  %v1643_v47 = vld [vmem:[#allocation2 + $0x28] sm:$0xf]  ;;  %v5439_v61 = vld [vmem:[#allocation10 + $0x178] sm:$0xff]  }
 0x381   : > { %4999 = vmatpush3.bf16.msra.mxu1 %v5417_v60  ;;  %4968 = vmatprep.subr.bf16.mxu0 %v5418_v8  ;;  %v1225_v60 = vsel %vm6123_vm2, %v1223_v46, %v1224_v48  ;;  %v1642_v46 = vld [vmem:[#allocation2 + $0x24] sm:$0xe]  ;;  %v2011_v51 = vsel %vm6123_vm2, %v4343_v34, %v2010_v35  ;;  %v1703_v53 = vrot.slane %v1643_v47, 5  ;;  %v1647_v63 = vld [vmem:[#allocation2 + $0x3c] sm:$0x1]  ;;  %v5442_v31 = vld [vmem:[#allocation10 + $0x128] sm:$0xff]  }
 0x382   : > { %5000 = vmatprep.subr.bf16.mxu1 %v5419_v12  ;;  %4922 = vmatprep.mubr.bf16.mxu0 %v4288_v13  ;;  %v1696_v13 = vrot.slane %v1640_v9, 5  ;;  %v1693_v37 = vsel %vm6190_vm5, %v1691_v11, %v1692_v7  ;;  %v5437_v48 = vld [vmem:[#allocation10 + $0xc0] sm:$0xff]   ;;  %v1961_v6 = vld [vmem:[#allocation2 + $0x48] sm:$0x7]  ;;  %v5440_v9 = vld [vmem:[#allocation10 + $0x130] sm:$0xff]   ;;  %s4038_s9 = sshll.u32 %s6109_s20, 4  ;;  %s6689_s9 = int_to_ptr.vmem [resolvable:$true] %s4038_s9 }
 0x383   : > { %4954 = vmatprep.mubr.bf16.mxu1 %v4304_v14  ;;  %v4308_v14 = vcombine.low %v1222_v59, %v1225_v60  ;;  %v1645_v59 = vld [vmem:[#allocation2 + $0x34] sm:$0xe]  ;;  %v1646_v60 = vld [vmem:[#allocation2 + $0x38] sm:$0xf]  ;;  %v1705_v62 = vrot.slane %v1703_v53, 4  ;;  %s6849_s22 = sld [smem:[#allocation63_spill]] }
 0x384   : > { %4969 = vmatpush3.bf16.msra.mxu0 %v5418_v8  ;;  %v1639_v8 = vld [vmem:[#allocation2 + $0x14] sm:$0xe]  ;;  %v1698_v32 = vrot.slane %v1696_v13, 4  ;;  %v6218_v2 = vld [vmem:[#allocation2 + $0x44] sm:$0xf]  ;;  %v4321_v5 = vrot.slane %v1645_v59, 9 }
 0x385   : > { %5001 = vmatpush3.bf16.msra.mxu1 %v5419_v12  ;;  %4970 = vmatprep.subr.bf16.mxu0 %v5422_v17  ;;  %v1641_v12 = vld [vmem:[#allocation2 + $0x1c] sm:$0x1]  ;;  %v4319_v21 = vrot.slane %v1639_v8, 9  ;;  %v1962_v8 = vld [vmem:[#allocation2 + $0x50] sm:$0x8]  ;;  %s4022_s21 = scalar_lea.sflag [#allocation7], %s5994_s10 }
 0x386   : > { %5002 = vmatprep.subr.bf16.mxu1 %v5423_v25  ;;  %v1699_v33 = vrot.slane %v1641_v12, 5  ;;  %v2017_v12 = vrot.slane %v6218_v2, 7  ;;  %v1649_v34 = vld [vmem:[#allocation2 + $0x48] sm:$0xf]  ;;  %s5661_s23 = scalar_lea.vmem %s6689_s9, 1024  ;;  %s5782_s25 = smov [#allocation13]  }
 0x387   : > { %4923 = vmatmul.mubr.bf16.gmra.mxu0 %v4289_v26  ;;  %v1232_v26 = vsel %vm6123_vm2, %v1230_v1, %v1231_v4  ;;  %v1697_v44 = vsel %vm6190_vm5, %v4319_v21, %v1696_v13  ;;  %v1959_v1 = vld [vmem:[#allocation2 + $0x40] sm:$0x8]  ;;  %v2020_v13 = vrot.slane %v1961_v6, 7  ;;  %v1967_v59 = vld [vmem:[#allocation2 + $0x68] sm:$0x7]  ;;  %p5662_p9 = scmp.ne.s32.totalorder %s6689_s9, %s5661_s23  ;;  %s5665_s26 = sshll.u32 %s5782_s25, 4  ;;  %s5666_s26 = int_to_ptr.vmem [resolvable:$false] %s5665_s26 }
 0x388   : > { %4955 = vmatmul.mubr.bf16.gmra.mxu1 %v4305_v27  ;;  %4971 = vmatpush3.bf16.msra.mxu0 %v5422_v17  ;;  %v1953_v17 = vld [vmem:[#allocation2 + $0x20] sm:$0x8]  ;;  %v2003_v27 = vrot.slane %v6184_v16, 7  ;;  %v1700_v50 = vsel %vm6190_vm5, %v1698_v32, %v1699_v33  ;;  %v4344_v7 = vrot.slane %v1959_v1, 11  ;;  %v1648_v33 = vld [vmem:[#allocation2 + $0x44] sm:$0xe]  ;;  %p5668_p0 = scmp.lt.s32.totalorder %s6689_s9, %s5666_s26 }
 0x389   : > { %5003 = vmatpush3.bf16.msra.mxu1 %v5423_v25  ;;  %4972 = vmatprep.subr.bf16.mxu0 %v5424_v38  ;;  %v4342_v23 = vrot.slane %v1953_v17, 11  ;;  %v1229_v25 = vsel %vm6123_vm2, %v4285_v3, %v1228_v49  ;;  %v4326_v49 = vcombine.low %v1690_v36, %v1693_v37  ;;  %v4327_v3 = vcombine.low %v1697_v44, %v1700_v50  ;;  %v1650_v37 = vld [vmem:[#allocation2 + $0x4c] sm:$0x1]  ;;  %v1970_v1 = vld [vmem:[#allocation2 + $0x78] sm:$0x7]  ;;  %s6686_s18 = scalar_lea.hbm %s6849_s22, %s4210_s2  ;;  %p5663_p12 = pnand %p5662_p9, %p5954_p13 }
 0x38a   : > { %5004 = vmatprep.subr.bf16.mxu1 %v5425_v41  ;;  %4926 = vmatprep.mubr.bf16.mxu0 %v4290_v42  ;;  %v4309_v40 = vcombine.low %v1229_v25, %v1232_v26  ;;  %v2018_v22 = vsel %vm6123_vm2, %v4344_v7, %v2017_v12  ;;  %v5441_v25 = vld [vmem:[#allocation10 + $0x170] sm:$0xff]   ;;  %v1720_v44 = vrot.slane %v1650_v37, 5  ;;  %v2041_v7 = vrot.slane %v1970_v1, 7  ;;  %s5667_s16 = scalar_lea.vmem %s5666_s26, 2048 }
 0x38b   : > { %4958 = vmatprep.mubr.bf16.mxu1 %v4306_v43  ;;  %v2004_v42 = vsel %vm6123_vm2, %v4342_v23, %v2003_v27  ;;  %v2012_v43 = vrot.slane %v2010_v35, 4  ;;  %v2019_v23 = vrot.slane %v2017_v12, 4  ;;  %v5449_v37 = vld [vmem:[#allocation10 + $0x150] sm:$0xff]   ;;  %p5664_p10 = pneg %p5663_p12  ;;  %p5669_p8 = scmp.lt.s32.totalorder %s5667_s16, %s5661_s23 }
 0x38c   : > { %4973 = vmatpush3.bf16.msra.mxu0 %v5424_v38  ;;  %v2005_v38 = vrot.slane %v2003_v27, 4 }
 0x38d   : > { %5005 = vmatpush3.bf16.msra.mxu1 %v5425_v41  ;;  %4974 = vmatprep.subr.bf16.mxu0 %v5428_v45  ;;  %v5436_v41 = vld [vmem:[#allocation10 + $0x80] sm:$0xff]   ;;  %v2021_v32 = vsel %vm6123_vm2, %v2019_v23, %v2020_v13  ;;  %p5670_p3 = por %p5669_p8, %p5668_p0 }
 0x38e   : > { %5006 = vmatprep.subr.bf16.mxu1 %v5429_v52  ;;  %v4352_v36 = vcombine.low %v2018_v22, %v2021_v32  ;;  %v5448_v32 = vld [vmem:[#allocation10 + $0x110] sm:$0xff]  }
 0x38f   : > { %4927 = vmatmul.mubr.bf16.gmra.mxu0 %v4291_v56  ;;  %v2014_v56 = vsel %vm6123_vm2, %v2012_v43, %v2013_v39  ;;  %v1717_v39 = vrot.slane %v1649_v34, 5  ;;  %v5443_v43 = vld [vmem:[#allocation10 + $0x168] sm:$0xff]   ;;  %v1658_v34 = vld [vmem:[#allocation2 + $0x78] sm:$0xf]  ;;  %p5671_p5 = pnand %p5670_p3, %p5664_p10 }
 0x390   : > { %4959 = vmatmul.mubr.bf16.gmra.mxu1 %v4307_v57  ;;  %4975 = vmatpush3.bf16.msra.mxu0 %v5428_v45  ;;  %v2007_v45 = vsel %vm6123_vm2, %v2005_v38, %v2006_v29  ;;  %v4320_v57 = vrot.slane %v1642_v46, 9  ;;  %v4351_v4 = vcombine.low %v2011_v51, %v2014_v56  ;;  %v4322_v38 = vrot.slane %v1648_v33, 9  ;;  %v1653_v46 = vld [vmem:[#allocation2 + $0x5c] sm:$0x1] }
 0x391   : > { %5007 = vmatpush3.bf16.msra.mxu1 %v5429_v52  ;;  %4976 = vmatprep.subr.bf16.mxu0 %v5430_v58  ;;  %v1644_v52 = vld [vmem:[#allocation2 + $0x2c] sm:$0x1]  ;;  %v4350_v55 = vcombine.low %v2004_v42, %v2007_v45  ;;  %v1652_v45 = vld [vmem:[#allocation2 + $0x58] sm:$0xf]  ;;  %v1719_v47 = vrot.slane %v1717_v39, 4  ;;  %v1727_v50 = vrot.slane %v1653_v46, 5 }
 0x392   : > { %5008 = vmatprep.subr.bf16.mxu1 %v5431_v0  ;;  %4930 = vmatprep.mubr.bf16.mxu0 %v4292_v10  ;;  %v1704_v10 = vsel %vm6190_vm5, %v4320_v57, %v1703_v53  ;;  %v1718_v53 = vsel %vm6190_vm5, %v4322_v38, %v1717_v39  ;;  %v1973_v46 = vld [vmem:[#allocation2 + $0x88] sm:$0x7] }
 0x393   : > { %4962 = vmatprep.mubr.bf16.mxu1 %v4308_v14  ;;  %v6225_v14 = vld [vmem:[#allocation2 + $0x54] sm:$0xf]  ;;  %v1721_v57 = vsel %vm6190_vm5, %v1719_v47, %v1720_v44 }
 0x394   : > { %4977 = vmatpush3.bf16.msra.mxu0 %v5430_v58  ;;  %v1706_v58 = vrot.slane %v1644_v52, 5  ;;  %v2024_v21 = vrot.slane %v6225_v14, 7  ;;  %v5444_v52 = vld [vmem:[#allocation10 + $0x120] sm:$0xff]  }
 0x395   : > { %5009 = vmatpush3.bf16.msra.mxu1 %v5431_v0  ;;  %4978 = vmatprep.subr.bf16.mxu0 %v5434_v15  ;;  %v1710_v0 = vrot.slane %v1646_v60, 5 }
 0x396   : > { %5010 = vmatprep.subr.bf16.mxu1 %v5435_v19  ;;  %v1707_v11 = vsel %vm6190_vm5, %v1705_v62, %v1706_v58  ;;  %v2026_v27 = vrot.slane %v2024_v21, 4 }
 0x397   : > { %4931 = vmatmul.mubr.bf16.gmra.mxu0 %v4293_v18  ;;  %v1712_v17 = vrot.slane %v1710_v0, 4  ;;  %v1713_v18 = vrot.slane %v1647_v63, 5  ;;  %v4328_v26 = vcombine.low %v1704_v10, %v1707_v11  ;;  %v1711_v29 = vsel %vm6190_vm5, %v4321_v5, %v1710_v0  ;;  %v6247_v0 = vld [vmem:[#allocation2 + $0x74] sm:$0xf] }
 0x398   : > { %4963 = vmatmul.mubr.bf16.gmra.mxu1 %v4309_v40  ;;  %4979 = vmatpush3.bf16.msra.mxu0 %v5434_v15  ;;  %v1964_v15 = vld [vmem:[#allocation2 + $0x58] sm:$0x7]  ;;  %v1651_v40 = vld [vmem:[#allocation2 + $0x54] sm:$0xe]  ;;  %v2034_v63 = vrot.slane %v1967_v59, 7  ;;  %v2038_v6 = vrot.slane %v6247_v0, 7 }
 0x399   : > { %5011 = vmatpush3.bf16.msra.mxu1 %v5435_v19  ;;  %4980 = vmatprep.subr.bf16.mxu0 %v5436_v41  ;;  %v4345_v19 = vrot.slane %v1962_v8, 11  ;;  %v2027_v24 = vrot.slane %v1964_v15, 7  ;;  %v1714_v35 = vsel %vm6190_vm5, %v1712_v17, %v1713_v18  ;;  %v5446_v8 = vld [vmem:[#allocation10 + $0x118] sm:$0xff]  }
 0x39a   : > { %5012 = vmatprep.subr.bf16.mxu1 %v5437_v48  ;;  %4982 = vmatprep.mubr.bf16.mxu0 %v4326_v49  ;;  %v1724_v49 = vrot.slane %v1652_v45, 5  ;;  %v4329_v51 = vcombine.low %v1711_v29, %v1714_v35  ;;  %v2040_v15 = vrot.slane %v2038_v6, 4  ;;  %v5447_v17 = vld [vmem:[#allocation10 + $0x158] sm:$0xff]  }
 0x39b   : > { %5014 = vmatprep.mubr.bf16.mxu1 %v4350_v55  ;;  %v2028_v42 = vsel %vm6123_vm2, %v2026_v27, %v2027_v24  ;;  %v6242_v55 = vld [vmem:[#allocation2 + $0x64] sm:$0xf]  ;;  %v1656_v24 = vld [vmem:[#allocation2 + $0x6c] sm:$0x1]  ;;  %v1657_v27 = vld [vmem:[#allocation2 + $0x74] sm:$0xe] }
 0x39c   : > { %4981 = vmatpush3.bf16.msra.mxu0 %v5436_v41  ;;  %v2025_v41 = vsel %vm6123_vm2, %v4345_v19, %v2024_v21  ;;  %v1726_v58 = vrot.slane %v1724_v49, 4  ;;  %v2031_v62 = vrot.slane %v6242_v55, 7  ;;  %v1654_v19 = vld [vmem:[#allocation2 + $0x64] sm:$0xe]  ;;  %v1655_v21 = vld [vmem:[#allocation2 + $0x68] sm:$0xf]  ;;  %v2042_v23 = vsel %vm6123_vm2, %v2040_v15, %v2041_v7 }
 0x39d   : > { %5013 = vmatpush3.bf16.msra.mxu1 %v5437_v48  ;;  %5030 = vmatprep.subr.bf16.mxu0 %v5438_v54  ;;  %v4323_v48 = vrot.slane %v1651_v40, 9  ;;  %v4353_v56 = vcombine.low %v2025_v41, %v2028_v42  ;;  %v1734_v33 = vrot.slane %v1656_v24, 5  ;;  %v1659_v35 = vld [vmem:[#allocation2 + $0x7c] sm:$0x1]  ;;  %v1738_v40 = vrot.slane %v1658_v34, 5 }
 0x39e   : > { %5062 = vmatprep.subr.bf16.mxu1 %v5439_v61  ;;  %v2033_v10 = vrot.slane %v2031_v62, 4  ;;  %v1728_v12 = vsel %vm6190_vm5, %v1726_v58, %v1727_v50  ;;  %v1741_v41 = vrot.slane %v1659_v35, 5  ;;  %v1971_v42 = vld [vmem:[#allocation2 + $0x80] sm:$0x8]  ;;  %v2267_v7 = vld [vmem:[#allocation2 + $0x28] sm:$0xf] }
 0x39f   : > { %4983 = vmatmul.mubr.bf16.vlgmr.msra.gmra.mxu0 %v4327_v3  ;;  %v5445_v3 = vld [vmem:[#allocation10 + $0x160] sm:$0xff]   ;;  %v1725_v11 = vsel %vm6190_vm5, %v4323_v48, %v1724_v49  ;;  %v1740_v45 = vrot.slane %v1738_v40, 4  ;;  %v4348_v47 = vrot.slane %v1971_v42, 11  ;;  %v1974_v48 = vld [vmem:[#allocation2 + $0x90] sm:$0x8] }
 0x3a0   : > { %5031 = vmatpush3.bf16.msra.mxu0 %v5438_v54  ;;  %5015 = vmatmul.mubr.bf16.vlgmr.msra.gmra.mxu1 %v4351_v4  ;;  %v1965_v54 = vld [vmem:[#allocation2 + $0x60] sm:$0x8]  ;;  %v4330_v4 = vcombine.low %v1718_v53, %v1721_v57  ;;  %v2035_v18 = vsel %vm6123_vm2, %v2033_v10, %v2034_v63  ;;  %v4331_v29 = vcombine.low %v1725_v11, %v1728_v12  ;;  %v6271_v53 = vld [vmem:[#allocation2 + $0x94] sm:$0xf]  ;;  %v4349_v57 = vrot.slane %v1974_v48, 11 }
 0x3a1   : > { %5063 = vmatpush3.bf16.msra.mxu1 %v5439_v61  ;;  %5032 = vmatprep.subr.bf16.mxu0 %v5440_v9  ;;  %v4346_v60 = vrot.slane %v1965_v54, 11  ;;  %v1968_v61 = vld [vmem:[#allocation2 + $0x70] sm:$0x8]  ;;  %v1976_v54 = vld [vmem:[#allocation2 + $0x98] sm:$0x7]  ;;  %v2052_v58 = vrot.slane %v6271_v53, 7 }
 0x3a2   : > { %5064 = vmatprep.subr.bf16.mxu1 %v5441_v25  ;;  %4986 = vmatprep.mubr.bf16.mxu0 %v4328_v26  ;;  %v4347_v5 = vrot.slane %v1968_v61, 11  ;;  %v1731_v26 = vrot.slane %v1655_v21, 5  ;;  %v2055_v59 = vrot.slane %v1976_v54, 7  ;;  %v2493_v10 = vld [vmem:[#allocation2 + $0x24] sm:$0xe] }
 0x3a3   : > { %5018 = vmatprep.mubr.bf16.mxu1 %v4352_v36  ;;  %v4325_v36 = vrot.slane %v1657_v27, 9  ;;  %v2053_v63 = vsel %vm6123_vm2, %v4349_v57, %v2052_v58  ;;  %v2054_v1 = vrot.slane %v2052_v58, 4  ;;  %v5453_v12 = vld [vmem:[#allocation10 + $0x140] sm:$0xff]   ;;  %v2495_v15 = vld [vmem:[#allocation2 + $0x2c] sm:$0x1] }
 0x3a4   : > { %5033 = vmatpush3.bf16.msra.mxu0 %v5440_v9  ;;  %v2032_v9 = vsel %vm6123_vm2, %v4346_v60, %v2031_v62  ;;  %v2039_v13 = vsel %vm6123_vm2, %v4347_v5, %v2038_v6  ;;  %v1733_v39 = vrot.slane %v1731_v26, 4  ;;  %v5450_v60 = vld [vmem:[#allocation10 + $0x108] sm:$0xff]   ;;  %v5452_v6 = vld [vmem:[#allocation10 + $0x100] sm:$0xff]   ;;  %v2497_v24 = vld [vmem:[#allocation2 + $0x38] sm:$0xf] }
 0x3a5   : > { %5065 = vmatpush3.bf16.msra.mxu1 %v5441_v25  ;;  %5034 = vmatprep.subr.bf16.mxu0 %v5442_v31  ;;  %v4354_v22 = vcombine.low %v2032_v9, %v2035_v18  ;;  %v4324_v25 = vrot.slane %v1654_v19, 9  ;;  %v1739_v50 = vsel %vm6190_vm5, %v4325_v36, %v1738_v40  ;;  %v2056_v9 = vsel %vm6123_vm2, %v2054_v1, %v2055_v59  ;;  %v2268_v19 = vld [vmem:[#allocation2 + $0x38] sm:$0xf]  ;;  %v2269_v40 = vld [vmem:[#allocation2 + $0x48] sm:$0xf] }
 0x3a6   : > { %5066 = vmatprep.subr.bf16.mxu1 %v5443_v43  ;;  %v1735_v44 = vsel %vm6190_vm5, %v1733_v39, %v1734_v33  ;;  %v4357_v11 = vcombine.low %v2053_v63, %v2056_v9  ;;  %v4366_v18 = vcombine.low %v6184_v16, %v2267_v7  ;;  %v2550_v27 = vrot.slane %v2497_v24, 5  ;;  %v5456_v33 = vld [vmem:[#allocation10 + $0x1b8] sm:$0xff]   ;;  %v2499_v42 = vld [vmem:[#allocation2 + $0x44] sm:$0xe] }
 0x3a7   : > { %4987 = vmatmul.mubr.bf16.gmra.mxu0 %v4329_v51  ;;  %v1732_v38 = vsel %vm6190_vm5, %v4324_v25, %v1731_v26  ;;  %v2498_v25 = vld [vmem:[#allocation2 + $0x3c] sm:$0x1]  ;;  %v2503_v54 = vld [vmem:[#allocation2 + $0x58] sm:$0xf]  ;;  %v2505_v9 = vld [vmem:[#allocation2 + $0x64] sm:$0xe] }
 0x3a8   : > { %5035 = vmatpush3.bf16.msra.mxu0 %v5442_v31  ;;  %5019 = vmatmul.mubr.bf16.gmra.mxu1 %v4353_v56  ;;  %v4355_v31 = vcombine.low %v2039_v13, %v2042_v23  ;;  %v4332_v49 = vcombine.low %v1732_v38, %v1735_v44  ;;  %v1742_v56 = vsel %vm6190_vm5, %v1740_v45, %v1741_v41  ;;  %v2494_v13 = vld [vmem:[#allocation2 + $0x28] sm:$0xf]  ;;  %v2496_v23 = vld [vmem:[#allocation2 + $0x34] sm:$0xe]  ;;  %v2552_v34 = vrot.slane %v2550_v27, 4  ;;  %v5457_v36 = vld [vmem:[#allocation10 + $0x1f8] sm:$0xff]  }
 0x3a9   : > { %5067 = vmatpush3.bf16.msra.mxu1 %v5443_v43  ;;  %5036 = vmatprep.subr.bf16.mxu0 %v5444_v52  ;;  %v6264_v43 = vld [vmem:[#allocation2 + $0x84] sm:$0xf]  ;;  %v2543_v21 = vrot.slane %v2494_v13, 5  ;;  %v4383_v26 = vrot.slane %v2496_v23, 9  ;;  %v2500_v44 = vld [vmem:[#allocation2 + $0x48] sm:$0xf] }
 0x3aa   : > { %5068 = vmatprep.subr.bf16.mxu1 %v5445_v3  ;;  %4990 = vmatprep.mubr.bf16.mxu0 %v4330_v4  ;;  %v2045_v51 = vrot.slane %v6264_v43, 7  ;;  %v4333_v4 = vcombine.low %v1739_v50, %v1742_v56  ;;  %v2501_v45 = vld [vmem:[#allocation2 + $0x4c] sm:$0x1]  ;;  %v2557_v48 = vrot.slane %v2500_v44, 5  ;;  %v2502_v50 = vld [vmem:[#allocation2 + $0x54] sm:$0xe] }
 0x3ab   : > { %5022 = vmatprep.mubr.bf16.mxu1 %v4354_v22  ;;  %v2546_v22 = vrot.slane %v2495_v15, 5  ;;  %v2551_v16 = vsel %vm6190_vm5, %v4383_v26, %v2550_v27  ;;  %v2504_v56 = vld [vmem:[#allocation2 + $0x5c] sm:$0x1]  ;;  %v4385_v57 = vrot.slane %v2502_v50, 9  ;;  %v4386_v13 = vrot.slane %v2505_v9, 9  ;;  %v5465_v23 = vld [vmem:[#allocation10 + $0x1e0] sm:$0xff]  }
 0x3ac   : > { %5037 = vmatpush3.bf16.msra.mxu0 %v5444_v52  ;;  %v2048_v52 = vrot.slane %v1973_v46, 7  ;;  %v2046_v61 = vsel %vm6123_vm2, %v4348_v47, %v2045_v51  ;;  %v2047_v62 = vrot.slane %v2045_v51, 4  ;;  %v5458_v46 = vld [vmem:[#allocation10 + $0x1b0] sm:$0xff]   ;;  %v4384_v47 = vrot.slane %v2499_v42, 9  ;;  %v2272_v24 = vld [vmem:[#allocation2 + $0x78] sm:$0xf] }
 0x3ad   : > { %5069 = vmatpush3.bf16.msra.mxu1 %v5445_v3  ;;  %5038 = vmatprep.subr.bf16.mxu0 %v5446_v8  ;;  %v5451_v3 = vld [vmem:[#allocation10 + $0x148] sm:$0xff]   ;;  %v4368_v51 = vcombine.low %v6218_v2, %v2269_v40  ;;  %v2559_v59 = vrot.slane %v2557_v48, 4  ;;  %v2516_v50 = vld [vmem:[#allocation2 + $0x9c] sm:$0x1] }
 0x3ae   : > { %5070 = vmatprep.subr.bf16.mxu1 %v5447_v17  ;;  %v2049_v5 = vsel %vm6123_vm2, %v2047_v62, %v2048_v52  ;;  %v2270_v52 = vld [vmem:[#allocation2 + $0x58] sm:$0xf]  ;;  %v2558_v58 = vsel %vm6190_vm5, %v4384_v47, %v2557_v48  ;;  %v5462_v62 = vld [vmem:[#allocation10 + $0x1a8] sm:$0xff]   ;;  %v5470_v47 = vld [vmem:[#allocation10 + $0x190] sm:$0xff]  }
 0x3af   : > { %4991 = vmatmul.mubr.bf16.gmra.mxu0 %v4331_v29  ;;  %v2513_v40 = vld [vmem:[#allocation2 + $0x8c] sm:$0x1] }
 0x3b0   : > { %5039 = vmatpush3.bf16.msra.mxu0 %v5446_v8  ;;  %5023 = vmatmul.mubr.bf16.gmra.mxu1 %v4355_v31  ;;  %v4356_v8 = vcombine.low %v2046_v61, %v2049_v5  ;;  %v2545_v31 = vrot.slane %v2543_v21, 4  ;;  %v2567_v61 = vrot.slane %v2504_v56, 5  ;;  %v2271_v5 = vld [vmem:[#allocation2 + $0x68] sm:$0xf] }
 0x3b1   : > { %5071 = vmatpush3.bf16.msra.mxu1 %v5447_v17  ;;  %5040 = vmatprep.subr.bf16.mxu0 %v5448_v32  ;;  %v4382_v17 = vrot.slane %v2493_v10, 9  ;;  %v2506_v10 = vld [vmem:[#allocation2 + $0x68] sm:$0xf] }
 0x3b2   : > { %5072 = vmatprep.subr.bf16.mxu1 %v5449_v37  ;;  %4994 = vmatprep.mubr.bf16.mxu0 %v4332_v49  ;;  %v2547_v35 = vsel %vm6190_vm5, %v2545_v31, %v2546_v22  ;;  %v2560_v49 = vrot.slane %v2501_v45, 5  ;;  %v2571_v15 = vrot.slane %v2506_v10, 5  ;;  %v2588_v45 = vrot.slane %v2513_v40, 5  ;;  %v6324_v10 = vld [vmem:[#allocation2 + $0x54] sm:$0xf] }
 0x3b3   : > { %5026 = vmatprep.mubr.bf16.mxu1 %v4356_v8  ;;  %v2544_v29 = vsel %vm6190_vm5, %v4382_v17, %v2543_v21  ;;  %v5464_v8 = vld [vmem:[#allocation10 + $0x1a0] sm:$0xff]   ;;  %v2508_v17 = vld [vmem:[#allocation2 + $0x74] sm:$0xe]  ;;  %v2509_v21 = vld [vmem:[#allocation2 + $0x78] sm:$0xf] }
 0x3b4   : > { %5041 = vmatpush3.bf16.msra.mxu0 %v5448_v32  ;;  %v2553_v32 = vrot.slane %v2498_v25, 5  ;;  %v4390_v38 = vcombine.low %v2544_v29, %v2547_v35  ;;  %v2561_v63 = vsel %vm6190_vm5, %v2559_v59, %v2560_v49  ;;  %v4387_v22 = vrot.slane %v2508_v17, 9  ;;  %v2515_v49 = vld [vmem:[#allocation2 + $0x98] sm:$0xf] }
 0x3b5   : > { %5073 = vmatpush3.bf16.msra.mxu1 %v5449_v37  ;;  %5042 = vmatprep.subr.bf16.mxu0 %v5450_v60  ;;  %v4367_v37 = vcombine.low %v6199_v30, %v2268_v19  ;;  %v5459_v30 = vld [vmem:[#allocation10 + $0x1f0] sm:$0xff]   ;;  %v2572_v25 = vsel %vm6190_vm5, %v4386_v13, %v2571_v15  ;;  %v2573_v26 = vrot.slane %v2571_v15, 4  ;;  %v2578_v27 = vrot.slane %v2509_v21, 5  ;;  %v3122_v21 = vld [vmem:[#allocation2 + $0x48] sm:$0xf] }
 0x3b6   : > { %5074 = vmatprep.subr.bf16.mxu1 %v5451_v3  ;;  %v2554_v39 = vsel %vm6190_vm5, %v2552_v34, %v2553_v32  ;;  %v5468_v32 = vld [vmem:[#allocation10 + $0x198] sm:$0xff]   ;;  %v2592_v56 = vrot.slane %v2515_v49, 5  ;;  %v2865_v17 = vrot.slane %v6324_v10, 7 }
 0x3b7   : > { %4995 = vmatmul.mubr.bf16.gmra.mxu0 %v4333_v4  ;;  %v4391_v41 = vcombine.low %v2551_v16, %v2554_v39  ;;  %v5463_v4 = vld [vmem:[#allocation10 + $0x1e8] sm:$0xff]   ;;  %v2579_v16 = vsel %vm6190_vm5, %v4387_v22, %v2578_v27  ;;  %v5469_v34 = vld [vmem:[#allocation10 + $0x1d8] sm:$0xff]  }
 0x3b8   : > { %5043 = vmatpush3.bf16.msra.mxu0 %v5450_v60  ;;  %5027 = vmatmul.mubr.bf16.gmra.mxu1 %v4357_v11  ;;  %v2564_v60 = vrot.slane %v2503_v54, 5  ;;  %v2512_v39 = vld [vmem:[#allocation2 + $0x88] sm:$0xf]  ;;  %v2867_v22 = vrot.slane %v2865_v17, 4 }
 0x3b9   : > { %5075 = vmatpush3.bf16.msra.mxu1 %v5451_v3  ;;  %5044 = vmatprep.subr.bf16.mxu0 %v5452_v6  ;;  %v4392_v3 = vcombine.low %v2558_v58, %v2561_v63  ;;  %v2585_v44 = vrot.slane %v2512_v39, 5  ;;  %v5474_v58 = vld [vmem:[#allocation10 + $0x188] sm:$0xff]   ;;  %v2809_v63 = vld [vmem:[#allocation2 + $0x44] sm:$0xf] }
 0x3ba   : > { %5076 = vmatprep.subr.bf16.mxu1 %v5453_v12  ;;  %5046 = vmatprep.mubr.bf16.mxu0 %v4366_v18  ;;  %v2565_v2 = vsel %vm6190_vm5, %v4385_v57, %v2564_v60  ;;  %v2566_v1 = vrot.slane %v2564_v60, 4  ;;  %v4370_v18 = vcombine.low %v6242_v55, %v2271_v5  ;;  %v2580_v55 = vrot.slane %v2578_v27, 4  ;;  %v2815_v27 = vld [vmem:[#allocation2 + $0x64] sm:$0xf] }
 0x3bb   : > { %5078 = vmatprep.mubr.bf16.mxu1 %v4390_v38  ;;  %v2511_v38 = vld [vmem:[#allocation2 + $0x84] sm:$0xe]  ;;  %v2587_v54 = vrot.slane %v2585_v44, 4  ;;  %v2595_v57 = vrot.slane %v2516_v50, 5  ;;  %v2594_v60 = vrot.slane %v2592_v56, 4  ;;  %v2858_v5 = vrot.slane %v2809_v63, 7 }
 0x3bc   : > { %5045 = vmatpush3.bf16.msra.mxu0 %v5452_v6  ;;  %v4369_v6 = vcombine.low %v6225_v14, %v2270_v52  ;;  %v2568_v7 = vsel %vm6190_vm5, %v2566_v1, %v2567_v61  ;;  %v2510_v14 = vld [vmem:[#allocation2 + $0x7c] sm:$0x1]  ;;  %v4388_v42 = vrot.slane %v2511_v38, 9 }
 0x3bd   : > { %5077 = vmatpush3.bf16.msra.mxu1 %v5453_v12  ;;  %5094 = vmatprep.subr.bf16.mxu0 %v5456_v33  ;;  %v4393_v11 = vcombine.low %v2565_v2, %v2568_v7  ;;  %v2507_v12 = vld [vmem:[#allocation2 + $0x6c] sm:$0x1]  ;;  %v2581_v29 = vrot.slane %v2510_v14, 5  ;;  %v2589_v59 = vsel %vm6190_vm5, %v2587_v54, %v2588_v45  ;;  %v2810_v2 = vld [vmem:[#allocation2 + $0x48] sm:$0x7]  ;;  %v2596_v1 = vsel %vm6190_vm5, %v2594_v60, %v2595_v57 }
 0x3be   : > { %5126 = vmatprep.subr.bf16.mxu1 %v5457_v36  ;;  %v2574_v19 = vrot.slane %v2507_v12, 5  ;;  %v2586_v52 = vsel %vm6190_vm5, %v4388_v42, %v2585_v44  ;;  %v2811_v7 = vld [vmem:[#allocation2 + $0x50] sm:$0x8]  ;;  %v2860_v15 = vrot.slane %v2858_v5, 4  ;;  %v3124_v45 = vld [vmem:[#allocation2 + $0x68] sm:$0xf] }
 0x3bf   : > { %5047 = vmatmul.mubr.bf16.vlgmr.msra.gmra.mxu0 %v4367_v37  ;;  %v2582_v35 = vsel %vm6190_vm5, %v2580_v55, %v2581_v29  ;;  %v4371_v37 = vcombine.low %v6247_v0, %v2272_v24  ;;  %v5471_v0 = vld [vmem:[#allocation10 + $0x1d0] sm:$0xff]   ;;  %v4396_v61 = vcombine.low %v2586_v52, %v2589_v59  ;;  %v4407_v12 = vrot.slane %v2811_v7, 11  ;;  %v2816_v29 = vld [vmem:[#allocation2 + $0x68] sm:$0x7]  ;;  %v5478_v55 = vld [vmem:[#allocation10 + $0x238] sm:$0xff]  }
 0x3c0   : > { %5095 = vmatpush3.bf16.msra.mxu0 %v5456_v33  ;;  %5079 = vmatmul.mubr.bf16.vlgmr.msra.gmra.mxu1 %v4391_v41  ;;  %v2575_v31 = vsel %vm6190_vm5, %v2573_v26, %v2574_v19  ;;  %v4395_v41 = vcombine.low %v2579_v16, %v2582_v35  ;;  %v5476_v19 = vld [vmem:[#allocation10 + $0x180] sm:$0xff]   ;;  %v2875_v16 = vrot.slane %v2816_v29, 7  ;;  %v3123_v35 = vld [vmem:[#allocation2 + $0x58] sm:$0xf]  ;;  %v5481_v42 = vld [vmem:[#allocation10 + $0x230] sm:$0xff]   ;;  %v4432_v52 = vcombine.low %v2815_v27, %v3124_v45 }
 0x3c1   : > { %5127 = vmatpush3.bf16.msra.mxu1 %v5457_v36  ;;  %5096 = vmatprep.subr.bf16.mxu0 %v5458_v46  ;;  %v4394_v33 = vcombine.low %v2572_v25, %v2575_v31  ;;  %v2273_v36 = vld [vmem:[#allocation2 + $0x88] sm:$0xf]  ;;  %v2866_v24 = vsel %vm6123_vm2, %v4407_v12, %v2865_v17  ;;  %v4430_v25 = vcombine.low %v2809_v63, %v3122_v21  ;;  %v2814_v26 = vld [vmem:[#allocation2 + $0x60] sm:$0x8]  ;;  %v6343_v59 = vld [vmem:[#allocation2 + $0x94] sm:$0xf] }
 0x3c2   : > { %5128 = vmatprep.subr.bf16.mxu1 %v5459_v30  ;;  %5050 = vmatprep.mubr.bf16.mxu0 %v4368_v51  ;;  %v4372_v48 = vcombine.low %v6264_v43, %v2273_v36  ;;  %v2274_v51 = vld [vmem:[#allocation2 + $0x98] sm:$0xf]  ;;  %v6335_v36 = vld [vmem:[#allocation2 + $0x74] sm:$0xf]  ;;  %v2893_v63 = vrot.slane %v6343_v59, 7  ;;  %v5485_v17 = vld [vmem:[#allocation10 + $0x220] sm:$0xff]  }
 0x3c3   : > { %5082 = vmatprep.mubr.bf16.mxu1 %v4392_v3  ;;  %v5475_v3 = vld [vmem:[#allocation10 + $0x1c8] sm:$0xff]   ;;  %v2879_v40 = vrot.slane %v6335_v36, 7  ;;  %v2829_v29 = vld [vmem:[#allocation2 + $0xb0] sm:$0x8]  ;;  %v3352_v45 = vld [vmem:[#allocation2 + $0x58] sm:$0xf] }
 0x3c4   : > { %5097 = vmatpush3.bf16.msra.mxu0 %v5458_v46  ;;  %v2514_v46 = vld [vmem:[#allocation2 + $0x94] sm:$0xe]  ;;  %v2895_v12 = vrot.slane %v2893_v63, 4 }
 0x3c5   : > { %5129 = vmatpush3.bf16.msra.mxu1 %v5459_v30  ;;  %5098 = vmatprep.subr.bf16.mxu0 %v5462_v62  ;;  %v4389_v30 = vrot.slane %v2514_v46, 9  ;;  %v4431_v46 = vcombine.low %v6324_v10, %v3123_v35  ;;  %v2828_v10 = vld [vmem:[#allocation2 + $0xa8] sm:$0x7] }
 0x3c6   : > { %5130 = vmatprep.subr.bf16.mxu1 %v5463_v4  ;;  %v3128_v35 = vld [vmem:[#allocation2 + $0xa8] sm:$0xf] }
 0x3c7   : > { %5051 = vmatmul.mubr.bf16.gmra.mxu0 %v4369_v6  ;;  %v2593_v43 = vsel %vm6190_vm5, %v4389_v30, %v2592_v56  ;;  %v2861_v6 = vrot.slane %v2810_v2, 7  ;;  %v2820_v30 = vld [vmem:[#allocation2 + $0x80] sm:$0x8]  ;;  %v2823_v2 = vld [vmem:[#allocation2 + $0x90] sm:$0x8] }
 0x3c8   : > { %5099 = vmatpush3.bf16.msra.mxu0 %v5462_v62  ;;  %5083 = vmatmul.mubr.bf16.gmra.mxu1 %v4393_v11  ;;  %v2808_v62 = vld [vmem:[#allocation2 + $0x40] sm:$0x8]  ;;  %v4397_v9 = vcombine.low %v2593_v43, %v2596_v1  ;;  %v2813_v11 = vld [vmem:[#allocation2 + $0x58] sm:$0x7]  ;;  %v4410_v54 = vrot.slane %v2820_v30, 11 }
 0x3c9   : > { %5131 = vmatpush3.bf16.msra.mxu1 %v5463_v4  ;;  %5100 = vmatprep.subr.bf16.mxu0 %v5464_v8  ;;  %v4406_v4 = vrot.slane %v2808_v62, 11  ;;  %v2862_v14 = vsel %vm6123_vm2, %v2860_v15, %v2861_v6  ;;  %v2825_v1 = vld [vmem:[#allocation2 + $0x98] sm:$0x7] }
 0x3ca   : > { %5132 = vmatprep.subr.bf16.mxu1 %v5465_v23  ;;  %5054 = vmatprep.mubr.bf16.mxu0 %v4370_v18  ;;  %v2868_v18 = vrot.slane %v2813_v11, 7  ;;  %v4411_v11 = vrot.slane %v2823_v2, 11 }
 0x3cb   : > { %5086 = vmatprep.mubr.bf16.mxu1 %v4394_v33  ;;  %v2859_v13 = vsel %vm6123_vm2, %v4406_v4, %v2858_v5  ;;  %v2872_v33 = vrot.slane %v2815_v27, 7  ;;  %v3126_v5 = vld [vmem:[#allocation2 + $0x88] sm:$0xf] }
 0x3cc   : > { %5101 = vmatpush3.bf16.msra.mxu0 %v5464_v8  ;;  %v4373_v8 = vcombine.low %v6271_v53, %v2274_v51  ;;  %v5477_v53 = vld [vmem:[#allocation10 + $0x1c0] sm:$0xff]   ;;  %v2869_v31 = vsel %vm6123_vm2, %v2867_v22, %v2868_v18  ;;  %v2822_v51 = vld [vmem:[#allocation2 + $0x88] sm:$0x7]  ;;  %v2903_v22 = vrot.slane %v2828_v10, 7 }
 0x3cd   : > { %5133 = vmatpush3.bf16.msra.mxu1 %v5465_v23  ;;  %5102 = vmatprep.subr.bf16.mxu0 %v5468_v32  ;;  %v4414_v23 = vcombine.low %v2859_v13, %v2862_v14  ;;  %v2874_v39 = vrot.slane %v2872_v33, 4  ;;  %v2889_v57 = vrot.slane %v2822_v51, 7  ;;  %v2896_v13 = vrot.slane %v2825_v1, 7  ;;  %v3351_v51 = vld [vmem:[#allocation2 + $0x54] sm:$0xe] }
 0x3ce   : > { %5134 = vmatprep.subr.bf16.mxu1 %v5469_v34 }
 0x3cf   : > { %5055 = vmatmul.mubr.bf16.gmra.mxu0 %v4371_v37  ;;  %v2819_v37 = vld [vmem:[#allocation2 + $0x78] sm:$0x7] }
 0x3d0   : > { %5103 = vmatpush3.bf16.msra.mxu0 %v5468_v32  ;;  %5087 = vmatmul.mubr.bf16.gmra.mxu1 %v4395_v41  ;;  %v4408_v32 = vrot.slane %v2814_v26, 11  ;;  %v4415_v41 = vcombine.low %v2866_v24, %v2869_v31  ;;  %v2882_v49 = vrot.slane %v2819_v37, 7  ;;  %v2894_v24 = vsel %vm6123_vm2, %v4411_v11, %v2893_v63  ;;  %v5486_v26 = vld [vmem:[#allocation10 + $0x218] sm:$0xff]   ;;  %v3350_v37 = vld [vmem:[#allocation2 + $0x4c] sm:$0x1] }
 0x3d1   : > { %5135 = vmatpush3.bf16.msra.mxu1 %v5469_v34  ;;  %5104 = vmatprep.subr.bf16.mxu0 %v5470_v47  ;;  %v2817_v34 = vld [vmem:[#allocation2 + $0x70] sm:$0x8]  ;;  %v2831_v31 = vld [vmem:[#allocation2 + $0xb8] sm:$0x7]  ;;  %v4447_v63 = vrot.slane %v3351_v51, 9 }
 0x3d2   : > { %5136 = vmatprep.subr.bf16.mxu1 %v5471_v0  ;;  %5058 = vmatprep.mubr.bf16.mxu0 %v4372_v48  ;;  %v2873_v38 = vsel %vm6123_vm2, %v4408_v32, %v2872_v33  ;;  %v4409_v44 = vrot.slane %v2817_v34, 11  ;;  %v2881_v48 = vrot.slane %v2879_v40, 4 }
 0x3d3   : > { %5090 = vmatprep.mubr.bf16.mxu1 %v4396_v61  ;;  %v3125_v61 = vld [vmem:[#allocation2 + $0x78] sm:$0xf] }
 0x3d4   : > { %5105 = vmatpush3.bf16.msra.mxu0 %v5470_v47  ;;  %v2876_v47 = vsel %vm6123_vm2, %v2874_v39, %v2875_v16  ;;  %v2880_v43 = vsel %vm6123_vm2, %v4409_v44, %v2879_v40  ;;  %v2883_v60 = vsel %vm6123_vm2, %v2881_v48, %v2882_v49  ;;  %v4433_v7 = vcombine.low %v6335_v36, %v3125_v61  ;;  %v3348_v36 = vld [vmem:[#allocation2 + $0x44] sm:$0xe] }
 0x3d5   : > { %5137 = vmatpush3.bf16.msra.mxu1 %v5471_v0  ;;  %5106 = vmatprep.subr.bf16.mxu0 %v5474_v58  ;;  %v4416_v50 = vcombine.low %v2873_v38, %v2876_v47  ;;  %v2821_v0 = vld [vmem:[#allocation2 + $0x84] sm:$0xf]  ;;  %v4417_v6 = vcombine.low %v2880_v43, %v2883_v60  ;;  %v4413_v39 = vrot.slane %v2829_v29, 11  ;;  %v4446_v47 = vrot.slane %v3348_v36, 9  ;;  %v3363_v36 = vld [vmem:[#allocation2 + $0x94] sm:$0xe] }
 0x3d6   : > { %5138 = vmatprep.subr.bf16.mxu1 %v5475_v3  ;;  %v2886_v56 = vrot.slane %v2821_v0, 7  ;;  %v4434_v21 = vcombine.low %v2821_v0, %v3126_v5  ;;  %v3401_v49 = vrot.slane %v3350_v37, 5  ;;  %v3354_v61 = vld [vmem:[#allocation2 + $0x64] sm:$0xe]  ;;  %v3359_v5 = vld [vmem:[#allocation2 + $0x7c] sm:$0x1] }
 0x3d7   : > { %5059 = vmatmul.mubr.bf16.gmra.mxu0 %v4373_v8  ;;  %v2826_v8 = vld [vmem:[#allocation2 + $0xa0] sm:$0x8]  ;;  %v3365_v37 = vld [vmem:[#allocation2 + $0x9c] sm:$0x1] }
 0x3d8   : > { %5107 = vmatpush3.bf16.msra.mxu0 %v5474_v58  ;;  %5091 = vmatmul.mubr.bf16.gmra.mxu1 %v4397_v9  ;;  %v5482_v58 = vld [vmem:[#allocation10 + $0x228] sm:$0xff]   ;;  %v2888_v62 = vrot.slane %v2886_v56, 4  ;;  %v6355_v9 = vld [vmem:[#allocation2 + $0xa4] sm:$0xf] }
 0x3d9   : > { %5139 = vmatpush3.bf16.msra.mxu1 %v5475_v3  ;;  %5108 = vmatprep.subr.bf16.mxu0 %v5476_v19  ;;  %v2887_v3 = vsel %vm6123_vm2, %v4410_v54, %v2886_v56  ;;  %v2900_v15 = vrot.slane %v6355_v9, 7  ;;  %v3405_v54 = vrot.slane %v3352_v45, 5  ;;  %v5490_v56 = vld [vmem:[#allocation10 + $0x208] sm:$0xff]  }
 0x3da   : > { %5140 = vmatprep.subr.bf16.mxu1 %v5477_v53  ;;  %5110 = vmatprep.mubr.bf16.mxu0 %v4414_v23  ;;  %v2890_v4 = vsel %vm6123_vm2, %v2888_v62, %v2889_v57  ;;  %v3127_v23 = vld [vmem:[#allocation2 + $0x98] sm:$0xf]  ;;  %v3356_v62 = vld [vmem:[#allocation2 + $0x6c] sm:$0x1] }
 0x3db   : > { %5142 = vmatprep.mubr.bf16.mxu1 %v4430_v25  ;;  %v4418_v18 = vcombine.low %v2887_v3, %v2890_v4  ;;  %v2902_v14 = vrot.slane %v2900_v15, 4  ;;  %v2897_v25 = vsel %vm6123_vm2, %v2895_v12, %v2896_v13  ;;  %v4435_v38 = vcombine.low %v6343_v59, %v3127_v23  ;;  %v3129_v57 = vld [vmem:[#allocation2 + $0xb8] sm:$0xf]  ;;  %v3357_v4 = vld [vmem:[#allocation2 + $0x74] sm:$0xe] }
 0x3dc   : > { %5109 = vmatpush3.bf16.msra.mxu0 %v5476_v19  ;;  %v6358_v19 = vld [vmem:[#allocation2 + $0xb4] sm:$0xf]  ;;  %v4419_v34 = vcombine.low %v2894_v24, %v2897_v25  ;;  %v3358_v59 = vld [vmem:[#allocation2 + $0x78] sm:$0xf]  ;;  %v3407_v3 = vrot.slane %v3405_v54, 4  ;;  %v3415_v11 = vrot.slane %v3356_v62, 5 }
 0x3dd   : > { %5141 = vmatpush3.bf16.msra.mxu1 %v5477_v53  ;;  %5158 = vmatprep.subr.bf16.mxu0 %v5478_v55  ;;  %v4412_v53 = vrot.slane %v2826_v8, 11  ;;  %v2907_v27 = vrot.slane %v6358_v19, 7  ;;  %v2904_v33 = vsel %vm6123_vm2, %v2902_v14, %v2903_v22  ;;  %v4437_v1 = vcombine.low %v6358_v19, %v3129_v57  ;;  %v3361_v12 = vld [vmem:[#allocation2 + $0x88] sm:$0xf]  ;;  %v3371_v57 = vld [vmem:[#allocation2 + $0xbc] sm:$0x1] }
 0x3de   : > { %v4449_v13 = vrot.slane %v3357_v4, 9  ;;  %v3426_v14 = vrot.slane %v3361_v12, 5  ;;  %v5497_v4 = vld [vmem:[#allocation11 + $0x20] sm:$0xff]  }
 0x3df   : > { %5111 = vmatmul.mubr.bf16.vlgmr.msra.gmra.mxu0 %v4415_v41  ;;  %v2901_v32 = vsel %vm6123_vm2, %v4412_v53, %v2900_v15  ;;  %v2909_v40 = vrot.slane %v2907_v27, 4  ;;  %v2910_v41 = vrot.slane %v2831_v31, 7  ;;  %v2908_v30 = vsel %vm6123_vm2, %v4413_v39, %v2907_v27  ;;  %v3362_v53 = vld [vmem:[#allocation2 + $0x8c] sm:$0x1]  ;;  %v3364_v31 = vld [vmem:[#allocation2 + $0x98] sm:$0xf] }
 0x3e0   : > { %5159 = vmatpush3.bf16.msra.mxu0 %v5478_v55  ;;  %5143 = vmatmul.mubr.bf16.vlgmr.msra.gmra.mxu1 %v4431_v46  ;;  %v3349_v55 = vld [vmem:[#allocation2 + $0x48] sm:$0xf]  ;;  %v4420_v44 = vcombine.low %v2901_v32, %v2904_v33  ;;  %v4436_v46 = vcombine.low %v6355_v9, %v3128_v35  ;;  %v4448_v9 = vrot.slane %v3354_v61, 9  ;;  %v3422_v15 = vrot.slane %v3359_v5, 5  ;;  %v3366_v39 = vld [vmem:[#allocation2 + $0xa4] sm:$0xe] }
 0x3e1   : > { %5160 = vmatprep.subr.bf16.mxu0 %v5481_v42  ;;  %5114 = vmatprep.mubr.bf16.mxu0 %v4416_v50  ;;  %v3398_v16 = vrot.slane %v3349_v55, 5  ;;  %v3355_v50 = vld [vmem:[#allocation2 + $0x68] sm:$0xf]  ;;  %v2911_v0 = vsel %vm6123_vm2, %v2909_v40, %v2910_v41  ;;  %v3428_v27 = vrot.slane %v3426_v14, 4  ;;  %v3429_v29 = vrot.slane %v3362_v53, 5  ;;  %v5498_v5 = vld [vmem:[#allocation11 + $0x18] sm:$0xff]  }
 0x3e2   : > { %5146 = vmatprep.mubr.bf16.mxu1 %v4432_v52  ;;  %v3353_v52 = vld [vmem:[#allocation2 + $0x5c] sm:$0x1]  ;;  %v4421_v28 = vcombine.low %v2908_v30, %v2911_v0  ;;  %v3367_v55 = vld [vmem:[#allocation2 + $0xa8] sm:$0xf]  ;;  %v3368_v40 = vld [vmem:[#allocation2 + $0xac] sm:$0x1] }
 0x3e3   : > { %v3400_v48 = vrot.slane %v3398_v16, 4  ;;  %v3399_v43 = vsel %vm6190_vm5, %v4446_v47, %v3398_v16  ;;  %v3408_v2 = vrot.slane %v3353_v52, 5  ;;  %v3433_v16 = vrot.slane %v3364_v31, 5 }
 0x3e4   : > { %5161 = vmatpush3.bf16.msra.mxu0 %v5481_v42  ;;  %v5489_v42 = vld [vmem:[#allocation10 + $0x210] sm:$0xff]   ;;  %v3430_v35 = vsel %vm6190_vm5, %v3428_v27, %v3429_v29  ;;  %v4452_v47 = vrot.slane %v3366_v39, 9  ;;  %v3450_v61 = vrot.slane %v3371_v57, 5 }
 0x3e5   : > { %5162 = vmatprep.subr.bf16.mxu0 %v5482_v58  ;;  %v3402_v60 = vsel %vm6190_vm5, %v3400_v48, %v3401_v49  ;;  %v3435_v45 = vrot.slane %v3433_v16, 4  ;;  %v3443_v49 = vrot.slane %v3368_v40, 5 }
 0x3e6   : > { %v4454_v8 = vcombine.low %v3399_v43, %v3402_v60 }
 0x3e7   : > { %5115 = vmatmul.mubr.bf16.gmra.mxu0 %v4417_v6  ;;  %v3419_v6 = vrot.slane %v3358_v59, 5 }
 0x3e8   : > { %5163 = vmatpush3.bf16.msra.mxu0 %v5482_v58  ;;  %5147 = vmatmul.mubr.bf16.gmra.mxu1 %v4433_v7  ;;  %v3412_v58 = vrot.slane %v3355_v50, 5  ;;  %v5493_v7 = vld [vmem:[#allocation10 + $0x200] sm:$0xff]   ;;  %v3370_v50 = vld [vmem:[#allocation2 + $0xb8] sm:$0xf] }
 0x3e9   : > { %5164 = vmatprep.subr.bf16.mxu0 %v5485_v17  ;;  %5118 = vmatprep.mubr.bf16.mxu0 %v4418_v18  ;;  %v3409_v18 = vsel %vm6190_vm5, %v3407_v3, %v3408_v2  ;;  %v3421_v19 = vrot.slane %v3419_v6, 4  ;;  %v3420_v32 = vsel %vm6190_vm5, %v4449_v13, %v3419_v6  ;;  %v3447_v51 = vrot.slane %v3370_v50, 5  ;;  %v5494_v2 = vld [vmem:[#allocation11 + $0x38] sm:$0xff]   ;;  %v5496_v3 = vld [vmem:[#allocation11 + $0x28] sm:$0xff]  }
 0x3ea   : > { %5150 = vmatprep.mubr.bf16.mxu1 %v4434_v21  ;;  %v3414_v10 = vrot.slane %v3412_v58, 4  ;;  %v3360_v21 = vld [vmem:[#allocation2 + $0x84] sm:$0xe]  ;;  %v3413_v22 = vsel %vm6190_vm5, %v4448_v9, %v3412_v58  ;;  %5190 = vmatprep.subr.bf16.mxu1 %v5494_v2 }
 0x3eb   : > { %v3423_v33 = vsel %vm6190_vm5, %v3421_v19, %v3422_v15  ;;  %v3449_v60 = vrot.slane %v3447_v51, 4  ;;  %5191 = vmatpush3.bf16.msra.mxu1 %v5494_v2  ;;  %v5500_v19 = vld [vmem:[#allocation11 + $0x8] sm:$0xff]  }
 0x3ec   : > { %5165 = vmatpush3.bf16.msra.mxu0 %v5485_v17  ;;  %v3406_v17 = vsel %vm6190_vm5, %v4447_v63, %v3405_v54  ;;  %v3416_v23 = vsel %vm6190_vm5, %v3414_v10, %v3415_v11  ;;  %v4457_v41 = vcombine.low %v3420_v32, %v3423_v33  ;;  %v5499_v10 = vld [vmem:[#allocation11 + $0x10] sm:$0xff]  }
 0x3ed   : > { %5166 = vmatprep.subr.bf16.mxu0 %v5486_v26  ;;  %v4455_v24 = vcombine.low %v3406_v17, %v3409_v18  ;;  %v4456_v25 = vcombine.low %v3413_v22, %v3416_v23 }
 0x3ef   : > { %5119 = vmatmul.mubr.bf16.gmra.mxu0 %v4419_v34 }
 0x3f0   : > { %5167 = vmatpush3.bf16.msra.mxu0 %v5486_v26  ;;  %5151 = vmatmul.mubr.bf16.gmra.mxu1 %v4435_v38  ;;  %v4450_v26 = vrot.slane %v3360_v21, 9  ;;  %v3440_v38 = vrot.slane %v3367_v55, 5 }
 0x3f1   : > { %5168 = vmatprep.subr.bf16.mxu0 %v5489_v42  ;;  %5122 = vmatprep.mubr.bf16.mxu0 %v4420_v44  ;;  %v4451_v44 = vrot.slane %v3363_v36, 9 }
 0x3f2   : > { %5154 = vmatprep.mubr.bf16.mxu1 %v4436_v46  ;;  %v3427_v34 = vsel %vm6190_vm5, %v4450_v26, %v3426_v14  ;;  %v3436_v46 = vrot.slane %v3365_v37, 5  ;;  %v3442_v48 = vrot.slane %v3440_v38, 4  ;;  %v3441_v52 = vsel %vm6190_vm5, %v4452_v47, %v3440_v38 }
 0x3f3   : > { %v3434_v30 = vsel %vm6190_vm5, %v4451_v44, %v3433_v16 }
 0x3f4   : > { %5169 = vmatpush3.bf16.msra.mxu0 %v5489_v42  ;;  %v4458_v42 = vcombine.low %v3427_v34, %v3430_v35  ;;  %v3437_v0 = vsel %vm6190_vm5, %v3435_v45, %v3436_v46  ;;  %v3444_v54 = vsel %vm6190_vm5, %v3442_v48, %v3443_v49 }
 0x3f5   : > { %5170 = vmatprep.subr.bf16.mxu0 %v5490_v56  ;;  %v4459_v58 = vcombine.low %v3434_v30, %v3437_v0  ;;  %v4460_v59 = vcombine.low %v3441_v52, %v3444_v54 }
 0x3f7   : > { %5123 = vmatmul.mubr.bf16.gmra.mxu0 %v4421_v28  ;;  %v3451_v28 = vsel %vm6190_vm5, %v3449_v60, %v3450_v61 }
 0x3f8   : > { %5171 = vmatpush3.bf16.msra.mxu0 %v5490_v56  ;;  %5155 = vmatmul.mubr.bf16.gmra.mxu1 %v4437_v1  ;;  %v3369_v56 = vld [vmem:[#allocation2 + $0xb4] sm:$0xe] }
 0x3f9   : > { %5172 = vmatprep.subr.bf16.mxu0 %v5493_v7  ;;  %5174 = vmatprep.mubr.bf16.mxu0 %v4454_v8  ;;  %v4453_v43 = vrot.slane %v3369_v56, 9  ;;  %v5495_v1 = vld [vmem:[#allocation11 + $0x30] sm:$0xff]  }
 0x3fa   : > { %5192 = vmatprep.subr.bf16.mxu1 %v5495_v1 }
 0x3fb   : > { %v3448_v62 = vsel %vm6190_vm5, %v4453_v43, %v3447_v51  ;;  %5193 = vmatpush3.bf16.msra.mxu1 %v5495_v1 }
 0x3fc   : > { %5173 = vmatpush3.bf16.msra.mxu0 %v5493_v7  ;;  %v4461_v63 = vcombine.low %v3448_v62, %v3451_v28  ;;  %5194 = vmatprep.subr.bf16.mxu1 %v5496_v3 }
 0x3ff   : > { %5175 = vmatmul.mubr.bf16.vlgmr.msra.gmra.mxu0 %v4455_v24  ;;  %5195 = vmatpush3.bf16.msra.mxu1 %v5496_v3 }
 0x400   : > { %5178 = vmatprep.mubr.bf16.mxu0 %v4456_v25  ;;  %5196 = vmatprep.subr.bf16.mxu1 %v5497_v4  ;;  %v5501_v25 = vld [vmem:[#allocation11] sm:$0xff]  }
 0x403   : > { %5197 = vmatpush3.bf16.msra.mxu1 %v5497_v4 }
 0x404   : > { %5198 = vmatprep.subr.bf16.mxu1 %v5498_v5 }
 0x407   : > { %5179 = vmatmul.mubr.bf16.gmra.mxu0 %v4457_v41  ;;  %5199 = vmatpush3.bf16.msra.mxu1 %v5498_v5 }
 0x408   : > { %5182 = vmatprep.mubr.bf16.mxu0 %v4458_v42  ;;  %5200 = vmatprep.subr.bf16.mxu1 %v5499_v10 }
 0x40b   : > { %5201 = vmatpush3.bf16.msra.mxu1 %v5499_v10 }
 0x40c   : > { %5202 = vmatprep.subr.bf16.mxu1 %v5500_v19 }
 0x40f   : > { %5183 = vmatmul.mubr.bf16.gmra.mxu0 %v4459_v58  ;;  %5203 = vmatpush3.bf16.msra.mxu1 %v5500_v19 }
 0x410   : > { %5186 = vmatprep.mubr.bf16.mxu0 %v4460_v59  ;;  %5204 = vmatprep.subr.bf16.mxu1 %v5501_v25 }
 0x413   : > { %5205 = vmatpush3.bf16.msra.mxu1 %v5501_v25 }
 0x417   : > { %5187 = vmatmul.mubr.bf16.gmra.mxu0 %v4461_v63 }
 0x43f   : > { %v4920_v6 = vpop.f32.mrf.mxu0 }
 0x440   : > { %v4952_v7 = vpop.f32.mrf.mxu1 }
 0x441   : > { %v1582_v20 = vadd.f32 %v4952_v7, %v4920_v6  ;;  %v1396_v8 = vpop.f32.mrf.mxu0 }
 0x442   : > { %v1573_v9 = vpop.f32.mrf.mxu1 }
 0x443   : > { %v1574_v11 = vadd.f32 %v1573_v9, %v1396_v8  ;;  %v4921_v12 = vpop.f32.mrf.mxu0 }
 0x444   : > { %v4953_v13 = vpop.f32.mrf.mxu1 }
 0x445   : > { %v1585_v15 = vadd.f32 %v4953_v13, %v4921_v12  ;;  %v1399_v17 = vpop.f32.mrf.mxu0 }
 0x446   : > { %v1576_v18 = vpop.f32.mrf.mxu1 }
 0x447   : > { %v1577_v21 = vadd.f32 %v1576_v18, %v1399_v17  ;;  %v4924_v53 = vpop.f32.mrf.mxu0 }
 0x448   : > { %v4956_v14 = vpop.f32.mrf.mxu1 }
 0x449   : > { %v1598_v22 = vadd.f32 %v4956_v14, %v4924_v53  ;;  %v1412_v23 = vpop.f32.mrf.mxu0 }
 0x44a   : > { %v1589_v24 = vpop.f32.mrf.mxu1 }
 0x44b   : > { %v1590_v26 = vadd.f32 %v1589_v24, %v1412_v23  ;;  %v4925_v27 = vpop.f32.mrf.mxu0 }
 0x44c   : > { %v4957_v29 = vpop.f32.mrf.mxu1 }
 0x44d   : > { %v1601_v31 = vadd.f32 %v4957_v29, %v4925_v27  ;;  %v1415_v55 = vpop.f32.mrf.mxu0 }
 0x44e   : > { %v1592_v32 = vpop.f32.mrf.mxu1 }
 0x44f   : > { %v1593_v33 = vadd.f32 %v1592_v32, %v1415_v55  ;;  %v4928_v16 = vpop.f32.mrf.mxu0 }
 0x450   : > { %v4960_v34 = vpop.f32.mrf.mxu1 }
 0x451   : > { %v1614_v35 = vadd.f32 %v4960_v34, %v4928_v16  ;;  %v1428_v36 = vpop.f32.mrf.mxu0 }
 0x452   : > { %v1605_v37 = vpop.f32.mrf.mxu1 }
 0x453   : > { %v1606_v38 = vadd.f32 %v1605_v37, %v1428_v36  ;;  %v4929_v39 = vpop.f32.mrf.mxu0 }
 0x454   : > { %v4961_v40 = vpop.f32.mrf.mxu1 }
 0x455   : > { %v1617_v41 = vadd.f32 %v4961_v40, %v4929_v39  ;;  %v1431_v42 = vpop.f32.mrf.mxu0 }
 0x456   : > { %v1608_v44 = vpop.f32.mrf.mxu1 }
 0x457   : > { %v1609_v45 = vadd.f32 %v1608_v44, %v1431_v42  ;;  %v4932_v46 = vpop.f32.mrf.mxu0 }
 0x458   : > { %v4964_v47 = vpop.f32.mrf.mxu1 }
 0x459   : > { %v1630_v48 = vadd.f32 %v4964_v47, %v4932_v46  ;;  %v1444_v49 = vpop.f32.mrf.mxu0 }
 0x45a   : > { %v1621_v50 = vpop.f32.mrf.mxu1 }
 0x45b   : > { %v1622_v30 = vadd.f32 %v1621_v50, %v1444_v49  ;;  %v4933_v0 = vpop.f32.mrf.mxu0 }
 0x45c   : > { %v4965_v51 = vpop.f32.mrf.mxu1 }
 0x45d   : > { %v1633_v52 = vadd.f32 %v4965_v51, %v4933_v0  ;;  %v1447_v54 = vpop.f32.mrf.mxu0 }
 0x45e   : > { %v1624_v56 = vpop.f32.mrf.mxu1 }
 0x45f   : > { %v1625_v57 = vadd.f32 %v1624_v56, %v1447_v54  ;;  %v4984_v58 = vpop.f32.mrf.mxu0 }
 0x460   : > { %v6408_v59 = vadd.f32 %v4984_v58, %v1582_v20  ;;  %v6410_v43 = vpop.f32.mrf.mxu1 }
 0x461   : > { %v1874_v60 = vpop.f32.mrf.mxu0 }
 0x462   : > { %v6412_v61 = vadd.f32 %v1874_v60, %v1574_v11  ;;  %v6414_v62 = vpop.f32.mrf.mxu1 }
 0x463   : > { %v4985_v28 = vpop.f32.mrf.mxu0 }
 0x464   : > { %v6416_v63 = vadd.f32 %v4985_v28, %v1585_v15  ;;  %v6418_v2 = vpop.f32.mrf.mxu1 }
 0x465   : > { %v1877_v1 = vpop.f32.mrf.mxu0 }
 0x466   : > { %v6420_v3 = vadd.f32 %v1877_v1, %v1577_v21  ;;  %v6422_v4 = vpop.f32.mrf.mxu1 }
 0x467   : > { %v4988_v5 = vpop.f32.mrf.mxu0 }
 0x468   : > { %v6424_v6 = vadd.f32 %v4988_v5, %v1598_v22  ;;  %v6426_v7 = vpop.f32.mrf.mxu1 }
 0x469   : > { %v1890_v20 = vpop.f32.mrf.mxu0 }
 0x46a   : > { %v6428_v8 = vadd.f32 %v1890_v20, %v1590_v26  ;;  %v6430_v9 = vpop.f32.mrf.mxu1 }
 0x46b   : > { %v4989_v10 = vpop.f32.mrf.mxu0 }
 0x46c   : > { %v6432_v11 = vadd.f32 %v4989_v10, %v1601_v31  ;;  %v6434_v12 = vpop.f32.mrf.mxu1 }
 0x46d   : > { %v1893_v13 = vpop.f32.mrf.mxu0 }
 0x46e   : > { %v6436_v15 = vadd.f32 %v1893_v13, %v1593_v33  ;;  %v6438_v17 = vpop.f32.mrf.mxu1 }
 0x46f   : > { %v4992_v18 = vpop.f32.mrf.mxu0 }
 0x470   : > { %v6440_v19 = vadd.f32 %v4992_v18, %v1614_v35  ;;  %v6442_v21 = vpop.f32.mrf.mxu1 }
 0x471   : > { %v1906_v53 = vpop.f32.mrf.mxu0 }
 0x472   : > { %v6444_v14 = vadd.f32 %v1906_v53, %v1606_v38  ;;  %v6446_v22 = vpop.f32.mrf.mxu1 }
 0x473   : > { %v4993_v23 = vpop.f32.mrf.mxu0 }
 0x474   : > { %v6448_v24 = vadd.f32 %v4993_v23, %v1617_v41  ;;  %v6450_v25 = vpop.f32.mrf.mxu1 }
 0x475   : > { %v1909_v26 = vpop.f32.mrf.mxu0 }
 0x476   : > { %v6452_v27 = vadd.f32 %v1909_v26, %v1609_v45  ;;  %v6454_v29 = vpop.f32.mrf.mxu1 }
 0x477   : > { %v4996_v31 = vpop.f32.mrf.mxu0 }
 0x478   : > { %v6456_v55 = vadd.f32 %v4996_v31, %v1630_v48  ;;  %v6458_v32 = vpop.f32.mrf.mxu1 }
 0x479   : > { %v1922_v33 = vpop.f32.mrf.mxu0 }
 0x47a   : > { %v6460_v16 = vadd.f32 %v1922_v33, %v1622_v30  ;;  %v6462_v34 = vpop.f32.mrf.mxu1 }
 0x47b   : > { %6791 = vst [vmem:[#allocation31_spill] sm:$0xff] %v6462_v34  ;;  %v4997_v35 = vpop.f32.mrf.mxu0 }
 0x47c   : > { %v6464_v36 = vadd.f32 %v4997_v35, %v1633_v52  ;;  %v6466_v37 = vpop.f32.mrf.mxu1 }
 0x47d   : > { %6793 = vst [vmem:[#allocation33_spill] sm:$0xff] %v6466_v37  ;;  %v1925_v38 = vpop.f32.mrf.mxu0 }
 0x47e   : > { %6792 = vst [vmem:[#allocation32_spill] sm:$0xff] %v6464_v36  ;;  %v6468_v39 = vadd.f32 %v1925_v38, %v1625_v57  ;;  %v6470_v40 = vpop.f32.mrf.mxu1 }
 0x47f   : > { %6795 = vst [vmem:[#allocation35_spill] sm:$0xff] %v6470_v40  ;;  %v5048_v41 = vpop.f32.mrf.mxu0 }
 0x480   : > { %6794 = vst [vmem:[#allocation34_spill] sm:$0xff] %v6468_v39  ;;  %v5080_v42 = vpop.f32.mrf.mxu1 }
 0x481   : > { %v2414_v44 = vpop.f32.mrf.mxu0 }
 0x482   : > { %v2728_v45 = vpop.f32.mrf.mxu1 }
 0x483   : > { %v5049_v46 = vpop.f32.mrf.mxu0 }
 0x484   : > { %v6472_v47 = vpop.f32.mrf.mxu1 }
 0x485   : > { %v2417_v48 = vpop.f32.mrf.mxu0 }
 0x486   : > { %v6474_v49 = vpop.f32.mrf.mxu1 }
 0x487   : > { %v5052_v50 = vpop.f32.mrf.mxu0 }
 0x488   : > { %v6476_v30 = vpop.f32.mrf.mxu1 }
 0x489   : > { %v2430_v0 = vpop.f32.mrf.mxu0 }
 0x48a   : > { %v6478_v51 = vpop.f32.mrf.mxu1 }
 0x48b   : > { %v6480_v52 = vpop.f32.mrf.mxu0 }
 0x48c   : > { %v6482_v54 = vpop.f32.mrf.mxu1 }
 0x48d   : > { %v6484_v56 = vpop.f32.mrf.mxu0 }
 0x48e   : > { %v6486_v57 = vpop.f32.mrf.mxu1 }
 0x48f   : > { %6796 = vst [vmem:[#allocation36_spill] sm:$0xff] %v6486_v57  ;;  %v6488_v58 = vpop.f32.mrf.mxu0 }
 0x490   : > { %v6490_v60 = vpop.f32.mrf.mxu1 }
 0x491   : > { %6797 = vst [vmem:[#allocation37_spill] sm:$0xff] %v6490_v60  ;;  %v6492_v28 = vpop.f32.mrf.mxu0 }
 0x492   : > { %6798 = vst [vmem:[#allocation38_spill] sm:$0xff] %v6492_v28  ;;  %v6494_v1 = vpop.f32.mrf.mxu1  ;;  %v2251_v28 = vadd.f32 %v6414_v62, %v6412_v61  ;;  %v2257_v61 = vadd.f32 %v6426_v7, %v6424_v6 }
 0x493   : > { %6799 = vst [vmem:[#allocation39_spill] sm:$0xff] %v6494_v1  ;;  %v6496_v5 = vpop.f32.mrf.mxu0 }
 0x494   : > { %6800 = vst [vmem:[#allocation40_spill] sm:$0xff] %v6496_v5  ;;  %v6498_v20 = vpop.f32.mrf.mxu1  ;;  %v2253_v5 = vadd.f32 %v6410_v43, %v6408_v59 }
 0x495   : > { %6801 = vst [vmem:[#allocation41_spill] sm:$0xff] %v6498_v20  ;;  %v6500_v10 = vpop.f32.mrf.mxu0 }
 0x496   : > { %6802 = vst [vmem:[#allocation42_spill] sm:$0xff] %v6500_v10  ;;  %v6502_v13 = vpop.f32.mrf.mxu1  ;;  %v2479_v57 = vadd.f32 %v5048_v41, %v2253_v5 }
 0x497   : > { %6803 = vst [vmem:[#allocation43_spill] sm:$0xff] %v6502_v13  ;;  %v6504_v18 = vpop.f32.mrf.mxu0 }
 0x498   : > { %6804 = vst [vmem:[#allocation44_spill] sm:$0xff] %v6504_v18  ;;  %v6506_v53 = vpop.f32.mrf.mxu1  ;;  %v2793_v59 = vadd.f32 %v5080_v42, %v2479_v57  ;;  %v2258_v42 = vadd.f32 %v6434_v12, %v6432_v11  ;;  %v2261_v12 = vadd.f32 %v6442_v21, %v6440_v19 }
 0x499   : > { %6805 = vst [vmem:[#allocation45_spill] sm:$0xff] %v6506_v53  ;;  %v6508_v23 = vpop.f32.mrf.mxu0 }
 0x49a   : > { %6806 = vst [vmem:[#allocation46_spill] sm:$0xff] %v6508_v23  ;;  %v6510_v26 = vpop.f32.mrf.mxu1 }
 0x49b   : > { %6807 = vst [vmem:[#allocation47_spill] sm:$0xff] %v6510_v26  ;;  %v6512_v31 = vpop.f32.mrf.mxu0 }
 0x49c   : > { %6808 = vst [vmem:[#allocation48_spill] sm:$0xff] %v6512_v31  ;;  %v6514_v33 = vpop.f32.mrf.mxu1 }
 0x49d   : > { %6809 = vst [vmem:[#allocation49_spill] sm:$0xff] %v6514_v33  ;;  %v6516_v35 = vpop.f32.mrf.mxu0 }
 0x49e   : > { %6810 = vst [vmem:[#allocation50_spill] sm:$0xff] %v6516_v35  ;;  %v6518_v38 = vpop.f32.mrf.mxu1 }
 0x49f   : > { %6811 = vst [vmem:[#allocation51_spill] sm:$0xff] %v6518_v38  ;;  %v5112_v40 = vpop.f32.mrf.mxu0 }
 0x4a0   : > { %v5144_v39 = vpop.f32.mrf.mxu1  ;;  %v3108_v5 = vadd.f32 %v5112_v40, %v2793_v59 }
 0x4a1   : > { %v3043_v20 = vpop.f32.mrf.mxu0 }
 0x4a2   : > { %v3269_v13 = vpop.f32.mrf.mxu1  ;;  %v3334_v7 = vadd.f32 %v5144_v39, %v3108_v5 }
 0x4a3   : > { %v5113_v37 = vpop.f32.mrf.mxu0 }
 0x4a4   : > { %v5145_v36 = vpop.f32.mrf.mxu1 }
 0x4a5   : > { %v3046_v18 = vpop.f32.mrf.mxu0 }
 0x4a6   : > { %v3272_v10 = vpop.f32.mrf.mxu1 }
 0x4a7   : > { %v5116_v53 = vpop.f32.mrf.mxu0 }
 0x4a8   : > { %v6522_v26 = vpop.f32.mrf.mxu1 }
 0x4a9   : > { %v3059_v23 = vpop.f32.mrf.mxu0  ;;  %6813 = vst [vmem:[#allocation53_spill] sm:$0xff] %v6522_v26 }
 0x4aa   : > { %v6528_v35 = vpop.f32.mrf.mxu1 }
 0x4ab   : > { %v6520_v1 = vpop.f32.mrf.mxu0  ;;  %6816 = vst [vmem:[#allocation56_spill] sm:$0xff] %v6528_v35 }
 0x4ac   : > { %6812 = vst [vmem:[#allocation52_spill] sm:$0xff] %v6520_v1  ;;  %v6538_v1 = vpop.f32.mrf.mxu1 }
 0x4ad   : > { %v6524_v31 = vpop.f32.mrf.mxu0 }
 0x4ae   : > { %6814 = vst [vmem:[#allocation54_spill] sm:$0xff] %v6524_v31  ;;  %v2477_v31 = vadd.f32 %v2414_v44, %v2251_v28 }
 0x4af   : > { %v6526_v33 = vpop.f32.mrf.mxu0 }
 0x4b0   : > { %6815 = vst [vmem:[#allocation55_spill] sm:$0xff] %v6526_v33  ;;  %v2254_v33 = vadd.f32 %v6418_v2, %v6416_v63  ;;  %v2791_v62 = vadd.f32 %v2728_v45, %v2477_v31  ;;  %v2255_v63 = vadd.f32 %v6430_v9, %v6428_v8  ;;  %v2256_v8 = vadd.f32 %v6438_v17, %v6436_v15  ;;  %v6581_v15 = vld [vmem:[%s6748_s5] ss:$0 sm:$0xff] }
 0x4b1   : > { %v6530_v38 = vpop.f32.mrf.mxu0  ;;  %v2484_v9 = vadd.f32 %v6480_v52, %v2258_v42 }
 0x4b2   : > { %6817 = vst [vmem:[#allocation57_spill] sm:$0xff] %v6530_v38  ;;  %v2252_v38 = vadd.f32 %v6422_v4, %v6420_v3  ;;  %v2480_v43 = vadd.f32 %v5049_v46, %v2254_v33  ;;  %v2483_v3 = vadd.f32 %v5052_v50, %v2257_v61  ;;  %v3106_v4 = vadd.f32 %v3043_v20, %v2791_v62 }
 0x4b3   : > { %v6534_v60 = vpop.f32.mrf.mxu0  ;;  %v2481_v46 = vadd.f32 %v2430_v0, %v2255_v63  ;;  %v2259_v0 = vadd.f32 %v6446_v22, %v6444_v14  ;;  %v2260_v14 = vadd.f32 %v6454_v29, %v6452_v27  ;;  %v2798_v22 = vadd.f32 %v6482_v54, %v2484_v9  ;;  %v6822_v29 = vld [vmem:[#allocation52_spill] sm:$0xff]  ;;  %v6829_v9 = vld [vmem:[#allocation42_spill] sm:$0xff] }
 0x4b4   : > { %6818 = vst [vmem:[#allocation58_spill] sm:$0xff] %v6534_v60  ;;  %v6548_v60 = vpop.f32.mrf.mxu1  ;;  %v2478_v41 = vadd.f32 %v2417_v48, %v2252_v38  ;;  %v2794_v44 = vadd.f32 %v6472_v47, %v2480_v43  ;;  %v2797_v47 = vadd.f32 %v6476_v30, %v2483_v3  ;;  %v3332_v48 = vadd.f32 %v3269_v13, %v3106_v4  ;;  %v6821_v38 = vld [vmem:[#allocation38_spill] sm:$0xff] }
 0x4b5   : > { %v6540_v26 = vpop.f32.mrf.mxu0  ;;  %v2795_v39 = vadd.f32 %v6478_v51, %v2481_v46  ;;  %v2262_v30 = vadd.f32 %v6450_v25, %v6448_v24  ;;  %v2487_v51 = vadd.f32 %v6488_v58, %v2261_v12  ;;  %v2265_v13 = vadd.f32 %v6458_v32, %v6456_v55  ;;  %v6819_v24 = vld [vmem:[#allocation31_spill] sm:$0xff] }
 0x4b6   : > { %v6561_v57 = vpop.f32.mrf.mxu1  ;;  %v2792_v6 = vadd.f32 %v6474_v49, %v2478_v41  ;;  %v3109_v40 = vadd.f32 %v5113_v37, %v2794_v44  ;;  %v2482_v37 = vadd.f32 %v6484_v56, %v2256_v8  ;;  %v3112_v19 = vadd.f32 %v5116_v53, %v2797_v47  ;;  %v6825_v41 = vld [vmem:[#allocation40_spill] sm:$0xff]  ;;  %v6827_v44 = vld [vmem:[#allocation54_spill] sm:$0xff] }
 0x4b7   : > { %v6544_v35 = vpop.f32.mrf.mxu0  ;;  %v3110_v56 = vadd.f32 %v3059_v23, %v2795_v39  ;;  %v2263_v25 = vadd.f32 %v6819_v24, %v6460_v16  ;;  %v2485_v27 = vadd.f32 %v6821_v38, %v2259_v0  ;;  %v3113_v54 = vadd.f32 %v6822_v29, %v2798_v22  ;;  %v6823_v23 = vld [vmem:[#allocation53_spill] sm:$0xff]  ;;  %v6826_v16 = vld [vmem:[#allocation56_spill] sm:$0xff] }
 0x4b8   : > { %v3107_v50 = vadd.f32 %v3046_v18, %v2792_v6  ;;  %v6576_v49 = vpop.f32.mrf.mxu1  ;;  %v3335_v52 = vadd.f32 %v5145_v36, %v3109_v40  ;;  %v6820_v36 = vld [vmem:[#allocation36_spill] sm:$0xff]  ;;  %v3338_v43 = vadd.f32 %v6823_v23, %v3112_v19  ;;  %v2488_v5 = vadd.f32 %v6825_v41, %v2262_v30  ;;  %v6828_v40 = vld [vmem:[#allocation39_spill] sm:$0xff] }
 0x4b9   : > { %v6550_v34 = vpop.f32.mrf.mxu0  ;;  %v2796_v53 = vadd.f32 %v6820_v36, %v2482_v37  ;;  %v3336_v63 = vadd.f32 %v6826_v16, %v3110_v56  ;;  %v2799_v8 = vadd.f32 %v6828_v40, %v2485_v27  ;;  %v3339_v47 = vadd.f32 %v6538_v1, %v3113_v54  ;;  %v6831_v30 = vld [vmem:[#allocation32_spill] sm:$0xff]  ;;  %v6836_v36 = vld [vmem:[#allocation34_spill] sm:$0xff]  ;;  %v6838_v27 = vld [vmem:[#allocation43_spill] sm:$0xff] }
 0x4ba   : > { %v3333_v18 = vadd.f32 %v3272_v10, %v3107_v50  ;;  %v5153_v59 = vpop.f32.mrf.mxu1  ;;  %v6824_v10 = vld [vmem:[#allocation37_spill] sm:$0xff]  ;;  %v6839_v54 = vld [vmem:[#allocation46_spill] sm:$0xff] }
 0x4bb   : > { %v6556_v2 = vpop.f32.mrf.mxu0  ;;  %v2801_v62 = vadd.f32 %v6824_v10, %v2487_v51  ;;  %v3111_v3 = vadd.f32 %v6827_v44, %v2796_v53  ;;  %v6834_v51 = vld [vmem:[#allocation44_spill] sm:$0xff]  ;;  %v6837_v53 = vld [vmem:[#allocation35_spill] sm:$0xff]  ;;  %v6840_v23 = vld [vmem:[#allocation58_spill] sm:$0xff] }
 0x4bc   : > { %v2491_v56 = vadd.f32 %v6834_v51, %v2265_v13  ;;  %v2264_v38 = vadd.f32 %v6837_v53, %v6836_v36 }
 0x4bd   : > { %v6563_v28 = vpop.f32.mrf.mxu0  ;;  %v3337_v1 = vadd.f32 %v6548_v60, %v3111_v3 }
 0x4bf   : > { %v5176_v45 = vpop.f32.mrf.mxu0 }
 0x4c0   : > { %v3648_v11 = vadd.f32 %v5176_v45, %v3334_v7  ;;  %v2486_v45 = vadd.f32 %v6829_v9, %v2260_v14 }
 0x4c1   : > { %v3583_v17 = vpop.f32.mrf.mxu0 }
 0x4c2   : > { %v3646_v21 = vadd.f32 %v3583_v17, %v3332_v48  ;;  %v3671_v31 = vadd.f32 %v6581_v15, %v3648_v11  ;;  %v6830_v48 = vld [vmem:[#allocation55_spill] sm:$0xff]  ;;  %v3304_v11 = vpop.f32.mrf.mxu1  ;;  %v2800_v29 = vadd.f32 %v6838_v27, %v2486_v45 }
 0x4c3   : > { %v5177_v20 = vpop.f32.mrf.mxu0  ;;  %v3116_v50 = vadd.f32 %v6830_v48, %v2801_v62  ;;  %v6841_v62 = vld [vmem:[#allocation45_spill] sm:$0xff] }
 0x4c4   : > { %v3649_v33 = vadd.f32 %v5177_v20, %v3335_v52  ;;  %v3669_v61 = vadd.f32 %v6581_v15, %v3646_v21  ;;  %v3687_v42 = vmax.f32 %v3671_v31, 0.0  ;;  %v6832_v52 = vld [vmem:[#allocation33_spill] sm:$0xff]  ;;  %v2805_v41 = vadd.f32 %v6841_v62, %v2491_v56 }
 0x4c5   : > { %v3586_v58 = vpop.f32.mrf.mxu0  ;;  %v2266_v19 = vadd.f32 %v6832_v52, %v6831_v30  ;;  %v6833_v21 = vld [vmem:[#allocation41_spill] sm:$0xff] }
 0x4c6   : > { %v3672_v55 = vadd.f32 %v6581_v15, %v3649_v33  ;;  %v3647_v32 = vadd.f32 %v3586_v58, %v3333_v18  ;;  %v3685_v0 = vmax.f32 %v3669_v61, 0.0  ;;  %v2802_v22 = vadd.f32 %v6833_v21, %v2488_v5  ;;  %v6835_v20 = vld [vmem:[#allocation57_spill] sm:$0xff]  ;;  %v5156_v61 = vpop.f32.mrf.mxu1  ;;  %v6842_v5 = vld [vmem:[#allocation48_spill] sm:$0xff]  ;;  %v6846_v21 = vld [vmem:[#allocation51_spill] sm:$0xff] }
 0x4c7   : > { %v5180_v4 = vpop.f32.mrf.mxu0  ;;  %v3114_v18 = vadd.f32 %v6835_v20, %v2799_v8  ;;  %v2489_v58 = vadd.f32 %v6839_v54, %v2263_v25  ;;  %v2492_v16 = vadd.f32 %v6842_v5, %v2266_v19  ;;  %v3115_v25 = vadd.f32 %v6540_v26, %v2800_v29 }
 0x4c8   : > { %v3688_v46 = vmax.f32 %v3672_v55, 0.0  ;;  %v3670_v6 = vadd.f32 %v6581_v15, %v3647_v32  ;;  %v3652_v7 = vadd.f32 %v5180_v4, %v3338_v43  ;;  %v3117_v43 = vadd.f32 %v6840_v23, %v2802_v22  ;;  %v3317_v45 = vpop.f32.mrf.mxu1 }
 0x4c9   : > { %v3599_v12 = vpop.f32.mrf.mxu0  ;;  %v3342_v55 = vadd.f32 %v6561_v57, %v3116_v50  ;;  %v3120_v9 = vadd.f32 %v6544_v35, %v2805_v41 }
 0x4ca   : > { %v3702_v39 = vpack.c.bf16 %v3688_v46, %v3687_v42  ;;  %v3686_v37 = vmax.f32 %v3670_v6, 0.0  ;;  %v3650_v17 = vadd.f32 %v3599_v12, %v3336_v63  ;;  %v3675_v31 = vadd.f32 %v6581_v15, %v3652_v7  ;;  %v6843_v46 = vld [vmem:[#allocation47_spill] sm:$0xff]  ;;  %v6844_v7 = vld [vmem:[#allocation50_spill] sm:$0xff]  ;;  %v6845_v12 = vld [vmem:[#allocation49_spill] sm:$0xff]  ;;  %v5157_v22 = vpop.f32.mrf.mxu1 }
 0x4cb   : > { %v5181_v14 = vpop.f32.mrf.mxu0  ;;  %v3340_v63 = vadd.f32 %v6576_v49, %v3114_v18  ;;  %v2803_v6 = vadd.f32 %v6843_v46, %v2489_v58  ;;  %v2490_v40 = vadd.f32 %v6844_v7, %v2264_v38  ;;  %v3343_v8 = vadd.f32 %v5153_v59, %v3117_v43 }
 0x4cc   : > { %v3653_v33 = vadd.f32 %v5181_v14, %v3339_v47  ;;  %v3701_v24 = vpack.c.bf16 %v3686_v37, %v3685_v0  ;;  %v3673_v32 = vadd.f32 %v6581_v15, %v3650_v17  ;;  %v3691_v3 = vmax.f32 %v3675_v31, 0.0  ;;  %v3320_v53 = vpop.f32.mrf.mxu1 }
 0x4cd   : > { %v3602_v13 = vpop.f32.mrf.mxu0  ;;  %v2806_v0 = vadd.f32 %v6845_v12, %v2492_v16  ;;  %v3341_v17 = vadd.f32 %v3304_v11, %v3115_v25  ;;  %v2804_v59 = vadd.f32 %v6846_v21, %v2490_v40  ;;  %v3346_v56 = vadd.f32 %v5156_v61, %v3120_v9 }
 0x4ce   : > { %v3676_v60 = vadd.f32 %v6581_v15, %v3653_v33  ;;  %v3651_v10 = vadd.f32 %v3602_v13, %v3337_v1  ;;  %5206 = vmatprep.mubr.bf16.mxu1 %v3701_v24  ;;  %v3689_v48 = vmax.f32 %v3673_v32, 0.0 }
 0x4cf   : > { %v5184_v44 = vpop.f32.mrf.mxu0  ;;  %5207 = vmatmul.mubr.bf16.vlgmr.msra.gmra.mxu1 %v3702_v39  ;;  %v3118_v39 = vadd.f32 %v6550_v34, %v2803_v6  ;;  %v3121_v35 = vadd.f32 %v6556_v2, %v2806_v0  ;;  %v3119_v11 = vadd.f32 %v6563_v28, %v2804_v59 }
 0x4d0   : > { %v3692_v4 = vmax.f32 %v3676_v60, 0.0  ;;  %v3674_v57 = vadd.f32 %v6581_v15, %v3651_v10  ;;  %v3656_v42 = vadd.f32 %v5184_v44, %v3342_v55 }
 0x4d1   : > { %v3615_v47 = vpop.f32.mrf.mxu0  ;;  %v3344_v34 = vadd.f32 %v3317_v45, %v3118_v39  ;;  %v3347_v2 = vadd.f32 %v5157_v22, %v3121_v35  ;;  %v3345_v43 = vadd.f32 %v3320_v53, %v3119_v11  ;;  %v4621_v39 = vld [vmem:[%s6000_s27 + $0x10] sm:$0xff]  }
 0x4d2   : > { %v3690_v49 = vmax.f32 %v3674_v57, 0.0  ;;  %v3654_v50 = vadd.f32 %v3615_v47, %v3340_v63  ;;  %v3704_v26 = vpack.c.bf16 %v3692_v4, %v3691_v3  ;;  %v3679_v30 = vadd.f32 %v6581_v15, %v3656_v42  ;;  %v4620_v3 = vld [vmem:[%s6000_s27 + $0x8] sm:$0xff]   ;;  %v6649_v4 = vld [vmem:[%s6847_s13] ss:$0 sm:$0xff] }
 0x4d3   : > { %v5185_v37 = vpop.f32.mrf.mxu0  ;;  %v4549_v42 = vld [vmem:[%s6000_s27] sm:$0xff]   ;;  %v4554_v46 = vunpack.c.l.bf16 %v4620_v3  ;;  %v4558_v59 = vunpack.c.l.bf16 %v4621_v39 }
 0x4d4   : > { %v3657_v52 = vadd.f32 %v5185_v37, %v3343_v8  ;;  %v3703_v19 = vpack.c.bf16 %v3690_v49, %v3689_v48  ;;  %v3677_v20 = vadd.f32 %v6581_v15, %v3654_v50  ;;  %v3695_v31 = vmax.f32 %v3679_v30, 0.0  ;;  %v4622_v49 = vld [vmem:[%s6000_s27 + $0x18] sm:$0xff]  }
 0x4d5   : > { %v3618_v51 = vpop.f32.mrf.mxu0  ;;  %v4550_v7 = vunpack.c.l.bf16 %v4549_v42  ;;  %v4555_v8 = vunpack.c.h.bf16 %v4620_v3  ;;  %v4551_v48 = vunpack.c.h.bf16 %v4549_v42  ;;  %v4562_v37 = vunpack.c.l.bf16 %v4622_v49 }
 0x4d6   : > { %v3680_v18 = vadd.f32 %v6581_v15, %v3657_v52  ;;  %v3655_v14 = vadd.f32 %v3618_v51, %v3341_v17  ;;  %5210 = vmatprep.mubr.bf16.mxu1 %v3703_v19  ;;  %v3693_v27 = vmax.f32 %v3677_v20, 0.0  ;;  %v4563_v22 = vunpack.c.h.bf16 %v4622_v49 }
 0x4d7   : > { %v5188_v1 = vpop.f32.mrf.mxu0  ;;  %5211 = vmatmul.mubr.bf16.gmra.mxu1 %v3704_v26 }
 0x4d8   : > { %v3696_v33 = vmax.f32 %v3680_v18, 0.0  ;;  %v3678_v24 = vadd.f32 %v6581_v15, %v3655_v14  ;;  %v3660_v36 = vadd.f32 %v5188_v1, %v3346_v56 }
 0x4d9   : > { %v3631_v38 = vpop.f32.mrf.mxu0 }
 0x4da   : > { %v3694_v29 = vmax.f32 %v3678_v24, 0.0  ;;  %v3658_v54 = vadd.f32 %v3631_v38, %v3344_v34  ;;  %v3706_v58 = vpack.c.bf16 %v3696_v33, %v3695_v31  ;;  %v3683_v61 = vadd.f32 %v6581_v15, %v3660_v36  ;;  %v4624_v33 = vld [vmem:[%s6000_s27 + $0x28] sm:$0xff]   ;;  %v4623_v38 = vld [vmem:[%s6000_s27 + $0x20] sm:$0xff]  }
 0x4db   : > { %v5189_v23 = vpop.f32.mrf.mxu0  ;;  %v4559_v31 = vunpack.c.h.bf16 %v4621_v39 }
 0x4dc   : > { %v3661_v13 = vadd.f32 %v5189_v23, %v3347_v2  ;;  %v3705_v28 = vpack.c.bf16 %v3694_v29, %v3693_v27  ;;  %v3681_v32 = vadd.f32 %v6581_v15, %v3658_v54  ;;  %v3699_v62 = vmax.f32 %v3683_v61, 0.0 }
 0x4dd   : > { %v3634_v55 = vpop.f32.mrf.mxu0  ;;  %v4570_v27 = vunpack.c.l.bf16 %v4624_v33  ;;  %v4566_v61 = vunpack.c.l.bf16 %v4623_v38 }
 0x4de   : > { %v3684_v60 = vadd.f32 %v6581_v15, %v3661_v13  ;;  %v3659_v10 = vadd.f32 %v3634_v55, %v3345_v43  ;;  %5214 = vmatprep.mubr.bf16.mxu1 %v3705_v28  ;;  %v3697_v16 = vmax.f32 %v3681_v32, 0.0  ;;  %v4571_v28 = vunpack.c.h.bf16 %v4624_v33 }
 0x4df   : > { %5215 = vmatmul.mubr.bf16.gmra.mxu1 %v3706_v58 }
 0x4e0   : > { %v3700_v41 = vmax.f32 %v3684_v60, 0.0  ;;  %v3682_v5 = vadd.f32 %v6581_v15, %v3659_v10 }
 0x4e2   : > { %v3698_v63 = vmax.f32 %v3682_v5, 0.0  ;;  %v3708_v25 = vpack.c.bf16 %v3700_v41, %v3699_v62 }
 0x4e4   : > { %v3707_v44 = vpack.c.bf16 %v3698_v63, %v3697_v16  ;;  %v4567_v63 = vunpack.c.h.bf16 %v4623_v38 }
 0x4e6   : > { %5218 = vmatprep.mubr.bf16.mxu1 %v3707_v44 }
 0x4e7   : > { %5219 = vmatmul.mubr.bf16.gmra.mxu1 %v3708_v25  ;;  %v4626_v25 = vld [vmem:[%s6000_s27 + $0x38] sm:$0xff]  }
 0x58f   : > { %v5208_v57 = vpop.f32.mrf.mxu1 }
 0x590   : > { %v3855_v6 = vadd.f32 %v5208_v57, %v6649_v4 }
 0x591   : > { %v3846_v15 = vpop.f32.mrf.mxu1 }
 0x592   : > { %v3847_v40 = vadd.f32 %v6649_v4, %v3846_v15  ;;  %v3911_v45 = vadd.f32 %v4554_v46, %v3855_v6  ;;  %v4625_v46 = vld [vmem:[%s6000_s27 + $0x30] sm:$0xff]   ;;  %v4578_v6 = vunpack.c.l.bf16 %v4626_v25 }
 0x593   : > { %v5209_v9 = vpop.f32.mrf.mxu1 }
 0x594   : > { %v3858_v47 = vadd.f32 %v5209_v9, %v6649_v4  ;;  %v3909_v26 = vadd.f32 %v4550_v7, %v3847_v40  ;;  %v3927_v30 = vmax.f32 %v3911_v45, 0.0  ;;  %v4574_v45 = vunpack.c.l.bf16 %v4625_v46 }
 0x595   : > { %v3849_v50 = vpop.f32.mrf.mxu1 }
 0x596   : > { %v3912_v12 = vadd.f32 %v4555_v8, %v3858_v47  ;;  %v3850_v0 = vadd.f32 %v6649_v4, %v3849_v50  ;;  %v3925_v51 = vmax.f32 %v3909_v26, 0.0 }
 0x597   : > { %v5212_v17 = vpop.f32.mrf.mxu1 }
 0x598   : > { %v3928_v52 = vmax.f32 %v3912_v12, 0.0  ;;  %v3910_v19 = vadd.f32 %v4551_v48, %v3850_v0  ;;  %v3871_v21 = vadd.f32 %v5212_v17, %v6649_v4  ;;  %v4579_v48 = vunpack.c.h.bf16 %v4626_v25 }
 0x599   : > { %v3862_v35 = vpop.f32.mrf.mxu1 }
 0x59a   : > { %v4588_v56 = vpack.c.bf16 %v3928_v52, %v3927_v30  ;;  %v3926_v20 = vmax.f32 %v3910_v19, 0.0  ;;  %v3863_v18 = vadd.f32 %v6649_v4, %v3862_v35  ;;  %v3915_v11 = vadd.f32 %v4562_v37, %v3871_v21 }
 0x59b   : > { %v5213_v14 = vpop.f32.mrf.mxu1  ;;  %v4575_v30 = vunpack.c.h.bf16 %v4625_v46 }
 0x59c   : > { %4627 = vst [vmem:[%s6109_s20 + $0x8] sm:$0xff] %v4588_v56   ;;  %v4583_v34 = vpack.c.bf16 %v3926_v20, %v3925_v51  ;;  %v3874_v1 = vadd.f32 %v5213_v14, %v6649_v4  ;;  %v3913_v36 = vadd.f32 %v4558_v59, %v3863_v18  ;;  %v3931_v54 = vmax.f32 %v3915_v11, 0.0 }
 0x59d   : > { %v3865_v24 = vpop.f32.mrf.mxu1 }
 0x59e   : > { %4584 = vst [vmem:[%s6109_s20] sm:$0xff] %v4583_v34   ;;  %v3916_v2 = vadd.f32 %v4563_v22, %v3874_v1  ;;  %v3866_v53 = vadd.f32 %v6649_v4, %v3865_v24  ;;  %v3929_v55 = vmax.f32 %v3913_v36, 0.0 }
 0x59f   : > { %v5216_v29 = vpop.f32.mrf.mxu1 }
 0x5a0   : > { %v3932_v58 = vmax.f32 %v3916_v2, 0.0  ;;  %v3914_v23 = vadd.f32 %v4559_v31, %v3866_v53  ;;  %v3887_v43 = vadd.f32 %v5216_v29, %v6649_v4 }
 0x5a1   : > { %v3878_v13 = vpop.f32.mrf.mxu1 }
 0x5a2   : > { %v4598_v32 = vpack.c.bf16 %v3932_v58, %v3931_v54  ;;  %v3930_v60 = vmax.f32 %v3914_v23, 0.0  ;;  %v3879_v10 = vadd.f32 %v6649_v4, %v3878_v13  ;;  %v3919_v5 = vadd.f32 %v4570_v27, %v3887_v43 }
 0x5a3   : > { %v5217_v62 = vpop.f32.mrf.mxu1 }
 0x5a4   : > { %4629 = vst [vmem:[%s6109_s20 + $0x18] sm:$0xff] %v4598_v32   ;;  %v4593_v41 = vpack.c.bf16 %v3930_v60, %v3929_v55  ;;  %v3890_v16 = vadd.f32 %v5217_v62, %v6649_v4  ;;  %v3917_v3 = vadd.f32 %v4566_v61, %v3879_v10  ;;  %v3935_v7 = vmax.f32 %v3919_v5, 0.0 }
 0x5a5   : > { %v3881_v44 = vpop.f32.mrf.mxu1 }
 0x5a6   : > { %4628 = vst [vmem:[%s6109_s20 + $0x10] sm:$0xff] %v4593_v41   ;;  %v3920_v57 = vadd.f32 %v4571_v28, %v3890_v16  ;;  %v3882_v42 = vadd.f32 %v6649_v4, %v3881_v44  ;;  %v3933_v49 = vmax.f32 %v3917_v3, 0.0 }
 0x5a7   : > { %v5220_v15 = vpop.f32.mrf.mxu1 }
 0x5a8   : > { %v3936_v40 = vmax.f32 %v3920_v57, 0.0  ;;  %v3918_v8 = vadd.f32 %v4567_v63, %v3882_v42  ;;  %v3903_v9 = vadd.f32 %v5220_v15, %v6649_v4 }
 0x5a9   : > { %v3894_v47 = vpop.f32.mrf.mxu1 }
 0x5aa   : > { %v4608_v50 = vpack.c.bf16 %v3936_v40, %v3935_v7  ;;  %v3934_v26 = vmax.f32 %v3918_v8, 0.0  ;;  %v3895_v12 = vadd.f32 %v6649_v4, %v3894_v47  ;;  %v3923_v37 = vadd.f32 %v4578_v6, %v3903_v9 }
 0x5ab   : > { %v5221_v0 = vpop.f32.mrf.mxu1 }
 0x5ac   : > { %4631 = vst [vmem:[%s6109_s20 + $0x28] sm:$0xff] %v4608_v50   ;;  %v4603_v39 = vpack.c.bf16 %v3934_v26, %v3933_v49  ;;  %v3906_v17 = vadd.f32 %v5221_v0, %v6649_v4  ;;  %v3921_v19 = vadd.f32 %v4574_v45, %v3895_v12  ;;  %v3939_v35 = vmax.f32 %v3923_v37, 0.0 }
 0x5ad   : > { %v3897_v52 = vpop.f32.mrf.mxu1 }
 0x5ae   : > { %4630 = vst [vmem:[%s6109_s20 + $0x20] sm:$0xff] %v4603_v39   ;;  %v3924_v21 = vadd.f32 %v4579_v48, %v3906_v17  ;;  %v3898_v59 = vadd.f32 %v6649_v4, %v3897_v52  ;;  %v3937_v56 = vmax.f32 %v3921_v19, 0.0 }
 0x5b0   : > { %v3940_v22 = vmax.f32 %v3924_v21, 0.0  ;;  %v3922_v51 = vadd.f32 %v4575_v30, %v3898_v59 }
 0x5b2   : > { %v4618_v20 = vpack.c.bf16 %v3940_v22, %v3939_v35  ;;  %v3938_v18 = vmax.f32 %v3922_v51, 0.0 }
 0x5b4   : > { %4633 = vst [vmem:[%s6109_s20 + $0x38] sm:$0xff] %v4618_v20   ;;  %v4613_v14 = vpack.c.bf16 %v3938_v18, %v3937_v56 }
 0x5b6   : > { %4632 = vst [vmem:[%s6109_s20 + $0x30] sm:$0xff] %v4613_v14  }
 0x5b7   : > { %5674 = shalt.err (!%p5671_p5)
}
 0x5b8   : > { %s5675_s2 = scalar_lea.hbm %s6686_s18, 1024  ;;  %s5679_s8 = scalar_lea.hbm %s6849_s22, 4096 }
 0x5b9   : > { %p5676_p6 = scmp.ne.s32.totalorder %s6686_s18, %s5675_s2  ;;  %p5680_p2 = scmp.lt.s32.totalorder %s6686_s18, %s6849_s22 }
 0x5ba   : > { %p5681_p7 = scmp.lt.s32.totalorder %s5679_s8, %s5675_s2 }
 0x5bb   : > { %p5677_p1 = pnand %p5676_p6, %p5954_p13 }
 0x5bc   : > { %p5682_p11 = por %p5681_p7, %p5680_p2 }
 0x5bd   : > { %p5678_p4 = pneg %p5677_p1 }
 0x5bf   : > { %p5683_p9 = pnand %p5682_p11, %p5678_p4 }
 0x5c1   : > { %5686 = shalt.err (!%p5683_p9)
}
 0x5c2   : > { %s5783_s15 = smov 64   ;;  %s5784_s17 = smov 4  }
 0x5c3   : > { %5256 = dma.vmem_to_hbm [thread:$0]  (%p5954_p13), %s6689_s9, 1024, %s6686_s18, %s4022_s21, %s5783_s15, %s5783_s15, %s5784_s17  }
 0x5c4 PF: > { %s6850_s13 = sld [smem:[#allocation26_spill]]  ;;  %p5285_p12 = scmp.ge.s32.totalorder %s5769_s12, 2 }
 0x5c5   : > { %s6851_s19 = sld [smem:[#allocation28_spill]] }
 0x5ca   : > { %s4053_s14 = sand.u32 1, %s6850_s13  }
 0x5cb   : > { %p6852_p10 = scmp.ne.s32.totalorder %s6851_s19, 0  ;;  %s4054_s23 = scalar_lea.sflag [#allocation7], %s4053_s14 }
 0x5cd   : > { %p5273_p0 = pnand %p5285_p12, %p6852_p10 }
 0x5cf   : > { %p5274_p8 = pneg %p5273_p0 }
 0x5d1   : > { %5736 = dma.done.wait (%p5274_p8), %s4054_s23, 1024  }
 0x5d2   : > { %5738 = vsyncadd (%p5274_p8), %s4054_s23, 4294966272  ;;  %s26_s12 = sadd.s32 1, %s5769_s12   ;;  %s6853_s30 = sld [smem:[#allocation27_spill]] }
 0x5d3   : > { %p23_p3 = scmp.ge.s32.totalorder %s26_s12, 6   ;;  %s6854_s10 = sld [smem:[#allocation29_spill]] }
 0x5d4   : > { %s6855_s27 = smov %s5745_s28  ;;  %s6856_s28 = smov %s5749_s29 }
 0x5d5   : > { %s6857_s29 = smov %s5971_s6  ;;  %s6858_s9 = smov %s5765_s11 }
 0x5d6   : > { %s6859_s11 = smov %s6865_s24  ;;  %25 = sbr.rel (!%p23_p3) target bundleno = 15 (0xf), region = 156 }
 0x5db   :  { %4059 = vsyncpa [#allocation6], 1 }
 0x5dc   :  { %4061 = vsyncpa [#allocation6 + $0x1], 1 }
 0x5dd   :  { %4062 = vsyncpa [#allocation9], 1 }
 0x5de   :  { %4063 = vsyncpa [#allocation12], 1 }
 0x5df   :  { %4064 = vsyncpa [#allocation7], 1 }
 0x5e0   :  { %4066 = vsyncpa [#allocation7 + $0x1], 1 }
 0x5e1   :  { %4067 = vsyncmov [#allocation4] }
 0x5e4   :  { %s4068_s18 = vpop.sfrf %4067 }
 0x5e5   :  { %p4503_p13 = scmp.ne.s32.totalorder %s4068_s18, 0 }
 0x5e7   :  { %4072 = shalt.err (%p4503_p13)  }
 0x5e8   :  { %4074 = vsyncmov [#allocation4 + $0x1] }
 0x5eb   :  { %s4075_s6 = vpop.sfrf %4074 }
 0x5ec   :  { %p4504_p5 = scmp.ne.s32.totalorder %s4075_s6, 0 }
 0x5ee   :  { %4079 = shalt.err (%p4504_p5)  }

</bundles_post_ra>
